<compile_context>
chip_gen: v5e
topology: v5e:2x2
jax: 0.10.0
libtpu: 0.0.40
codegen_flags: <defaults>
</compile_context>

<pallas_src>
import functools
import math

import jax
import jax.numpy as jnp
from jax.experimental import pallas as pl
from jax.experimental.pallas import tpu as pltpu


def gnn_kernel(a_ref, h_ref, u_in_ref, u_out_ref, w_hh_ref,
               c_in_ref, c_out_ref, c_base_ref, b_hh_ref,
               out_ref, *, step, hidden_size, seq_len, b_blk):
    H, S, Bb = hidden_size, seq_len, b_blk
    M = Bb * S

    A = a_ref[...]                         # (Bb, S, 2S)  bf16
    a_in = A[..., :S]                      # (Bb, S, S)
    a_out = A[..., S:]                     # (Bb, S, S)

    u_in = u_in_ref[...]                   # (H, 3H)  bf16  = We_in^T @ Wa
    u_out = u_out_ref[...]                 # (H, 3H)  bf16  = We_out^T @ Wb
    w_hh = w_hh_ref[...]                   # (H, 3H)  bf16  = w_hh^T
    c_in = c_in_ref[...]                   # (1, 3H)  f32   = be_in @ Wa
    c_out = c_out_ref[...]                 # (1, 3H)  f32   = be_out @ Wb
    c_base = c_base_ref[...]               # (1, 3H)  f32   = b_iah@Wa + b_oah@Wb + b_ih
    b_hh = b_hh_ref[...]                   # (1, 3H)  f32

    # Step-invariant bias term (A does not change across GNN steps): computed
    # once per grid step, hoisted out of the unrolled loop.
    rs_in = jnp.sum(a_in.astype(jnp.float32), axis=-1, keepdims=True).reshape(M, 1)
    rs_out = jnp.sum(a_out.astype(jnp.float32), axis=-1, keepdims=True).reshape(M, 1)
    gi_bias = rs_in * c_in + rs_out * c_out + c_base          # (M, 3H) f32

    # Carried hidden state in f32; flattened so the MXU matmuls have M rows.
    h = h_ref[...].reshape(M, H).astype(jnp.float32)          # (M, H)

    # `step` is a small static int (opt.step) -> unrolled at trace time.
    # (Would switch to lax.fori_loop only if step became large / runtime.)
    for _ in range(step):
        hb = h.astype(jnp.bfloat16)
        h3 = hb.reshape(Bb, S, H)
        # Per-batch adjacency propagation (batched matmul on the MXU).
        m_in = jnp.einsum("bij,bjh->bih", a_in, h3,
                          preferred_element_type=jnp.float32).reshape(M, H)
        m_out = jnp.einsum("bij,bjh->bih", a_out, h3,
                           preferred_element_type=jnp.float32).reshape(M, H)

        # gi without any concat: two wide dots into one f32 accumulator.
        gi = (jnp.dot(m_in.astype(jnp.bfloat16), u_in,
                      preferred_element_type=jnp.float32)
              + jnp.dot(m_out.astype(jnp.bfloat16), u_out,
                        preferred_element_type=jnp.float32)
              + gi_bias)                                      # (M, 3H)
        gh = jnp.dot(hb, w_hh, preferred_element_type=jnp.float32) + b_hh

        # Reset/input gates from the summed tile (fewer narrow lane slices);
        # the new-gate needs i_n and resetgate*h_n separately.
        s_ri = gi[:, :2 * H] + gh[:, :2 * H]
        resetgate = jax.nn.sigmoid(s_ri[:, :H])
        inputgate = jax.nn.sigmoid(s_ri[:, H:])
        newgate = jnp.tanh(gi[:, 2 * H:] + resetgate * gh[:, 2 * H:])
        h = newgate + inputgate * (h - newgate)

    # NOTE: H=32 < 128 lanes so this store is lane-masked; a lane-dense
    # (Bb, S*H) output would require an in-kernel sublane->lane relayout that
    # costs more than it saves at these shapes (store happens once per block).
    out_ref[...] = h.reshape(Bb, S, H).astype(out_ref.dtype)


def init_params(key, n_node, hidden_size):
    """Deterministic 'uniform' init, matching reset_parameters('uniform')."""
    H = hidden_size
    stdv = 1.0 / math.sqrt(H)
    keys = jax.random.split(key, 16)
    u = lambda k, shape: jax.random.uniform(k, shape, jnp.float32, -stdv, stdv)
    return {
        "embedding": u(keys[0], (n_node, H)),
        # GNN params in PyTorch layout (folded/transposed in the wrapper).
        "w_ih": u(keys[1], (3 * H, 2 * H)),
        "w_hh": u(keys[2], (3 * H, H)),
        "b_ih": u(keys[3], (3 * H,)),
        "b_hh": u(keys[4], (3 * H,)),
        "b_iah": u(keys[5], (H,)),
        "b_oah": u(keys[6], (H,)),
        "we_in": u(keys[7], (H, H)),    # linear_edge_in.weight
        "be_in": u(keys[8], (H,)),      # linear_edge_in.bias
        "we_out": u(keys[9], (H, H)),
        "be_out": u(keys[10], (H,)),
        # linear_edge_f exists in the module but is unused in forward().
        "we_f": u(keys[11], (H, H)),
        "be_f": u(keys[12], (H,)),
    }


def session_graph_forward(item_ids, A, params, step):
    """SessionGraph.forward: embedding lookup (JAX glue) + GGNN cell (Pallas)."""
    H = params["embedding"].shape[1]
    B, S = item_ids.shape

    # ---- fold weights/biases in f32 (wrapper-side, tiny, done once) ----
    w_ih = params["w_ih"]                              # (3H, 2H)
    Wa = w_ih[:, :H].T                                 # (H, 3H)
    Wb = w_ih[:, H:].T                                 # (H, 3H)
    U_in = params["we_in"].T @ Wa                      # (H, 3H)
    U_out = params["we_out"].T @ Wb                    # (H, 3H)
    c_in = params["be_in"][None, :] @ Wa               # (1, 3H)
    c_out = params["be_out"][None, :] @ Wb             # (1, 3H)
    c_base = (params["b_iah"][None, :] @ Wa
              + params["b_oah"][None, :] @ Wb
              + params["b_ih"][None, :])               # (1, 3H)
    w_hh_t = params["w_hh"].T                          # (H, 3H)
    b_hh = params["b_hh"].reshape(1, 3 * H)

    # bf16 operands for the MXU (f32 accumulation inside the kernel).
    u_in_b = U_in.astype(jnp.bfloat16)
    u_out_b = U_out.astype(jnp.bfloat16)
    w_hh_b = w_hh_t.astype(jnp.bfloat16)
    c_in = c_in.astype(jnp.float32)
    c_out = c_out.astype(jnp.float32)
    c_base = c_base.astype(jnp.float32)
    b_hh = b_hh.astype(jnp.float32)

    # Embedding gather stays in JAX; stream activations/adjacency as bf16.
    hidden0 = params["embedding"][item_ids].astype(jnp.bfloat16)   # (B, S, H)
    A_b = A.astype(jnp.bfloat16)                                   # (B, S, 2S)

    # ---- batch blocking so every linear matmul has >= 128 rows ----
    b_blk = max(1, pl.cdiv(128, S))          # e.g. 16 for S=8  -> 128 rows
    n_blk = pl.cdiv(B, b_blk)
    # (On v7x, once B is large enough for n_blk >= 2, the "parallel" grid axis
    #  shards batch blocks across the two TensorCores.)
    B_pad = n_blk * b_blk
    if B_pad != B:
        A_b = jnp.pad(A_b, ((0, B_pad - B), (0, 0), (0, 0)))
        hidden0 = jnp.pad(hidden0, ((0, B_pad - B), (0, 0), (0, 0)))

    kernel = functools.partial(gnn_kernel, step=step, hidden_size=H,
                               seq_len=S, b_blk=b_blk)

    def full(shape):
        return pl.BlockSpec(shape, lambda b: (0,) * len(shape))

    out = pl.pallas_call(
        kernel,
        out_shape=jax.ShapeDtypeStruct((B_pad, S, H), jnp.float32),
        grid=(n_blk,),
        in_specs=[
            pl.BlockSpec((b_blk, S, 2 * S), lambda b: (b, 0, 0)),   # A block
            pl.BlockSpec((b_blk, S, H), lambda b: (b, 0, 0)),       # hidden0 block
            full((H, 3 * H)),      # U_in
            full((H, 3 * H)),      # U_out
            full((H, 3 * H)),      # w_hh^T
            full((1, 3 * H)),      # c_in
            full((1, 3 * H)),      # c_out
            full((1, 3 * H)),      # c_base
            full((1, 3 * H)),      # b_hh
        ],
        out_specs=pl.BlockSpec((b_blk, S, H), lambda b: (b, 0, 0)),
        compiler_params=pltpu.CompilerParams(
            dimension_semantics=("parallel",),
            vmem_limit_bytes=32 * 1024 * 1024),   # safe on v7x (64 MiB phys)
    )(A_b, hidden0, u_in_b, u_out_b, w_hh_b, c_in, c_out, c_base, b_hh)
    return out[:B]


def session_graph_forward_ref(item_ids, A, params, step):
    """Pure-JAX, PyTorch-faithful reference of SessionGraph.forward."""
    hidden = params["embedding"][item_ids].astype(jnp.float32)
    A = A.astype(jnp.float32)
    S = A.shape[1]
    for _ in range(step):
        h_in = hidden @ params["we_in"].T + params["be_in"]
        h_out = hidden @ params["we_out"].T + params["be_out"]
        input_in = jnp.matmul(A[:, :, :S], h_in) + params["b_iah"]
        input_out = jnp.matmul(A[:, :, S:2 * S], h_out) + params["b_oah"]
        inputs = jnp.concatenate([input_in, input_out], axis=2)
        gi = inputs @ params["w_ih"].T + params["b_ih"]
        gh = hidden @ params["w_hh"].T + params["b_hh"]
        i_r, i_i, i_n = jnp.split(gi, 3, axis=2)
        h_r, h_i, h_n = jnp.split(gh, 3, axis=2)
        resetgate = jax.nn.sigmoid(i_r + h_r)
        inputgate = jax.nn.sigmoid(i_i + h_i)
        newgate = jnp.tanh(i_n + resetgate * h_n)
        hidden = newgate + inputgate * (hidden - newgate)
    return hidden


if __name__ == "__main__":
    # Small shapes implied by the module: batch=2, seq=8, hidden=32.
    B, S, H = 2, 8, 32
    n_node = 50
    step = 2                      # opt.step

    key = jax.random.PRNGKey(0)
    k_param, k_ids, k_adj = jax.random.split(key, 3)

    params = init_params(k_param, n_node, H)
    item_ids = jax.random.randint(k_ids, (B, S), 0, n_node, dtype=jnp.int32)
    A = jax.random.uniform(k_adj, (B, S, 2 * S), jnp.float32)

    out = jax.block_until_ready(session_graph_forward(item_ids, A, params, step))
    ref = session_graph_forward_ref(item_ids, A, params, step)

    assert out.shape == (B, S, H)
    err = float(jnp.max(jnp.abs(out - ref)))
    # bf16 matmul operands + weight-folding reassociation -> relaxed tolerance.
    assert err < 3e-2, f"mismatch vs pure-JAX reference: max abs err {err}"

    # TODO(synk): compute_scores / session_embedding / loss are not part of
    # forward() and are therefore not kernelized here.
    print("KERNEL_OK")
</pallas_src>

<mosaic_0001>
module attributes {stable_mosaic.version = 11 : i64} {
  func.func @gnn_kernel(%arg0: i32, %arg1: memref<16x8x16xbf16, #tpu.memory_space<vmem>>, %arg2: memref<16x8x32xbf16, #tpu.memory_space<vmem>>, %arg3: memref<32x96xbf16, #tpu.memory_space<vmem>>, %arg4: memref<32x96xbf16, #tpu.memory_space<vmem>>, %arg5: memref<32x96xbf16, #tpu.memory_space<vmem>>, %arg6: memref<1x96xf32, #tpu.memory_space<vmem>>, %arg7: memref<1x96xf32, #tpu.memory_space<vmem>>, %arg8: memref<1x96xf32, #tpu.memory_space<vmem>>, %arg9: memref<1x96xf32, #tpu.memory_space<vmem>>, %arg10: memref<16x8x32xf32, #tpu.memory_space<vmem>>) attributes {dimension_semantics = [#tpu.dimension_semantics<parallel>], iteration_bounds = array<i64: 1>, scalar_prefetch = 0 : i64, scratch_operands = 0 : i64, tpu.core_type = #tpu.core_type<tc>, window_params = [{transform_indices = @transform_0, window_bounds = array<i64: 16, 8, 16>}, {transform_indices = @transform_1, window_bounds = array<i64: 16, 8, 32>}, {pipeline_mode = #tpu.pipeline_mode<synchronous>, transform_indices = @transform_2, window_bounds = array<i64: 32, 96>}, {pipeline_mode = #tpu.pipeline_mode<synchronous>, transform_indices = @transform_3, window_bounds = array<i64: 32, 96>}, {pipeline_mode = #tpu.pipeline_mode<synchronous>, transform_indices = @transform_4, window_bounds = array<i64: 32, 96>}, {pipeline_mode = #tpu.pipeline_mode<synchronous>, transform_indices = @transform_5, window_bounds = array<i64: 1, 96>}, {pipeline_mode = #tpu.pipeline_mode<synchronous>, transform_indices = @transform_6, window_bounds = array<i64: 1, 96>}, {pipeline_mode = #tpu.pipeline_mode<synchronous>, transform_indices = @transform_7, window_bounds = array<i64: 1, 96>}, {pipeline_mode = #tpu.pipeline_mode<synchronous>, transform_indices = @transform_8, window_bounds = array<i64: 1, 96>}, {transform_indices = @transform_9, window_bounds = array<i64: 16, 8, 32>}]} {
    %c0 = arith.constant 0 : index
    %c0_0 = arith.constant 0 : index
    %c0_1 = arith.constant 0 : index
    %0 = vector.load %arg1[%c0, %c0_0, %c0_1] : memref<16x8x16xbf16, #tpu.memory_space<vmem>>, vector<16x8x16xbf16>
    %1 = vector.extract_strided_slice %0 {offsets = [0, 0, 0], sizes = [16, 8, 8], strides = [1, 1, 1]} : vector<16x8x16xbf16> to vector<16x8x8xbf16>
    %2 = vector.extract_strided_slice %0 {offsets = [0, 0, 8], sizes = [16, 8, 8], strides = [1, 1, 1]} : vector<16x8x16xbf16> to vector<16x8x8xbf16>
    %c0_2 = arith.constant 0 : index
    %c0_3 = arith.constant 0 : index
    %3 = vector.load %arg3[%c0_2, %c0_3] : memref<32x96xbf16, #tpu.memory_space<vmem>>, vector<32x96xbf16>
    %c0_4 = arith.constant 0 : index
    %c0_5 = arith.constant 0 : index
    %4 = vector.load %arg4[%c0_4, %c0_5] : memref<32x96xbf16, #tpu.memory_space<vmem>>, vector<32x96xbf16>
    %c0_6 = arith.constant 0 : index
    %c0_7 = arith.constant 0 : index
    %5 = vector.load %arg5[%c0_6, %c0_7] : memref<32x96xbf16, #tpu.memory_space<vmem>>, vector<32x96xbf16>
    %c0_8 = arith.constant 0 : index
    %c0_9 = arith.constant 0 : index
    %6 = vector.load %arg6[%c0_8, %c0_9] : memref<1x96xf32, #tpu.memory_space<vmem>>, vector<1x96xf32>
    %c0_10 = arith.constant 0 : index
    %c0_11 = arith.constant 0 : index
    %7 = vector.load %arg7[%c0_10, %c0_11] : memref<1x96xf32, #tpu.memory_space<vmem>>, vector<1x96xf32>
    %c0_12 = arith.constant 0 : index
    %c0_13 = arith.constant 0 : index
    %8 = vector.load %arg8[%c0_12, %c0_13] : memref<1x96xf32, #tpu.memory_space<vmem>>, vector<1x96xf32>
    %c0_14 = arith.constant 0 : index
    %c0_15 = arith.constant 0 : index
    %9 = vector.load %arg9[%c0_14, %c0_15] : memref<1x96xf32, #tpu.memory_space<vmem>>, vector<1x96xf32>
    %10 = arith.extf %1 : vector<16x8x8xbf16> to vector<16x8x8xf32>
    %cst = arith.constant dense<0.000000e+00> : vector<16x8xf32>
    %11 = vector.multi_reduction <add>, %10, %cst [2] : vector<16x8x8xf32> to vector<16x8xf32>
    %12 = vector.shape_cast %11 : vector<16x8xf32> to vector<16x8x1xf32>
    %13 = vector.shape_cast %12 : vector<16x8x1xf32> to vector<128x1xf32>
    %14 = arith.extf %2 : vector<16x8x8xbf16> to vector<16x8x8xf32>
    %cst_16 = arith.constant dense<0.000000e+00> : vector<16x8xf32>
    %15 = vector.multi_reduction <add>, %14, %cst_16 [2] : vector<16x8x8xf32> to vector<16x8xf32>
    %16 = vector.shape_cast %15 : vector<16x8xf32> to vector<16x8x1xf32>
    %17 = vector.shape_cast %16 : vector<16x8x1xf32> to vector<128x1xf32>
    %18 = vector.broadcast %13 : vector<128x1xf32> to vector<128x96xf32>
    %19 = vector.broadcast %6 : vector<1x96xf32> to vector<128x96xf32>
    %20 = arith.mulf %18, %19 : vector<128x96xf32>
    %21 = vector.broadcast %17 : vector<128x1xf32> to vector<128x96xf32>
    %22 = vector.broadcast %7 : vector<1x96xf32> to vector<128x96xf32>
    %23 = arith.mulf %21, %22 : vector<128x96xf32>
    %24 = arith.addf %20, %23 : vector<128x96xf32>
    %25 = vector.broadcast %8 : vector<1x96xf32> to vector<128x96xf32>
    %26 = arith.addf %24, %25 : vector<128x96xf32>
    %c0_17 = arith.constant 0 : index
    %c0_18 = arith.constant 0 : index
    %c0_19 = arith.constant 0 : index
    %27 = vector.load %arg2[%c0_17, %c0_18, %c0_19] : memref<16x8x32xbf16, #tpu.memory_space<vmem>>, vector<16x8x32xbf16>
    %28 = vector.shape_cast %27 : vector<16x8x32xbf16> to vector<128x32xbf16>
    %29 = arith.extf %28 : vector<128x32xbf16> to vector<128x32xf32>
    %30 = arith.truncf %29 : vector<128x32xf32> to vector<128x32xbf16>
    %31 = vector.shape_cast %30 : vector<128x32xbf16> to vector<16x8x32xbf16>
    "tpu.trace_start"() <{level = 10 : i32, message = "bij,bjh->bih"}> : () -> ()
    %cst_20 = arith.constant dense<0.000000e+00> : vector<16x8x32xf32>
    %32 = tpu.matmul %1, %31, %cst_20 {dimension_numbers = #tpu.dot_dimension_numbers<[2], [1], [1], [2], [0, 0, 0, 1, 1, 2], [0], [0]>} : vector<16x8x8xbf16>, vector<16x8x32xbf16>, vector<16x8x32xf32> -> vector<16x8x32xf32>
    "tpu.trace_stop"() : () -> ()
    %33 = vector.shape_cast %32 : vector<16x8x32xf32> to vector<128x32xf32>
    "tpu.trace_start"() <{level = 10 : i32, message = "bij,bjh->bih"}> : () -> ()
    %cst_21 = arith.constant dense<0.000000e+00> : vector<16x8x32xf32>
    %34 = tpu.matmul %2, %31, %cst_21 {dimension_numbers = #tpu.dot_dimension_numbers<[2], [1], [1], [2], [0, 0, 0, 1, 1, 2], [0], [0]>} : vector<16x8x8xbf16>, vector<16x8x32xbf16>, vector<16x8x32xf32> -> vector<16x8x32xf32>
    "tpu.trace_stop"() : () -> ()
    %35 = vector.shape_cast %34 : vector<16x8x32xf32> to vector<128x32xf32>
    %36 = arith.truncf %33 : vector<128x32xf32> to vector<128x32xbf16>
    %cst_22 = arith.constant dense<0.000000e+00> : vector<128x96xf32>
    %37 = tpu.matmul %36, %3, %cst_22 {dimension_numbers = #tpu.dot_dimension_numbers<[1], [0], [0], [1], [0, 0, 1, 1], [], []>} : vector<128x32xbf16>, vector<32x96xbf16>, vector<128x96xf32> -> vector<128x96xf32>
    %38 = arith.truncf %35 : vector<128x32xf32> to vector<128x32xbf16>
    %cst_23 = arith.constant dense<0.000000e+00> : vector<128x96xf32>
    %39 = tpu.matmul %38, %4, %cst_23 {dimension_numbers = #tpu.dot_dimension_numbers<[1], [0], [0], [1], [0, 0, 1, 1], [], []>} : vector<128x32xbf16>, vector<32x96xbf16>, vector<128x96xf32> -> vector<128x96xf32>
    %40 = arith.addf %37, %39 : vector<128x96xf32>
    %41 = arith.addf %40, %26 : vector<128x96xf32>
    %cst_24 = arith.constant dense<0.000000e+00> : vector<128x96xf32>
    %42 = tpu.matmul %30, %5, %cst_24 {dimension_numbers = #tpu.dot_dimension_numbers<[1], [0], [0], [1], [0, 0, 1, 1], [], []>} : vector<128x32xbf16>, vector<32x96xbf16>, vector<128x96xf32> -> vector<128x96xf32>
    %43 = vector.broadcast %9 : vector<1x96xf32> to vector<128x96xf32>
    %44 = arith.addf %42, %43 : vector<128x96xf32>
    %45 = vector.extract_strided_slice %41 {offsets = [0, 0], sizes = [128, 64], strides = [1, 1]} : vector<128x96xf32> to vector<128x64xf32>
    %46 = vector.extract_strided_slice %44 {offsets = [0, 0], sizes = [128, 64], strides = [1, 1]} : vector<128x96xf32> to vector<128x64xf32>
    %47 = arith.addf %45, %46 : vector<128x64xf32>
    %48 = vector.extract_strided_slice %47 {offsets = [0, 0], sizes = [128, 32], strides = [1, 1]} : vector<128x64xf32> to vector<128x32xf32>
    %49 = arith.negf %48 : vector<128x32xf32>
    %50 = math.exp %49 : vector<128x32xf32>
    %cst_25 = arith.constant 1.000000e+00 : f32
    %51 = vector.broadcast %cst_25 : f32 to vector<128x32xf32>
    %52 = arith.addf %51, %50 : vector<128x32xf32>
    %53 = arith.divf %51, %52 : vector<128x32xf32>
    %54 = vector.extract_strided_slice %47 {offsets = [0, 32], sizes = [128, 32], strides = [1, 1]} : vector<128x64xf32> to vector<128x32xf32>
    %55 = arith.negf %54 : vector<128x32xf32>
    %56 = math.exp %55 : vector<128x32xf32>
    %cst_26 = arith.constant 1.000000e+00 : f32
    %57 = vector.broadcast %cst_26 : f32 to vector<128x32xf32>
    %58 = arith.addf %57, %56 : vector<128x32xf32>
    %59 = arith.divf %57, %58 : vector<128x32xf32>
    %60 = vector.extract_strided_slice %41 {offsets = [0, 64], sizes = [128, 32], strides = [1, 1]} : vector<128x96xf32> to vector<128x32xf32>
    %61 = vector.extract_strided_slice %44 {offsets = [0, 64], sizes = [128, 32], strides = [1, 1]} : vector<128x96xf32> to vector<128x32xf32>
    %62 = arith.mulf %53, %61 : vector<128x32xf32>
    %63 = arith.addf %60, %62 : vector<128x32xf32>
    %64 = math.tanh %63 : vector<128x32xf32>
    %65 = arith.subf %29, %64 : vector<128x32xf32>
    %66 = arith.mulf %59, %65 : vector<128x32xf32>
    %67 = arith.addf %64, %66 : vector<128x32xf32>
    %68 = arith.truncf %67 : vector<128x32xf32> to vector<128x32xbf16>
    %69 = vector.shape_cast %68 : vector<128x32xbf16> to vector<16x8x32xbf16>
    "tpu.trace_start"() <{level = 10 : i32, message = "bij,bjh->bih"}> : () -> ()
    %cst_27 = arith.constant dense<0.000000e+00> : vector<16x8x32xf32>
    %70 = tpu.matmul %1, %69, %cst_27 {dimension_numbers = #tpu.dot_dimension_numbers<[2], [1], [1], [2], [0, 0, 0, 1, 1, 2], [0], [0]>} : vector<16x8x8xbf16>, vector<16x8x32xbf16>, vector<16x8x32xf32> -> vector<16x8x32xf32>
    "tpu.trace_stop"() : () -> ()
    %71 = vector.shape_cast %70 : vector<16x8x32xf32> to vector<128x32xf32>
    "tpu.trace_start"() <{level = 10 : i32, message = "bij,bjh->bih"}> : () -> ()
    %cst_28 = arith.constant dense<0.000000e+00> : vector<16x8x32xf32>
    %72 = tpu.matmul %2, %69, %cst_28 {dimension_numbers = #tpu.dot_dimension_numbers<[2], [1], [1], [2], [0, 0, 0, 1, 1, 2], [0], [0]>} : vector<16x8x8xbf16>, vector<16x8x32xbf16>, vector<16x8x32xf32> -> vector<16x8x32xf32>
    "tpu.trace_stop"() : () -> ()
    %73 = vector.shape_cast %72 : vector<16x8x32xf32> to vector<128x32xf32>
    %74 = arith.truncf %71 : vector<128x32xf32> to vector<128x32xbf16>
    %cst_29 = arith.constant dense<0.000000e+00> : vector<128x96xf32>
    %75 = tpu.matmul %74, %3, %cst_29 {dimension_numbers = #tpu.dot_dimension_numbers<[1], [0], [0], [1], [0, 0, 1, 1], [], []>} : vector<128x32xbf16>, vector<32x96xbf16>, vector<128x96xf32> -> vector<128x96xf32>
    %76 = arith.truncf %73 : vector<128x32xf32> to vector<128x32xbf16>
    %cst_30 = arith.constant dense<0.000000e+00> : vector<128x96xf32>
    %77 = tpu.matmul %76, %4, %cst_30 {dimension_numbers = #tpu.dot_dimension_numbers<[1], [0], [0], [1], [0, 0, 1, 1], [], []>} : vector<128x32xbf16>, vector<32x96xbf16>, vector<128x96xf32> -> vector<128x96xf32>
    %78 = arith.addf %75, %77 : vector<128x96xf32>
    %79 = arith.addf %78, %26 : vector<128x96xf32>
    %cst_31 = arith.constant dense<0.000000e+00> : vector<128x96xf32>
    %80 = tpu.matmul %68, %5, %cst_31 {dimension_numbers = #tpu.dot_dimension_numbers<[1], [0], [0], [1], [0, 0, 1, 1], [], []>} : vector<128x32xbf16>, vector<32x96xbf16>, vector<128x96xf32> -> vector<128x96xf32>
    %81 = vector.broadcast %9 : vector<1x96xf32> to vector<128x96xf32>
    %82 = arith.addf %80, %81 : vector<128x96xf32>
    %83 = vector.extract_strided_slice %79 {offsets = [0, 0], sizes = [128, 64], strides = [1, 1]} : vector<128x96xf32> to vector<128x64xf32>
    %84 = vector.extract_strided_slice %82 {offsets = [0, 0], sizes = [128, 64], strides = [1, 1]} : vector<128x96xf32> to vector<128x64xf32>
    %85 = arith.addf %83, %84 : vector<128x64xf32>
    %86 = vector.extract_strided_slice %85 {offsets = [0, 0], sizes = [128, 32], strides = [1, 1]} : vector<128x64xf32> to vector<128x32xf32>
    %87 = arith.negf %86 : vector<128x32xf32>
    %88 = math.exp %87 : vector<128x32xf32>
    %cst_32 = arith.constant 1.000000e+00 : f32
    %89 = vector.broadcast %cst_32 : f32 to vector<128x32xf32>
    %90 = arith.addf %89, %88 : vector<128x32xf32>
    %91 = arith.divf %89, %90 : vector<128x32xf32>
    %92 = vector.extract_strided_slice %85 {offsets = [0, 32], sizes = [128, 32], strides = [1, 1]} : vector<128x64xf32> to vector<128x32xf32>
    %93 = arith.negf %92 : vector<128x32xf32>
    %94 = math.exp %93 : vector<128x32xf32>
    %cst_33 = arith.constant 1.000000e+00 : f32
    %95 = vector.broadcast %cst_33 : f32 to vector<128x32xf32>
    %96 = arith.addf %95, %94 : vector<128x32xf32>
    %97 = arith.divf %95, %96 : vector<128x32xf32>
    %98 = vector.extract_strided_slice %79 {offsets = [0, 64], sizes = [128, 32], strides = [1, 1]} : vector<128x96xf32> to vector<128x32xf32>
    %99 = vector.extract_strided_slice %82 {offsets = [0, 64], sizes = [128, 32], strides = [1, 1]} : vector<128x96xf32> to vector<128x32xf32>
    %100 = arith.mulf %91, %99 : vector<128x32xf32>
    %101 = arith.addf %98, %100 : vector<128x32xf32>
    %102 = math.tanh %101 : vector<128x32xf32>
    %103 = arith.subf %67, %102 : vector<128x32xf32>
    %104 = arith.mulf %97, %103 : vector<128x32xf32>
    %105 = arith.addf %102, %104 : vector<128x32xf32>
    %106 = vector.shape_cast %105 : vector<128x32xf32> to vector<16x8x32xf32>
    %c0_34 = arith.constant 0 : index
    %c0_35 = arith.constant 0 : index
    %c0_36 = arith.constant 0 : index
    %107 = vector.load %arg10[%c0_34, %c0_35, %c0_36] : memref<16x8x32xf32, #tpu.memory_space<vmem>>, vector<16x8x32xf32>
    tpu.vector_store %arg10[%c0_34, %c0_35, %c0_36], %106 {strides = array<i32>} : memref<16x8x32xf32, #tpu.memory_space<vmem>>, vector<16x8x32xf32>,
    return
  }
  func.func @transform_0(%arg0: i32) -> (i32, i32, i32) {
    %c0_i32 = arith.constant 0 : i32
    %c0_i32_0 = arith.constant 0 : i32
    %c0_i32_1 = arith.constant 0 : i32
    return %arg0, %c0_i32, %c0_i32_0 : i32, i32, i32
  }
  func.func @transform_1(%arg0: i32) -> (i32, i32, i32) {
    %c0_i32 = arith.constant 0 : i32
    %c0_i32_0 = arith.constant 0 : i32
    %c0_i32_1 = arith.constant 0 : i32
    return %arg0, %c0_i32, %c0_i32_0 : i32, i32, i32
  }
  func.func @transform_2(%arg0: i32) -> (i32, i32) {
    %c0_i32 = arith.constant 0 : i32
    %c0_i32_0 = arith.constant 0 : i32
    %c0_i32_1 = arith.constant 0 : i32
    return %c0_i32, %c0_i32_0 : i32, i32
  }
  func.func @transform_3(%arg0: i32) -> (i32, i32) {
    %c0_i32 = arith.constant 0 : i32
    %c0_i32_0 = arith.constant 0 : i32
    %c0_i32_1 = arith.constant 0 : i32
    return %c0_i32, %c0_i32_0 : i32, i32
  }
  func.func @transform_4(%arg0: i32) -> (i32, i32) {
    %c0_i32 = arith.constant 0 : i32
    %c0_i32_0 = arith.constant 0 : i32
    %c0_i32_1 = arith.constant 0 : i32
    return %c0_i32, %c0_i32_0 : i32, i32
  }
  func.func @transform_5(%arg0: i32) -> (i32, i32) {
    %c0_i32 = arith.constant 0 : i32
    %c0_i32_0 = arith.constant 0 : i32
    %c0_i32_1 = arith.constant 0 : i32
    return %c0_i32, %c0_i32_0 : i32, i32
  }
  func.func @transform_6(%arg0: i32) -> (i32, i32) {
    %c0_i32 = arith.constant 0 : i32
    %c0_i32_0 = arith.constant 0 : i32
    %c0_i32_1 = arith.constant 0 : i32
    return %c0_i32, %c0_i32_0 : i32, i32
  }
  func.func @transform_7(%arg0: i32) -> (i32, i32) {
    %c0_i32 = arith.constant 0 : i32
    %c0_i32_0 = arith.constant 0 : i32
    %c0_i32_1 = arith.constant 0 : i32
    return %c0_i32, %c0_i32_0 : i32, i32
  }
  func.func @transform_8(%arg0: i32) -> (i32, i32) {
    %c0_i32 = arith.constant 0 : i32
    %c0_i32_0 = arith.constant 0 : i32
    %c0_i32_1 = arith.constant 0 : i32
    return %c0_i32, %c0_i32_0 : i32, i32
  }
  func.func @transform_9(%arg0: i32) -> (i32, i32, i32) {
    %c0_i32 = arith.constant 0 : i32
    %c0_i32_0 = arith.constant 0 : i32
    %c0_i32_1 = arith.constant 0 : i32
    return %arg0, %c0_i32, %c0_i32_0 : i32, i32, i32
  }
}

</mosaic_0001>

<bundles_post_ra>
// kernel: tpu_custom_call.1
= control target key start
LH: loop header
LB: loop body
LE: loop exit
PB: predicated region body
PF: predicated region fallthrough
CT: control target
= control target key end

     0   :  { %14 = vsyncpa [#allocation3], 0  ;;  %s6467_s0 = inlined_call_operand.hbm [shape: bf16[16,8,16], index: 0, kind: input, shape index: {}]   ;;  %s6468_s1 = inlined_call_operand.hbm [shape: bf16[16,8,32], index: 1, kind: input, shape index: {}]   ;;  %s6469_s2 = inlined_call_operand.hbm [shape: bf16[32,96], index: 2, kind: input, shape index: {}]   ;;  %s6470_s3 = inlined_call_operand.hbm [shape: bf16[32,96], index: 3, kind: input, shape index: {}]   ;;  %s6471_s4 = inlined_call_operand.hbm [shape: bf16[32,96], index: 4, kind: input, shape index: {}]   ;;  %s6472_s5 = inlined_call_operand.vmem [shape: f32[1,96], index: 5, kind: input, shape index: {}]   ;;  %s6473_s6 = inlined_call_operand.vmem [shape: f32[1,96], index: 6, kind: input, shape index: {}]   ;;  %s6474_s7 = inlined_call_operand.vmem [shape: f32[1,96], index: 7, kind: input, shape index: {}]   ;;  %s6475_s8 = inlined_call_operand.vmem [shape: f32[1,96], index: 8, kind: input, shape index: {}]   ;;  %s6476_s9 = inlined_call_operand.hbm [shape: f32[16,8,32], index: 9, kind: output, shape index: {}]  }
   0x1   :  { %15 = vsyncpa [#allocation6], 0 }
   0x2   :  { %16 = vsyncpa [#allocation9], 0 }
   0x3   :  { %17 = vsyncpa [#allocation4], 0  ;;  %s35_s11 = sshll.u32 %s6468_s1, 4  ;;  %s4402_s12 = smov [#allocation5]   ;;  %s36_s11 = int_to_ptr.hbm [resolvable:$true] %s35_s11 }
   0x4   :  { %s37_s13 = sshll.u32 %s4402_s12, 4  ;;  %s61_s16 = sshll.u32 %s6470_s3, 4  ;;  %s38_s13 = int_to_ptr.vmem [resolvable:$true] %s37_s13  ;;  %s62_s16 = int_to_ptr.hbm [resolvable:$true] %s61_s16 }
   0x5   :  { %s4403_s17 = smov 64   ;;  %s4404_s18 = smov 4  }
   0x6   :  { %43 = dma.hbm_to_vmem [thread:$0]  %s36_s11, 1024, %s38_s13, [#allocation6], %s4403_s17, %s4403_s17, %s4404_s18  }
   0x7   :  { %s4405_s19 = smov [#allocation8]   ;;  %s22_s1 = sshll.u32 %s6467_s0, 4  ;;  %s23_s1 = int_to_ptr.hbm [resolvable:$true] %s22_s1 }
   0x8   :  { %s63_s20 = sshll.u32 %s4405_s19, 4  ;;  %s48_s3 = sshll.u32 %s6469_s2, 4  ;;  %s64_s20 = int_to_ptr.vmem [resolvable:$true] %s63_s20  ;;  %s49_s3 = int_to_ptr.hbm [resolvable:$true] %s48_s3 }
   0x9   :  { %69 = dma.hbm_to_vmem [thread:$0]  %s62_s16, 256, %s64_s20, [#allocation9], %s4403_s17, %s4403_s17, %s4404_s18  }
   0xa   :  { %s4406_s25 = smov [#allocation2]   ;;  %s4407_s27 = smov [#allocation7]  }
   0xb   :  { %s24_s26 = sshll.u32 %s4406_s25, 4  ;;  %s50_s28 = sshll.u32 %s4407_s27, 4  ;;  %s25_s26 = int_to_ptr.vmem [resolvable:$true] %s24_s26  ;;  %s51_s28 = int_to_ptr.vmem [resolvable:$true] %s50_s28 }
   0xc   :  { %30 = dma.hbm_to_vmem [thread:$0]  %s23_s1, 1024, %s25_s26, [#allocation3], %s4403_s17, %s4403_s17, %s4404_s18  }
   0xd   :  { %s74_s30 = sshll.u32 %s6471_s4, 4  ;;  %s4408_s10 = smov [#allocation10]   ;;  %s75_s30 = int_to_ptr.hbm [resolvable:$true] %s74_s30 }
   0xe   :  { %56 = dma.hbm_to_vmem [thread:$0]  %s49_s3, 256, %s51_s28, [#allocation6], %s4403_s17, %s4403_s17, %s4404_s18  }
   0xf   :  { %s76_s2 = sshll.u32 %s4408_s10, 4  ;;  %s77_s2 = int_to_ptr.vmem [resolvable:$true] %s76_s2 }
  0x10   :  { %82 = dma.hbm_to_vmem [thread:$0]  %s75_s30, 256, %s77_s2, [#allocation9], %s4403_s17, %s4403_s17, %s4404_s18  }
  0x11   :  { %4394 = dma.done.wait [#allocation3], 1024  }
  0x12   :  { %4395 = vsyncadd [#allocation3], 4294966272 }
  0x13   :  { %4396 = dma.done.wait [#allocation6], 1280  }
  0x14   :  { %4397 = vsyncadd [#allocation6], 4294966016 }
  0x15   :  { %4398 = dma.done.wait [#allocation9], 512  }
  0x16   :  { %4399 = vsyncadd [#allocation9], 4294966784  ;;  %v4490_v0 = vld [vmem:[#allocation2 + $0x8] sm:$0xf]  ;;  %v4492_v1 = vld [vmem:[#allocation2] sm:$0xf] }
  0x17   :  { %v774_v2 = vunpack.c.l.b16 %v4490_v0  ;;  %v732_v3 = vunpack.c.l.b16 %v4492_v1  ;;  %v4496_v4 = vld [vmem:[#allocation2 + $0xc] sm:$0xf]  ;;  %v4498_v5 = vld [vmem:[#allocation2 + $0x4] sm:$0xf]  ;;  %s4409_s4 = smov 120   ;;  %vm429_vm0 = vcmask 1043456  }
  0x18   :  { %v795_v8 = vunpack.c.l.b16 %v4496_v4  ;;  %v753_v9 = vunpack.c.l.b16 %v4498_v5  ;;  %v4504_v10 = vld [vmem:[#allocation2 + $0x10] sm:$0xf]  ;;  %v4507_v15 = vld [vmem:[#allocation2 + $0x1c] sm:$0xf]  ;;  %v4509_v16 = vld [vmem:[#allocation2 + $0x18] sm:$0xf] }
  0x19   :  { %v775_v6 = vpack.c.b16 %v774_v2, %v774_v2  ;;  %v733_v7 = vpack.c.b16 %v732_v3, %v732_v3  ;;  %v816_v11 = vunpack.c.l.b16 %v4504_v10  ;;  %v879_v17 = vunpack.c.l.b16 %v4507_v15  ;;  %v4516_v19 = vld [vmem:[#allocation2 + $0x14] sm:$0xf]  ;;  %v394_v20 = vld [vmem:[#allocation5] sm:$0xf]  ;;  %v396_v23 = vld [vmem:[#allocation5 + $0x8] sm:$0xf] }
  0x1a   :  { %v796_v13 = vpack.c.b16 %v795_v8, %v795_v8  ;;  %v754_v14 = vpack.c.b16 %v753_v9, %v753_v9  ;;  %v858_v18 = vunpack.c.l.b16 %v4509_v16  ;;  %v837_v21 = vunpack.c.l.b16 %v4516_v19  ;;  %v4522_v24 = vld [vmem:[#allocation2 + $0x20] sm:$0xf]  ;;  %v395_v26 = vld [vmem:[#allocation5 + $0x4] sm:$0xf]  ;;  %v397_v27 = vld [vmem:[#allocation5 + $0xc] sm:$0xf] }
  0x1b   :  { %776 = vrot.lane.b32.xlu1 %v775_v6, %s4409_s4  ;;  %734 = vrot.lane.b32.xlu0 %v733_v7, %s4409_s4  ;;  %v817_v12 = vpack.c.b16 %v816_v11, %v816_v11  ;;  %v4520_v22 = vsel %vm429_vm0, %v394_v20, 0  ;;  %v4526_v25 = vsel %vm429_vm0, %v396_v23, 0  ;;  %vm160_vm1 = vcmask 64512   ;;  %v4528_v28 = vld [vmem:[#allocation2 + $0x28] sm:$0xf]  ;;  %s3727_s1 = sshll.u32 %s6476_s9, 4  ;;  %s3728_s1 = int_to_ptr.hbm [resolvable:$true] %s3727_s1 }
  0x1c   :  { %440 = vmatpush.bf16.msra.mxu0 %v4520_v22  ;;  %v838_v29 = vpack.c.b16 %v837_v21, %v837_v21  ;;  %478 = vmatpush.bf16.msra.mxu2 %v4526_v25  ;;  %v4532_v30 = vsel %vm429_vm0, %v395_v26, 0  ;;  %v398_v31 = vld [vmem:[#allocation5 + $0x10] sm:$0xf]  ;;  %v880_v32 = vpack.c.b16 %v879_v17, %v879_v17  ;;  %v859_v33 = vpack.c.b16 %v858_v18, %v858_v18  ;;  %v4534_v34 = vld [vmem:[#allocation2 + $0x24] sm:$0xf]  ;;  %s4413_s23 = smov 128  }
  0x1d   :  { %818 = vrot.lane.b32.xlu2 %v817_v12, %s4409_s4  ;;  %459 = vmatpush.bf16.msra.mxu1 %v4532_v30  ;;  %v4538_v35 = vsel %vm429_vm0, %v397_v27, 0  ;;  %v400_v36 = vld [vmem:[#allocation5 + $0x18] sm:$0xf]  ;;  %v900_v37 = vunpack.c.l.b16 %v4522_v24  ;;  %v4545_v38 = vsel %vm429_vm0, %v398_v31, 0  ;;  %v399_v39 = vld [vmem:[#allocation5 + $0x14] sm:$0xf]  ;;  %v942_v46 = vunpack.c.l.b16 %v4528_v28 }
  0x1e   :  { %v401_v40 = vld [vmem:[#allocation5 + $0x1c] sm:$0xf]  ;;  %497 = vmatpush.bf16.msra.mxu3 %v4538_v35  ;;  %v4551_v41 = vsel %vm429_vm0, %v400_v36, 0  ;;  %v402_v42 = vld [vmem:[#allocation5 + $0x20] sm:$0xf]  ;;  %v4557_v44 = vsel %vm429_vm0, %v399_v39, 0  ;;  %v921_v47 = vunpack.c.l.b16 %v4534_v34  ;;  %v144_v6 = vunpack.c.l.bf16 %v4492_v1 }
  0x1f   :  { %3742 = vmatmul.msk.bf16.vlgmr.msra.gmra.mxu0 %vm160_vm1, %v4492_v1  ;;  %3744 = vmatmul.msk.bf16.vlgmr.msra.gmra.mxu2 %vm160_vm1, %v4490_v0  ;;  %v404_v43 = vld [vmem:[#allocation5 + $0x28] sm:$0xf]  ;;  %v4560_v45 = vsel %vm429_vm0, %v401_v40, 0  ;;  %v4567_v48 = vsel %vm429_vm0, %v402_v42, 0  ;;  %v901_v50 = vpack.c.b16 %v900_v37, %v900_v37  ;;  %v4575_v51 = vld [vmem:[#allocation2 + $0x2c] sm:$0xf]  ;;  %v943_v52 = vpack.c.b16 %v942_v46, %v942_v46 }
  0x20   :  { %3743 = vmatmul.msk.bf16.vlgmr.msra.gmra.mxu1 %vm160_vm1, %v4498_v5  ;;  %516 = vmatpush.bf16.msrb.mxu0 %v4545_v38  ;;  %v4570_v49 = vsel %vm429_vm0, %v404_v43, 0  ;;  %v922_v53 = vpack.c.b16 %v921_v47, %v921_v47  ;;  %v4581_v54 = vld [vmem:[#allocation2 + $0x34] sm:$0xf]  ;;  %v4583_v55 = vld [vmem:[#allocation2 + $0x30] sm:$0xf]  ;;  %v963_v56 = vunpack.c.l.b16 %v4575_v51  ;;  %v145_v7 = vunpack.c.l.bf16 %v4498_v5  ;;  %s4414_s24 = smov 8  }
  0x21   :  { %3745 = vmatmul.msk.bf16.vlgmr.msra.gmra.mxu3 %vm160_vm1, %v4496_v4  ;;  %554 = vmatpush.bf16.msrb.mxu2 %v4551_v41  ;;  %v1005_v57 = vunpack.c.l.b16 %v4581_v54  ;;  %v984_v58 = vunpack.c.l.b16 %v4583_v55  ;;  %v4591_v60 = vld [vmem:[#allocation2 + $0x38] sm:$0xf]  ;;  %v4593_v63 = vld [vmem:[#allocation2 + $0x3c] sm:$0xf]  ;;  %v146_v12 = vunpack.c.l.bf16 %v4490_v0  ;;  %v403_v5 = vld [vmem:[#allocation5 + $0x24] sm:$0xf]  ;;  %v148_v31 = vunpack.c.l.bf16 %v4504_v10 }
  0x22   :  { %535 = vmatpush.bf16.msrb.mxu1 %v4557_v44  ;;  %573 = vmatpush.bf16.msrb.mxu3 %v4560_v45  ;;  %v964_v59 = vpack.c.b16 %v963_v56, %v963_v56  ;;  %v1026_v2 = vunpack.c.l.b16 %v4591_v60  ;;  %v1047_v3 = vunpack.c.l.b16 %v4593_v63  ;;  %v3975_v11 = vpack.i.bf16 %v145_v7, %v144_v6  ;;  %v406_v0 = vld [vmem:[#allocation5 + $0x30] sm:$0xf]  ;;  %v408_v21 = vld [vmem:[#allocation5 + $0x38] sm:$0xf]  ;;  %v407_v26 = vld [vmem:[#allocation5 + $0x34] sm:$0xf] }
  0x23   :  { %797 = vrot.lane.b32.xlu1 %v796_v13, %s4409_s4  ;;  %755 = vrot.lane.b32.xlu0 %v754_v14, %s4409_s4  ;;  %v1006_v61 = vpack.c.b16 %v1005_v57, %v1005_v57  ;;  %v985_v62 = vpack.c.b16 %v984_v58, %v984_v58  ;;  %v147_v13 = vunpack.c.l.bf16 %v4496_v4  ;;  %v405_v14 = vld [vmem:[#allocation5 + $0x2c] sm:$0xf]  ;;  %v602_v17 = vsel %vm429_vm0, %v403_v5, 0 }
  0x24   :  { %592 = vmatpush.bf16.msra.mxu0 %v4567_v48  ;;  %v1027_v8 = vpack.c.b16 %v1026_v2, %v1026_v2  ;;  %v1048_v9 = vpack.c.b16 %v1047_v3, %v1047_v3  ;;  %v640_v18 = vsel %vm429_vm0, %v405_v14, 0  ;;  %v659_v20 = vsel %vm429_vm0, %v406_v0, 0  ;;  %v4724_v3 = vld [vmem:[#allocation7 + $0x8] sm:$0xff] }
  0x25   :  { %839 = vrot.lane.b32.xlu2 %v838_v29, %s4409_s4  ;;  %630 = vmatpush.bf16.msra.mxu2 %v4570_v49  ;;  %v3980_v1 = vpack.i.bf16 %v147_v13, %v146_v12  ;;  %v697_v23 = vsel %vm429_vm0, %v408_v21, 0  ;;  %v161_v29 = vsel %vm160_vm1, %v144_v6, 0.0  ;;  %v164_v39 = vsel %vm160_vm1, %v145_v7, 0.0 }
  0x26   :  { %611 = vmatpush.bf16.msra.mxu1 %v602_v17  ;;  %649 = vmatpush.bf16.msra.mxu3 %v640_v18  ;;  %v167_v40 = vsel %vm160_vm1, %v146_v12, 0.0  ;;  %v152_v12 = vunpack.c.l.bf16 %v4522_v24  ;;  %vm1095_vm2 = vcmask 261120  }
  0x2b   :  { %881 = vrot.lane.b32.xlu1 %v880_v32, %s4409_s4  ;;  %860 = vrot.lane.b32.xlu0 %v859_v33, %s4409_s4  ;;  %v149_v32 = vunpack.c.l.bf16 %v4516_v19 }
  0x2d   :  { %902 = vrot.lane.b32.xlu2 %v901_v50, %s4409_s4  ;;  %v3985_v33 = vpack.i.bf16 %v149_v32, %v148_v31 }
  0x2f   :  { %3746 = vmatmul.msk.bf16.vlgmr.msrb.gmra.mxu0 %vm160_vm1, %v4504_v10  ;;  %3748 = vmatmul.msk.bf16.vlgmr.msrb.gmra.mxu2 %vm160_vm1, %v4509_v16  ;;  %v154_v10 = vunpack.c.l.bf16 %v4528_v28 }
  0x30   :  { %3747 = vmatmul.msk.bf16.vlgmr.msrb.gmra.mxu1 %vm160_vm1, %v4516_v19  ;;  %668 = vmatpush.bf16.msrb.mxu0 %v659_v20 }
  0x31   :  { %3749 = vmatmul.msk.bf16.vlgmr.msrb.gmra.mxu3 %vm160_vm1, %v4507_v15  ;;  %706 = vmatpush.bf16.msrb.mxu2 %v697_v23 }
  0x33   :  { %944 = vrot.lane.b32.xlu1 %v943_v52, %s4409_s4  ;;  %923 = vrot.lane.b32.xlu0 %v922_v53, %s4409_s4  ;;  %v4706_v53 = vld [vmem:[#allocation10 + $0x8] sm:$0xff] }
  0x35   :  { %965 = vrot.lane.b32.xlu2 %v964_v59, %s4409_s4 }
  0x3b   :  { %1007 = vrot.lane.b32.xlu1 %v1006_v61, %s4409_s4  ;;  %986 = vrot.lane.b32.xlu0 %v985_v62, %s4409_s4  ;;  %v4719_v61 = vld [vmem:[#allocation10] sm:$0xff] }
  0x3d   :  { %1028 = vrot.lane.b32.xlu2 %v1027_v8, %s4409_s4 }
  0x3f   :  { %3750 = vmatmul.msk.bf16.vlgmr.msra.gmra.mxu0 %vm160_vm1, %v4522_v24  ;;  %3752 = vmatmul.msk.bf16.vlgmr.msra.gmra.mxu2 %vm160_vm1, %v4528_v28 }
  0x40   :  { %746 = vmatpush.bf16.msra.mxu0 %v4520_v22  ;;  %788 = vmatpush.bf16.msra.mxu2 %v4526_v25  ;;  %v409_v22 = vld [vmem:[#allocation5 + $0x3c] sm:$0xf]  ;;  %v678_v25 = vsel %vm429_vm0, %v407_v26, 0 }
  0x41   :  { %3751 = vmatmul.msk.bf16.vlgmr.msra.gmra.mxu1 %vm160_vm1, %v4534_v34  ;;  %3753 = vmatmul.msk.bf16.vlgmr.msra.gmra.mxu3 %vm160_vm1, %v4575_v51  ;;  %v716_v27 = vsel %vm429_vm0, %v409_v22, 0  ;;  %v3942_v22 = vld [vmem:[#allocation7] sm:$0xff] }
  0x42   :  { %687 = vmatpush.bf16.msrb.mxu1 %v678_v25  ;;  %725 = vmatpush.bf16.msrb.mxu3 %v716_v27 }
  0x43   :  { %1049 = vrot.lane.b32.xlu0 %v1048_v9, %s4409_s4  ;;  %3976 = vrot.lane.b32.xlu1 %v3975_v11, %s4409_s4 }
  0x45   :  { %3981 = vrot.lane.b32.xlu2 %v3980_v1, %s4409_s4 }
  0x46   :  { %767 = vmatpush.bf16.msra.mxu1 %v4532_v30  ;;  %809 = vmatpush.bf16.msra.mxu3 %v4538_v35 }
  0x4f   :  { %3754 = vmatmul.msk.bf16.vlgmr.msrb.gmra.mxu0 %vm160_vm1, %v4583_v55  ;;  %3756 = vmatmul.msk.bf16.vlgmr.msrb.gmra.mxu2 %vm160_vm1, %v4591_v60 }
  0x50   :  { %830 = vmatpush.bf16.msrb.mxu0 %v4545_v38  ;;  %872 = vmatpush.bf16.msrb.mxu2 %v4551_v41 }
  0x51   :  { %3755 = vmatmul.msk.bf16.vlgmr.msrb.gmra.mxu1 %vm160_vm1, %v4581_v54  ;;  %3757 = vmatmul.msk.bf16.vlgmr.msrb.gmra.mxu3 %vm160_vm1, %v4593_v63 }
  0x52   :  { %851 = vmatpush.bf16.msrb.mxu1 %v4557_v44  ;;  %893 = vmatpush.bf16.msrb.mxu3 %v4560_v45  ;;  %v170_v44 = vsel %vm160_vm1, %v147_v13, 0.0  ;;  %v153_v13 = vunpack.c.l.bf16 %v4534_v34 }
  0x54   :  { %v188_v24 = vsel %vm160_vm1, %v153_v13, 0.0 }
  0x6d   :  { %162 = vadd.xlane.f32.xlu0 %v161_v29  ;;  %168 = vadd.xlane.f32.xlu1 %v167_v40 }
  0x6e   :  { %165 = vadd.xlane.f32.xlu2 %v164_v39 }
  0x76   :  { %171 = vadd.xlane.f32.xlu2 %v170_v44  ;;  %v150_v44 = vunpack.c.l.bf16 %v4509_v16 }
  0x77   :  { %v4651_v30 = vpop.permute.xlu2 %818 }
  0x78   :  { %6510 = vst [vmem:[#allocation16_spill] sm:$0xff] %v4651_v30 }
  0x7f   :  { %v4658_v35 = vpop.permute.xlu2 %839 }
  0x80   :  { %6511 = vst [vmem:[#allocation17_spill] sm:$0xff] %v4658_v35 }
  0x81   :  { %3986 = vrot.lane.b32.xlu0 %v3985_v33, %s4409_s4 }
  0x87   :  { %v4660_v36 = vpop.permute.xlu2 %902 }
  0x88   :  { %6512 = vst [vmem:[#allocation18_spill] sm:$0xff] %v4660_v36 }
  0x8d   :  { %v4662_v37 = vpop.permute.xlu1 %776  ;;  %v4664_v38 = vpop.permute.xlu0 %734 }
  0x8e   :  { %6513 = vst [vmem:[#allocation19_spill] sm:$0xff] %v4662_v37  ;;  %3758 = vmatmul.msk.bf16.vlgmr.msra.gmra.mxu0 %vm160_vm1, %v4664_v38  ;;  %3760 = vmatmul.msk.bf16.vlgmr.msra.gmra.mxu2 %vm160_vm1, %v4662_v37 }
  0x8f   :  { %6514 = vst [vmem:[#allocation20_spill] sm:$0xff] %v4664_v38  ;;  %914 = vmatpush.bf16.msra.mxu0 %v4567_v48  ;;  %956 = vmatpush.bf16.msra.mxu2 %v4570_v49  ;;  %v4674_v41 = vpop.permute.xlu2 %965 }
  0x90   :  { %6515 = vst [vmem:[#allocation21_spill] sm:$0xff] %v4674_v41 }
  0x95   :  { %v4676_v42 = vpop.permute.xlu1 %797  ;;  %v4678_v43 = vpop.permute.xlu0 %755 }
  0x96   :  { %6516 = vst [vmem:[#allocation22_spill] sm:$0xff] %v4676_v42  ;;  %3759 = vmatmul.msk.bf16.vlgmr.msra.gmra.mxu1 %vm160_vm1, %v4678_v43  ;;  %3761 = vmatmul.msk.bf16.vlgmr.msra.gmra.mxu3 %vm160_vm1, %v4676_v42 }
  0x97   :  { %6517 = vst [vmem:[#allocation23_spill] sm:$0xff] %v4678_v43  ;;  %935 = vmatpush.bf16.msra.mxu1 %v602_v17  ;;  %977 = vmatpush.bf16.msra.mxu3 %v640_v18  ;;  %v4687_v45 = vpop.permute.xlu2 %1028 }
  0x98   :  { %6518 = vst [vmem:[#allocation24_spill] sm:$0xff] %v4687_v45 }
  0x9c   :  { %v4703_v50 = vpop.f32.mrf.mxu0 }
  0x9d   :  { %v4689_v46 = vpop.permute.xlu1 %881  ;;  %v4691_v47 = vpop.permute.xlu0 %860 }
  0x9e   :  { %6519 = vst [vmem:[#allocation25_spill] sm:$0xff] %v4689_v46  ;;  %3762 = vmatmul.msk.bf16.vlgmr.msrb.gmra.mxu0 %vm160_vm1, %v4651_v30  ;;  %3764 = vmatmul.msk.bf16.vlgmr.msrb.gmra.mxu2 %vm160_vm1, %v4691_v47  ;;  %v461_v62 = vpop.f32.mrf.mxu1 }
  0x9f   :  { %6520 = vst [vmem:[#allocation26_spill] sm:$0xff] %v4691_v47  ;;  %998 = vmatpush.bf16.msrb.mxu0 %v659_v20  ;;  %1040 = vmatpush.bf16.msrb.mxu2 %v697_v23  ;;  %v3982_v4 = vpop.permute.xlu2 %3981  ;;  %v3995_v20 = vpack.i.bf16 %v153_v13, %v152_v12 }
  0xa0   :  { %v3984_v48 = vunpack.i.h.bf16 %v3982_v4  ;;  %v3983_v14 = vunpack.i.l.bf16 %v3982_v4  ;;  %v151_v4 = vunpack.c.l.bf16 %v4507_v15  ;;  %v185_v15 = vsel %vm160_vm1, %v152_v12, 0.0 }
  0xa2   :  { %v282_v52 = vsel %vm160_vm1, %v3984_v48, 0.0  ;;  %v4708_v56 = vpop.f32.mrf.mxu2  ;;  %v279_v21 = vsel %vm160_vm1, %v3983_v14, 0.0  ;;  %v3948_v48 = vld [vmem:[#allocation5] sm:$0xff] }
  0xa4   :  { %v444_v58 = vpop.f32.mrf.mxu0  ;;  %v4721_v2 = vpop.f32.mrf.mxu3 }
  0xa5   :  { %v4697_v49 = vpop.permute.xlu1 %944  ;;  %v4717_v59 = vpop.permute.xlu0 %923 }
  0xa6   :  { %6521 = vst [vmem:[#allocation27_spill] sm:$0xff] %v4697_v49  ;;  %3763 = vmatmul.msk.bf16.vlgmr.msrb.gmra.mxu1 %vm160_vm1, %v4658_v35  ;;  %3765 = vmatmul.msk.bf16.vlgmr.msrb.gmra.mxu3 %vm160_vm1, %v4689_v46  ;;  %v463_v0 = vpop.f32.mrf.mxu1 }
  0xa7   :  { %1019 = vmatpush.bf16.msrb.mxu1 %v678_v25  ;;  %1061 = vmatpush.bf16.msrb.mxu3 %v716_v27  ;;  %6523 = vst [vmem:[#allocation29_spill] sm:$0xff] %v4717_v59 }
  0xaa   :  { %v482_v6 = vpop.f32.mrf.mxu2 }
  0xab   :  { %283 = vadd.xlane.f32.xlu0 %v282_v52  ;;  %v3990_v6 = vpack.i.bf16 %v151_v4, %v150_v44 }
  0xac   :  { %v4730_v11 = vpop.f32.mrf.mxu0  ;;  %v501_v17 = vpop.f32.mrf.mxu3 }
  0xad   :  { %v4710_v57 = vpop.permute.xlu1 %1007  ;;  %v4737_v18 = vpop.permute.xlu0 %986 }
  0xae   :  { %6522 = vst [vmem:[#allocation28_spill] sm:$0xff] %v4710_v57  ;;  %3766 = vmatmul.msk.bf16.vlgmr.msra.gmra.mxu0 %vm160_vm1, %v4660_v36  ;;  %3768 = vmatmul.msk.bf16.vlgmr.msra.gmra.mxu2 %vm160_vm1, %v4697_v49  ;;  %v537_v25 = vpop.f32.mrf.mxu1 }
  0xaf   :  { %1355 = vmatpush.bf16.msra.mxu2 %v4706_v53  ;;  %6524 = vst [vmem:[#allocation30_spill] sm:$0xff] %v4737_v18 }
  0xb2   :  { %v4749_v26 = vpop.f32.mrf.mxu2 }
  0xb3   :  { %1356 = vmatpush.bf16.msra.mxu2 %v4719_v61 }
  0xb4   :  { %v520_v23 = vpop.f32.mrf.mxu0  ;;  %v4751_v27 = vpop.f32.mrf.mxu3 }
  0xb5   :  { %v3977_v7 = vpop.permute.xlu1 %3976  ;;  %v1070_v29 = vpack.c.bf16 %v4751_v27, %v4749_v26  ;;  %v4755_v33 = vpop.permute.xlu0 %1049  ;;  %v6478_v26 = vunpack.c.l.bf16 %v4591_v60  ;;  %v6477_v27 = vunpack.c.l.bf16 %v4593_v63 }
  0xb6   :  { %3767 = vmatmul.msk.bf16.vlgmr.msra.gmra.mxu1 %vm160_vm1, %v4717_v59  ;;  %3769 = vmatmul.msk.bf16.vlgmr.msra.gmra.mxu3 %vm160_vm1, %v4674_v41  ;;  %v3978_v8 = vunpack.i.l.bf16 %v3977_v7  ;;  %v3979_v9 = vunpack.i.h.bf16 %v3977_v7  ;;  %6525 = vst [vmem:[#allocation31_spill] sm:$0xff] %v4755_v33  ;;  %v539_v52 = vpop.f32.mrf.mxu1 }
  0xb7   :  { %1211 = vmatpush.bf16.msra.mxu1 %v4724_v3 }
  0xb8   :  { %v273_v1 = vsel %vm160_vm1, %v3978_v8, 0.0  ;;  %v276_v5 = vsel %vm160_vm1, %v3979_v9, 0.0  ;;  %v1067_v9 = vpack.c.bf16 %v461_v62, %v4703_v50  ;;  %v1068_v62 = vpack.c.bf16 %v4721_v2, %v4708_v56 }
  0xb9   :  { %274 = vadd.xlane.f32.xlu1 %v273_v1  ;;  %277 = vadd.xlane.f32.xlu2 %v276_v5  ;;  %v157_v56 = vunpack.c.l.bf16 %v4581_v54 }
  0xba   :  { %v558_v40 = vpop.f32.mrf.mxu2 }
  0xbb   :  { %1212 = vmatpush.bf16.msra.mxu1 %v3942_v22  ;;  %v200_v12 = vsel %vm160_vm1, %v157_v56, 0.0 }
  0xbc   :  { %v4761_v39 = vpop.f32.mrf.mxu0  ;;  %v577_v58 = vpop.f32.mrf.mxu3 }
  0xbe   :  { %3770 = vmatmul.msk.bf16.vlgmr.msrb.gmra.mxu0 %vm160_vm1, %v4737_v18  ;;  %3772 = vmatmul.msk.bf16.vlgmr.msrb.gmra.mxu2 %vm160_vm1, %v4687_v45  ;;  %v613_v1 = vpop.f32.mrf.mxu1 }
  0xbf   :  { %3996 = vrot.lane.b32.xlu0 %v3995_v20, %s4409_s4  ;;  %v1071_v5 = vpack.c.bf16 %v613_v1, %v4761_v39 }
  0xc1   :  { %280 = vadd.xlane.f32.xlu2 %v279_v21  ;;  %v3949_v21 = vld [vmem:[#allocation5 + $0x8] sm:$0xff] }
  0xc2   :  { %v4770_v8 = vpop.f32.mrf.mxu2 }
  0xc4   :  { %v596_v7 = vpop.f32.mrf.mxu0  ;;  %v4776_v14 = vpop.f32.mrf.mxu3 }
  0xc5   :  { %v1072_v17 = vpack.c.bf16 %v4776_v14, %v4770_v8 }
  0xc6   :  { %3771 = vmatmul.msk.bf16.vlgmr.msrb.gmra.mxu1 %vm160_vm1, %v4710_v57  ;;  %3773 = vmatmul.msk.bf16.vlgmr.msrb.gmra.mxu3 %vm160_vm1, %v4755_v33  ;;  %v615_v23 = vpop.f32.mrf.mxu1 }
  0xca   :  { %v634_v20 = vpop.f32.mrf.mxu2 }
  0xcb   :  { %v3945_v20 = vld [vmem:[#allocation8 + $0x8] sm:$0xff] }
  0xcc   :  { %v4778_v0 = vpop.f32.mrf.mxu0  ;;  %v653_v40 = vpop.f32.mrf.mxu3  ;;  %1126 = vmatpush.bf16.msra.mxu0 %v3945_v20  ;;  %3956 = vmatpush.bf16.msra.mxu3 %v3945_v20  ;;  %v173_v20 = vsel %vm160_vm1, %v148_v31, 0.0  ;;  %v155_v31 = vunpack.c.l.bf16 %v4575_v51 }
  0xcd   :  { %v3944_v40 = vld [vmem:[#allocation8] sm:$0xff] }
  0xce   :  { %3846 = vmatmul.msk.bf16.vlgmr.msra.gmra.mxu2 %vm1095_vm2, %v3948_v48  ;;  %v4787_v39 = vpop.f32.mrf.mxu1  ;;  %v4000_v19 = vpack.i.bf16 %v155_v31, %v154_v10  ;;  %v194_v28 = vsel %vm160_vm1, %v155_v31, 0.0 }
  0xcf   :  { %v1073_v52 = vpack.c.bf16 %v4787_v39, %v4778_v0 }
  0xd0   :  { %1127 = vmatpush.bf16.msra.mxu0 %v3944_v40  ;;  %3957 = vmatpush.bf16.msra.mxu3 %v3944_v40 }
  0xd2   :  { %3991 = vrot.lane.b32.xlu1 %v3990_v6, %s4409_s4  ;;  %v4783_v50 = vpop.f32.mrf.mxu2 }
  0xd4   :  { %v672_v48 = vpop.f32.mrf.mxu0  ;;  %v4792_v6 = vpop.f32.mrf.mxu3  ;;  %3958 = vmatpush.bf16.msrb.mxu3 %v4724_v3 }
  0xd5   :  { %v1074_v7 = vpack.c.bf16 %v4792_v6, %v4783_v50  ;;  %v1069_v48 = vpack.c.bf16 %v537_v25, %v4730_v11  ;;  %v176_v25 = vsel %vm160_vm1, %v149_v32, 0.0 }
  0xd6   :  { %3798 = vmatmul.msk.bf16.vlgmr.msra.gmra.mxu1 %vm1095_vm2, %v1067_v9  ;;  %v691_v1 = vpop.f32.mrf.mxu1 }
  0xd8   :  { %3959 = vmatpush.bf16.msrb.mxu3 %v3942_v22  ;;  %v3950_v22 = vld [vmem:[#allocation5 + $0x10] sm:$0xff] }
  0xda   :  { %v710_v58 = vpop.f32.mrf.mxu2 }
  0xdc   :  { %v729_v23 = vpop.f32.mrf.mxu3 }
  0xde   :  { %3847 = vmatmul.msk.bf16.gmra.mxu2 %vm1095_vm2, %v3949_v21  ;;  %v156_v21 = vunpack.c.l.bf16 %v4583_v55 }
  0xe0   :  { %v4796_v9 = vpop.xlane.xlu0 %162  ;;  %v4005_v2 = vpack.i.bf16 %v157_v56, %v156_v21  ;;  %v197_v50 = vsel %vm160_vm1, %v156_v21, 0.0 }
  0xe2   :  { %4006 = vrot.lane.b32.xlu0 %v4005_v2, %s4409_s4 }
  0xe6   :  { %3799 = vmatmul.msk.bf16.gmra.mxu1 %vm1095_vm2, %v1068_v62 }
  0xee   :  { %3848 = vmatmul.msk.bf16.gmra.mxu2 %vm1095_vm2, %v3950_v22 }
  0xf3   :  { %v3987_v62 = vpop.permute.xlu0 %3986 }
  0xf4   :  { %v3988_v58 = vunpack.i.l.bf16 %v3987_v62  ;;  %v3989_v2 = vunpack.i.h.bf16 %v3987_v62 }
  0xf6   :  { %v285_v1 = vsel %vm160_vm1, %v3988_v58, 0.0  ;;  %3800 = vmatmul.msk.bf16.gmra.mxu1 %vm1095_vm2, %v1069_v48  ;;  %v288_v11 = vsel %vm160_vm1, %v3989_v2, 0.0  ;;  %v179_v2 = vsel %vm160_vm1, %v150_v44, 0.0 }
  0xf7   :  { %286 = vadd.xlane.f32.xlu2 %v285_v1 }
  0xfc   :  { %174 = vadd.xlane.f32.xlu1 %v173_v20  ;;  %v4010_v20 = vpack.i.bf16 %v6477_v27, %v6478_v26 }
  0xff   :  { %289 = vadd.xlane.f32.xlu2 %v288_v11 }
 0x104   :  { %177 = vadd.xlane.f32.xlu1 %v176_v25 }
 0x106   :  { %3801 = vmatmul.msk.bf16.gmra.mxu1 %vm1095_vm2, %v1070_v29 }
 0x10b   :  { %v748_v3 = vpop.f32.mrf.mxu0 }
 0x10c   :  { %180 = vadd.xlane.f32.xlu0 %v179_v2 }
 0x111   :  { %v790_v23 = vpop.f32.mrf.mxu2 }
 0x113   :  { %v750_v40 = vpop.f32.mrf.mxu0  ;;  %v769_v48 = vpop.f32.mrf.mxu1 }
 0x114   :  { %v1075_v32 = vpack.c.bf16 %v769_v48, %v748_v3 }
 0x116   :  { %3782 = vmatmul.msk.bf16.vlgmr.msra.gmra.mxu0 %vm1095_vm2, %v1075_v32  ;;  %3802 = vmatmul.msk.bf16.gmra.mxu1 %vm1095_vm2, %v1071_v5  ;;  %v3951_v5 = vld [vmem:[#allocation5 + $0x18] sm:$0xff]  ;;  %v3952_v32 = vld [vmem:[#allocation5 + $0x20] sm:$0xff] }
 0x117   :  { %4001 = vrot.lane.b32.xlu2 %v4000_v19, %s4409_s4  ;;  %3849 = vmatmul.msk.bf16.gmra.mxu2 %vm1095_vm2, %v3951_v5 }
 0x119   :  { %v792_v29 = vpop.f32.mrf.mxu2  ;;  %v811_v62 = vpop.f32.mrf.mxu3 }
 0x11a   :  { %v1076_v3 = vpack.c.bf16 %v811_v62, %v790_v23  ;;  %v4848_v62 = vpop.xlane.xlu1 %168 }
 0x11b   :  { %v771_v58 = vpop.f32.mrf.mxu1  ;;  %v832_v1 = vpop.f32.mrf.mxu0 }
 0x11f   :  { %4011 = vrot.lane.b32.xlu2 %v4010_v20, %s4409_s4 }
 0x121   :  { %v813_v11 = vpop.f32.mrf.mxu3  ;;  %v874_v25 = vpop.f32.mrf.mxu2 }
 0x123   :  { %v834_v22 = vpop.f32.mrf.mxu0  ;;  %v853_v40 = vpop.f32.mrf.mxu1 }
 0x124   :  { %v1077_v23 = vpack.c.bf16 %v853_v40, %v832_v1  ;;  %v4856_v40 = vpop.xlane.xlu2 %165 }
 0x126   :  { %3783 = vmatmul.msk.bf16.gmra.mxu0 %vm1095_vm2, %v1076_v3  ;;  %3803 = vmatmul.msk.bf16.gmra.mxu1 %vm1095_vm2, %v1072_v17  ;;  %v4854_v3 = vpop.xlane.xlu0 %283 }
 0x127   :  { %3850 = vmatmul.msk.bf16.gmra.mxu2 %vm1095_vm2, %v3952_v32 }
 0x129   :  { %v876_v16 = vpop.f32.mrf.mxu2  ;;  %v895_v44 = vpop.f32.mrf.mxu3 }
 0x12b   :  { %v855_v48 = vpop.f32.mrf.mxu1  ;;  %v916_v19 = vpop.f32.mrf.mxu0 }
 0x12c   :  { %v4852_v11 = vpop.xlane.xlu1 %274 }
 0x131   :  { %v897_v29 = vpop.f32.mrf.mxu3  ;;  %v4846_v58 = vpop.f32.mrf.mxu2 }
 0x132   :  { %v1078_v29 = vpack.c.bf16 %v895_v44, %v874_v25 }
 0x133   :  { %v918_v20 = vpop.f32.mrf.mxu0  ;;  %v937_v2 = vpop.f32.mrf.mxu1 }
 0x136   :  { %3784 = vmatmul.msk.bf16.gmra.mxu0 %vm1095_vm2, %v1077_v23  ;;  %v3997_v23 = vpop.permute.xlu0 %3996 }
 0x137   :  { %v3999_v44 = vunpack.i.h.bf16 %v3997_v23 }
 0x139   :  { %v979_v8 = vpop.f32.mrf.mxu3  ;;  %v960_v14 = vpop.f32.mrf.mxu2 }
 0x13a   :  { %v182_v14 = vsel %vm160_vm1, %v151_v4, 0.0  ;;  %v300_v4 = vsel %vm160_vm1, %v3999_v44, 0.0  ;;  %v1080_v56 = vpack.c.bf16 %v979_v8, %v4846_v58 }
 0x13b   :  { %v939_v17 = vpop.f32.mrf.mxu1  ;;  %v1000_v5 = vpop.f32.mrf.mxu0 }
 0x141   :  { %v981_v22 = vpop.f32.mrf.mxu3  ;;  %v1042_v16 = vpop.f32.mrf.mxu2 }
 0x143   :  { %v1002_v48 = vpop.f32.mrf.mxu0  ;;  %v1021_v1 = vpop.f32.mrf.mxu1 }
 0x144   :  { %v1081_v32 = vpack.c.bf16 %v1021_v1, %v1000_v5  ;;  %v3992_v20 = vpop.permute.xlu1 %3991  ;;  %v3953_v48 = vld [vmem:[#allocation5 + $0x28] sm:$0xff] }
 0x145   :  { %v3993_v27 = vunpack.i.l.bf16 %v3992_v20  ;;  %v3994_v26 = vunpack.i.h.bf16 %v3992_v20  ;;  %3851 = vmatmul.msk.bf16.gmra.mxu2 %vm1095_vm2, %v3953_v48  ;;  %v4939_v48 = vld [vmem:[%s6473_s6] ss:$0 sm:$0xff]  ;;  %s4410_s6 = smov 32  }
 0x146   :  { %3785 = vmatmul.msk.bf16.gmra.mxu0 %vm1095_vm2, %v1078_v29  ;;  %3788 = vmatmul.msk.bf16.vlgmr.msra.gmra.mxu3 %vm1095_vm2, %v1081_v32 }
 0x147   :  { %v291_v17 = vsel %vm160_vm1, %v3993_v27, 0.0  ;;  %v294_v22 = vsel %vm160_vm1, %v3994_v26, 0.0  ;;  %3960 = vmatpush.bf16.msra.mxu3 %v4706_v53  ;;  %v4872_v26 = vpop.xlane.xlu2 %171  ;;  %v191_v53 = vsel %vm160_vm1, %v154_v10, 0.0 }
 0x148   :  { %292 = vadd.xlane.f32.xlu1 %v291_v17  ;;  %295 = vadd.xlane.f32.xlu0 %v294_v22  ;;  %v3954_v17 = vld [vmem:[#allocation5 + $0x30] sm:$0xff] }
 0x149   :  { %v1063_v25 = vpop.f32.mrf.mxu3  ;;  %v1044_v5 = vpop.f32.mrf.mxu2  ;;  %183 = vadd.xlane.f32.xlu2 %v182_v14 }
 0x14a   :  { %v1082_v32 = vpack.c.bf16 %v1063_v25, %v1042_v16  ;;  %v4934_v5 = vld [vmem:[%s6472_s5] ss:$0 sm:$0xff] }
 0x14b   :  { %v1023_v1 = vpop.f32.mrf.mxu1  ;;  %3961 = vmatpush.bf16.msra.mxu3 %v4719_v61  ;;  %v1079_v61 = vpack.c.bf16 %v937_v2, %v916_v19  ;;  %v3998_v19 = vunpack.i.l.bf16 %v3997_v23  ;;  %v4895_v2 = vld [vmem:[%s6475_s8] ss:$0 sm:$0xff] }
 0x14c   :  { %v325_v1 = vmul.f32 %v4934_v5, %v4856_v40 }
 0x14d   :  { %v297_v13 = vsel %vm160_vm1, %v3998_v19, 0.0 }
 0x14f   :  { %v278_v10 = vpop.xlane.xlu2 %277 }
 0x150   :  { %186 = vadd.xlane.f32.xlu1 %v185_v15  ;;  %301 = vadd.xlane.f32.xlu0 %v300_v4  ;;  %v344_v15 = vmul.f32 %v4939_v48, %v278_v10  ;;  %v6526_v4 = vunpack.c.l.bf16 %v4591_v60 }
 0x151   :  { %v1065_v27 = vpop.f32.mrf.mxu3  ;;  %v1358_v29 = vpop.f32.mrf.mxu2  ;;  %192 = vadd.xlane.f32.xlu2 %v191_v53 }
 0x152   :  { %v203_v53 = vsel %vm160_vm1, %v6526_v4, 0.0 }
 0x153   :  { %v1214_v21 = vpop.f32.mrf.mxu1 }
 0x154   :  { %v4007_v39 = vpop.permute.xlu0 %4006 }
 0x155   :  { %v4008_v14 = vunpack.i.l.bf16 %v4007_v39  ;;  %v4009_v60 = vunpack.i.h.bf16 %v4007_v39  ;;  %v324_v39 = vmul.f32 %v4934_v5, %v4796_v9  ;;  %v327_v9 = vmul.f32 %v4934_v5, %v4872_v26 }
 0x156   :  { %3786 = vmatmul.msk.bf16.gmra.mxu0 %vm1095_vm2, %v1079_v61  ;;  %3789 = vmatmul.msk.bf16.gmra.mxu3 %vm1095_vm2, %v1082_v32 }
 0x157   :  { %v4889_v54 = vpop.xlane.xlu2 %280  ;;  %v309_v22 = vsel %vm160_vm1, %v4008_v14, 0.0 }
 0x158   :  { %189 = vadd.xlane.f32.xlu1 %v188_v24  ;;  %201 = vadd.xlane.f32.xlu0 %v200_v12  ;;  %v4952_v24 = vld [vmem:[%s6474_s7] ss:$0 sm:$0xff] }
 0x159   :  { %195 = vadd.xlane.f32.xlu2 %v194_v28  ;;  %v1360_v34 = vpop.f32.mrf.mxu2 }
 0x15a   :  { %v1361_v6 = vadd.f32 %v4895_v2, %v1360_v34  ;;  %v312_v34 = vsel %vm160_vm1, %v4009_v60, 0.0  ;;  %v6529_v60 = vunpack.c.l.bf16 %v4593_v63 }
 0x15b   :  { %v1216_v32 = vpop.f32.mrf.mxu1 }
 0x160   :  { %298 = vadd.xlane.f32.xlu1 %v297_v13  ;;  %v3955_v13 = vld [vmem:[#allocation5 + $0x38] sm:$0xff] }
 0x161   :  { %v1363_v51 = vpop.f32.mrf.mxu2 }
 0x162   :  { %v4903_v31 = vadd.f32 %v4895_v2, %v1363_v51 }
 0x166   :  { %3787 = vmatmul.msk.bf16.gmra.mxu0 %vm1095_vm2, %v1080_v56  ;;  %3804 = vmatmul.msk.bf16.vlgmr.msrb.gmra.mxu3 %vm1095_vm2, %v1073_v52 }
 0x169   :  { %v1365_v25 = vpop.f32.mrf.mxu2 }
 0x16a   :  { %v4905_v16 = vpop.xlane.xlu2 %286  ;;  %v4927_v44 = vadd.f32 %v4895_v2, %v1365_v25  ;;  %v345_v25 = vmul.f32 %v4939_v48, %v4889_v54 }
 0x16b   :  { %v347_v18 = vmul.f32 %v4939_v48, %v4905_v16 }
 0x16c   :  { %1738 = vrot.lane.b32.xlu0 %v4903_v31, %s4403_s17 }
 0x16f   :  { %v4947_v61 = vpop.xlane.xlu1 %174 }
 0x170   :  { %v328_v49 = vmul.f32 %v4934_v5, %v4947_v61 }
 0x172   :  { %v4909_v58 = vpop.xlane.xlu2 %289 }
 0x176   :  { %3805 = vmatmul.msk.bf16.gmra.mxu3 %vm1095_vm2, %v1074_v7  ;;  %v1359_v7 = vadd.f32 %v4895_v2, %v1358_v29  ;;  %v360_v29 = vadd.f32 %v344_v15, %v325_v1  ;;  %v346_v15 = vmul.f32 %v4939_v48, %v4854_v3 }
 0x177   :  { %v4963_v56 = vpop.xlane.xlu1 %177 }
 0x178   :  { %v4955_v40 = vadd.f32 %v4952_v24, %v360_v29 }
 0x17a   :  { %v4002_v8 = vpop.permute.xlu2 %4001  ;;  %6527 = vst [vmem:[#allocation32_spill] sm:$0xff] %v4955_v40 }
 0x17b   :  { %v4004_v20 = vunpack.i.h.bf16 %v4002_v8  ;;  %v4003_v0 = vunpack.i.l.bf16 %v4002_v8 }
 0x17d   :  { %v306_v52 = vsel %vm160_vm1, %v4004_v20, 0.0  ;;  %v303_v23 = vsel %vm160_vm1, %v4003_v0, 0.0  ;;  %v343_v20 = vmul.f32 %v4939_v48, %v4852_v11 }
 0x17e   :  { %307 = vadd.xlane.f32.xlu1 %v306_v52  ;;  %304 = vadd.xlane.f32.xlu2 %v303_v23  ;;  %v1219_v52 = vpop.f32.mrf.mxu1 }
 0x17f   :  { %v359_v14 = vadd.f32 %v343_v20, %v324_v39 }
 0x181   :  { %v4986_v4 = vadd.f32 %v4952_v24, %v359_v14 }
 0x182   :  { %v4957_v10 = vpop.permute.xlu2 %4011 }
 0x183   :  { %6528 = vst [vmem:[#allocation33_spill] sm:$0xff] %v4986_v4 }
 0x186   :  { %3852 = vmatmul.msk.bf16.vlgmr.msra.gmra.mxu3 %vm1095_vm2, %v3954_v17  ;;  %310 = vadd.xlane.f32.xlu1 %v309_v22 }
 0x187   :  { %198 = vadd.xlane.f32.xlu2 %v197_v50  ;;  %v1368_v50 = vpop.f32.mrf.mxu2 }
 0x188   :  { %v4992_v54 = vadd.f32 %v4895_v2, %v1368_v50 }
 0x193   :  { %v1129_v55 = vpop.f32.mrf.mxu0 }
 0x194   :  { %v1215_v22 = vadd.f32 %v1214_v21, %v1129_v55 }
 0x196   :  { %3853 = vmatmul.msk.bf16.gmra.mxu3 %vm1095_vm2, %v3955_v13  ;;  %v4989_v55 = vadd.f32 %v1215_v22, %v4986_v4 }
 0x19b   :  { %v1131_v27 = vpop.f32.mrf.mxu0 }
 0x19c   :  { %v1217_v12 = vadd.f32 %v1216_v32, %v1131_v27  ;;  %v1221_v32 = vpop.f32.mrf.mxu1 }
 0x19e   :  { %v4960_v19 = vadd.f32 %v1217_v12, %v4955_v40  ;;  %v1398_v12 = vadd.f32 %v1359_v7, %v4989_v55 }
 0x19f   :  { %1736 = vrot.lane.b32.xlu2 %v1361_v6, %s4403_s17  ;;  %1734 = vrot.lane.b32.xlu1 %v1359_v7, %s4403_s17 }
 0x1a0   :  { %v1399_v51 = vadd.f32 %v1361_v6, %v4960_v19  ;;  %v326_v6 = vmul.f32 %v4934_v5, %v4848_v62 }
 0x1a2   :  { %v3855_v23 = vmul.f32 -1.442695, %v1399_v51  ;;  %v361_v62 = vadd.f32 %v345_v25, %v326_v6 }
 0x1a3   :  { %v1134_v0 = vpop.f32.mrf.mxu0 }
 0x1a4   :  { %4019 = vpow2.f32 %v3855_v23  ;;  %v1220_v26 = vadd.f32 %v1219_v52, %v1134_v0  ;;  %v5003_v13 = vadd.f32 %v4952_v24, %v361_v62  ;;  %v1370_v0 = vpop.f32.mrf.mxu2  ;;  %v3854_v23 = vmul.f32 -1.442695, %v1398_v12 }
 0x1a5   :  { %v5025_v6 = vadd.f32 %v4895_v2, %v1370_v0 }
 0x1a6   :  { %6530 = vst [vmem:[#allocation34_spill] sm:$0xff] %v5003_v13  ;;  %v5011_v7 = vadd.f32 %v1220_v26, %v5003_v13 }
 0x1a7   :  { %1740 = vrot.lane.b32.xlu1 %v4927_v44, %s4403_s17 }
 0x1a8   :  { %v1400_v14 = vadd.f32 %v4903_v31, %v5011_v7 }
 0x1aa   :  { %v4020_v29 = vpop.eup %4019 }
 0x1ab   :  { %v1136_v21 = vpop.f32.mrf.mxu0  ;;  %v1463_v20 = vadd.f32 1.0, %v4020_v29 }
 0x1ac   :  { %v1222_v3 = vadd.f32 %v1221_v32, %v1136_v21 }
 0x1ad   :  { %4021 = vrcp.f32 %v1463_v20  ;;  %v1504_v13 = vand.u32 2147483648, %v1463_v20  ;;  %vm1498_vm4 = vweird.f32 %v1463_v20 }
 0x1ae   :  { %4023 = vpow2.f32 %v3854_v23 }
 0x1b3   :  { %v4022_v62 = vpop.eup %4021 }
 0x1b4   :  { %v4024_v29 = vpop.eup %4023  ;;  %v1494_v32 = vmul.f32 %v4022_v62, %v1463_v20  ;;  %vm1499_vm3 = vweird.f32 %v4022_v62 }
 0x1b5   :  { %vm1500_vm5 = vmor %vm1498_vm4, %vm1499_vm3 }
 0x1bb   :  { %v4979_v11 = vpop.xlane.xlu1 %292 }
 0x1bc   :  { %v4973_v17 = vpop.xlane.xlu2 %183 }
 0x1c3   :  { %v5013_v52 = vpop.xlane.xlu1 %186 }
 0x1c4   :  { %v4994_v27 = vpop.xlane.xlu2 %192 }
 0x1c8   :  { %204 = vadd.xlane.f32.xlu2 %v203_v53  ;;  %v362_v53 = vadd.f32 %v346_v15, %v327_v9  ;;  %v3856_v15 = vmul.f32 -1.442695, %v1400_v14 }
 0x1c9   :  { %v1159_v28 = vpop.f32.mrf.mxu3 }
 0x1ca   :  { %v5008_v39 = vadd.f32 %v4952_v24, %v362_v53  ;;  %v1373_v53 = vpop.f32.mrf.mxu2  ;;  %4025 = vpow2.f32 %v3856_v15 }
 0x1cb   :  { %v5031_v31 = vpop.xlane.xlu1 %189  ;;  %v5036_v26 = vadd.f32 %v4895_v2, %v1373_v53 }
 0x1cc   :  { %6531 = vst [vmem:[#allocation35_spill] sm:$0xff] %v5008_v39  ;;  %v5016_v63 = vadd.f32 %v1222_v3, %v5008_v39  ;;  %v5022_v50 = vpop.xlane.xlu2 %195 }
 0x1ce   :  { %v1401_v22 = vadd.f32 %v4927_v44, %v5016_v63  ;;  %v5033_v44 = vpop.xlane.xlu0 %180 }
 0x1d0   :  { %v3857_v21 = vmul.f32 -1.442695, %v1401_v22 }
 0x1d1   :  { %v4966_v8 = vpop.f32.mrf.mxu3  ;;  %313 = vadd.xlane.f32.xlu1 %v312_v34  ;;  %v206_v34 = vsel %vm160_vm1, %v6529_v60, 0.0  ;;  %v1495_v60 = vsub.f32 1.0, %v1494_v32 }
 0x1d2   :  { %207 = vadd.xlane.f32.xlu0 %v206_v34  ;;  %4027 = vpow2.f32 %v3857_v21  ;;  %v4026_v34 = vpop.eup %4025 }
 0x1d3   :  { %v5047_v23 = vpop.xlane.xlu1 %298  ;;  %v1496_v14 = vmul.f32 %v4022_v62, %v1495_v60  ;;  %v5049_v22 = vadd.f32 1.0, %v4026_v34  ;;  %v1502_v60 = vand.u32 2147483647, %v1463_v20 }
 0x1d5   :  { %v1497_v32 = vadd.f32 %v4022_v62, %v1496_v14  ;;  %vm1503_vm6 = vcmp.eq.f32.partialorder %v1502_v60, 8.507059e+37  ;;  %v363_v60 = vadd.f32 %v347_v18, %v328_v49  ;;  %vm1513_vm13 = vweird.f32 %v5049_v22 }
 0x1d6   :  { %v5053_v15 = vpop.xlane.xlu0 %295 }
 0x1d7   :  { %v1501_v40 = vsel %vm1500_vm5, %v4022_v62, %v1497_v32  ;;  %v5079_v46 = vadd.f32 %v4952_v24, %v363_v60 }
 0x1d8   :  { %v4028_v0 = vpop.eup %4027 }
 0x1d9   :  { %v1164_v1 = vpop.f32.mrf.mxu3  ;;  %6532 = vst [vmem:[#allocation36_spill] sm:$0xff] %v5079_v46 }
 0x1de   :  { %v5068_v41 = vpop.xlane.xlu0 %301 }
 0x1e0   :  { %1742 = vrot.lane.b32.xlu2 %v4992_v54, %s4403_s17 }
 0x1e1   :  { %v5005_v51 = vpop.f32.mrf.mxu3 }
 0x1e6   :  { %v5087_v49 = vpop.xlane.xlu0 %201 }
 0x1e9   :  { %v1244_v25 = vpop.f32.mrf.mxu3 }
 0x1ea   :  { %v5027_v9 = vadd.f32 %v1244_v25, %v1159_v28  ;;  %1744 = vrot.lane.b32.xlu1 %v5025_v6, %s4403_s17  ;;  %v5038_v28 = vadd.f32 1.0, %v4024_v29  ;;  %v5051_v25 = vadd.f32 1.0, %v4028_v0 }
 0x1ec   :  { %4029 = vrcp.f32 %v5038_v28  ;;  %v1489_v16 = vand.u32 2147483648, %v5038_v28  ;;  %vm1483_vm8 = vweird.f32 %v5038_v28  ;;  %vm1528_vm15 = vweird.f32 %v5051_v25 }
 0x1ed   :  { %4031 = vrcp.f32 %v5049_v22 }
 0x1ee   :  { %4033 = vrcp.f32 %v5051_v25 }
 0x1f1   :  { %v5040_v12 = vpop.f32.mrf.mxu3  ;;  %v5042_v3 = vpop.xlane.xlu2 %304 }
 0x1f2   :  { %1746 = vrot.lane.b32.xlu1 %v5036_v26, %s4403_s17  ;;  %v4030_v39 = vpop.eup %4029  ;;  %v5062_v0 = vpop.xlane.xlu1 %307 }
 0x1f3   :  { %v1479_v34 = vmul.f32 %v4030_v39, %v5038_v28  ;;  %vm1484_vm7 = vweird.f32 %v4030_v39 }
 0x1f4   :  { %vm1485_vm9 = vmor %vm1483_vm8, %vm1484_vm7 }
 0x1f5   :  { %v1480_v14 = vsub.f32 1.0, %v1479_v34  ;;  %v1224_v34 = vpop.f32.mrf.mxu1 }
 0x1f7   :  { %v1481_v62 = vmul.f32 %v4030_v39, %v1480_v14  ;;  %v1487_v14 = vand.u32 2147483647, %v5038_v28 }
 0x1f9   :  { %v1249_v21 = vpop.f32.mrf.mxu3  ;;  %v1482_v61 = vadd.f32 %v4030_v39, %v1481_v62  ;;  %vm1488_vm10 = vcmp.eq.f32.partialorder %v1487_v14, 8.507059e+37 }
 0x1fa   :  { %v5055_v53 = vadd.f32 %v1249_v21, %v1164_v1  ;;  %v5057_v29 = vpop.xlane.xlu2 %198  ;;  %v1505_v1 = vor.u32 1.1754944e-38, %v1504_v13  ;;  %v4032_v21 = vpop.eup %4031 }
 0x1fb   :  { %v4034_v33 = vpop.eup %4033  ;;  %v1139_v13 = vpop.f32.mrf.mxu0  ;;  %v1509_v32 = vmul.f32 %v4032_v21, %v5049_v22  ;;  %v1486_v18 = vsel %vm1485_vm9, %v4030_v39, %v1482_v61  ;;  %vm1514_vm11 = vweird.f32 %v4032_v21  ;;  %v1519_v39 = vand.u32 2147483648, %v5049_v22 }
 0x1fc   :  { %v5064_v45 = vsel %vm1503_vm6, %v1505_v1, %v1501_v40  ;;  %v1524_v40 = vmul.f32 %v4034_v33, %v5051_v25  ;;  %v1225_v1 = vadd.f32 %v1224_v34, %v1139_v13  ;;  %v5076_v47 = vpop.xlane.xlu1 %310  ;;  %vm1529_vm12 = vweird.f32 %v4034_v33  ;;  %vm1515_vm14 = vmor %vm1513_vm13, %vm1514_vm11 }
 0x1fd   :  { %v1510_v57 = vsub.f32 1.0, %v1509_v32  ;;  %v1490_v32 = vor.u32 1.1754944e-38, %v1489_v16  ;;  %v1532_v61 = vand.u32 2147483647, %v5051_v25  ;;  %vm1530_vm3 = vmor %vm1528_vm15, %vm1529_vm12 }
 0x1ff   :  { %v1511_v13 = vmul.f32 %v4032_v21, %v1510_v57  ;;  %v5091_v34 = vsel %vm1488_vm10, %v1490_v32, %v1486_v18  ;;  %v1534_v57 = vand.u32 2147483648, %v5051_v25  ;;  %v1739_v18 = vpop.permute.xlu0 %1738  ;;  %vm1533_vm5 = vcmp.eq.f32.partialorder %v1532_v61, 8.507059e+37 }
 0x201   :  { %v1512_v36 = vadd.f32 %v4032_v21, %v1511_v13  ;;  %v1520_v13 = vor.u32 1.1754944e-38, %v1519_v39 }
 0x202   :  { %v1737_v4 = vpop.permute.xlu2 %1736 }
 0x203   :  { %v1783_v20 = vmul.f32 %v1737_v4, %v5064_v45  ;;  %v1525_v4 = vsub.f32 1.0, %v1524_v40  ;;  %v1516_v16 = vsel %vm1515_vm14, %v4032_v21, %v1512_v36  ;;  %v329_v36 = vmul.f32 %v4934_v5, %v4963_v56  ;;  %v1141_v21 = vpop.f32.mrf.mxu0 }
 0x205   :  { %1816 = vrot.lane.b32.xlu2 %v1783_v20, %s4403_s17  ;;  %v5085_v20 = vadd.f32 %v1225_v1, %v5079_v46  ;;  %v1526_v62 = vmul.f32 %v4034_v33, %v1525_v4 }
 0x207   :  { %v1402_v40 = vadd.f32 %v4992_v54, %v5085_v20  ;;  %v1527_v1 = vadd.f32 %v4034_v33, %v1526_v62  ;;  %v1517_v54 = vand.u32 2147483647, %v5049_v22  ;;  %v1535_v62 = vor.u32 1.1754944e-38, %v1534_v57 }
 0x209   :  { %v3858_v4 = vmul.f32 -1.442695, %v1402_v40  ;;  %v1531_v14 = vsel %vm1530_vm3, %v4034_v33, %v1527_v1  ;;  %vm1518_vm4 = vcmp.eq.f32.partialorder %v1517_v54, 8.507059e+37  ;;  %v348_v33 = vmul.f32 %v4939_v48, %v4909_v58  ;;  %v1226_v1 = vpop.f32.mrf.mxu1 }
 0x20a   :  { %v1227_v57 = vadd.f32 %v1226_v1, %v1141_v21 }
 0x20b   :  { %4035 = vpow2.f32 %v3858_v4  ;;  %v364_v40 = vadd.f32 %v348_v33, %v329_v36 }
 0x20d   :  { %v5114_v54 = vadd.f32 %v4952_v24, %v364_v40 }
 0x20f   :  { %6533 = vst [vmem:[#allocation37_spill] sm:$0xff] %v5114_v54  ;;  %v5117_v61 = vadd.f32 %v1227_v57, %v5114_v54 }
 0x211   :  { %v1735_v60 = vpop.permute.xlu1 %1734  ;;  %v4036_v25 = vpop.eup %4035 }
 0x212   :  { %v1782_v28 = vmul.f32 %v1735_v60, %v5091_v34  ;;  %v5101_v60 = vsel %vm1518_vm4, %v1520_v13, %v1516_v16  ;;  %v1466_v39 = vadd.f32 1.0, %v4036_v25 }
 0x213   :  { %v1784_v22 = vmul.f32 %v1739_v18, %v5101_v60 }
 0x214   :  { %1814 = vrot.lane.b32.xlu0 %v1782_v28, %s4403_s17  ;;  %v5103_v28 = vsel %vm1533_vm5, %v1535_v62, %v1531_v14  ;;  %4037 = vrcp.f32 %v1466_v39  ;;  %v5123_v62 = vpop.f32.mrf.mxu2  ;;  %v1549_v36 = vand.u32 2147483648, %v1466_v39  ;;  %vm1543_vm7 = vweird.f32 %v1466_v39 }
 0x215   :  { %v1547_v33 = vand.u32 2147483647, %v1466_v39 }
 0x216   :  { %v1550_v21 = vor.u32 1.1754944e-38, %v1549_v36 }
 0x217   :  { %vm1548_vm9 = vcmp.eq.f32.partialorder %v1547_v33, 8.507059e+37 }
 0x219   :  { %v1741_v32 = vpop.permute.xlu1 %1740 }
 0x21a   :  { %v1785_v46 = vmul.f32 %v1741_v32, %v5103_v28  ;;  %v4038_v56 = vpop.eup %4037 }
 0x21b   :  { %v1539_v16 = vmul.f32 %v4038_v56, %v1466_v39  ;;  %vm1544_vm6 = vweird.f32 %v4038_v56 }
 0x21c   :  { %1818 = vrot.lane.b32.xlu0 %v1784_v22, %s4403_s17  ;;  %1820 = vrot.lane.b32.xlu2 %v1785_v46, %s4403_s17  ;;  %v1403_v46 = vadd.f32 %v5025_v6, %v5117_v61  ;;  %vm1545_vm8 = vmor %vm1543_vm7, %vm1544_vm6  ;;  %v4013_v6 = vunpack.i.l.bf16 %v4957_v10 }
 0x21d   :  { %v1540_v58 = vsub.f32 1.0, %v1539_v16  ;;  %v1378_v16 = vpop.f32.mrf.mxu2 }
 0x21e   :  { %v3859_v4 = vmul.f32 -1.442695, %v1403_v46  ;;  %v315_v57 = vsel %vm160_vm1, %v4013_v6, 0.0  ;;  %v5141_v6 = vpop.f32.mrf.mxu3 }
 0x21f   :  { %v1541_v14 = vmul.f32 %v4038_v56, %v1540_v58  ;;  %v5132_v58 = vadd.f32 %v4895_v2, %v1378_v16 }
 0x220   :  { %4039 = vpow2.f32 %v3859_v4 }
 0x221   :  { %v1542_v22 = vadd.f32 %v4038_v56, %v1541_v14 }
 0x223   :  { %v1546_v25 = vsel %vm1545_vm8, %v4038_v56, %v1542_v22 }
 0x224   :  { %v5126_v1 = vsel %vm1548_vm9, %v1550_v21, %v1546_v25 }
 0x225   :  { %v1380_v56 = vpop.f32.mrf.mxu2 }
 0x226   :  { %v4040_v18 = vpop.eup %4039  ;;  %v5139_v36 = vadd.f32 %v4895_v2, %v1380_v56 }
 0x227   :  { %v1467_v32 = vadd.f32 1.0, %v4040_v18 }
 0x229   :  { %4041 = vrcp.f32 %v1467_v32  ;;  %v1564_v25 = vand.u32 2147483648, %v1467_v32  ;;  %vm1558_vm11 = vweird.f32 %v1467_v32  ;;  %v1562_v21 = vand.u32 2147483647, %v1467_v32 }
 0x22b   :  { %vm1563_vm13 = vcmp.eq.f32.partialorder %v1562_v21, 8.507059e+37 }
 0x22f   :  { %v4042_v4 = vpop.eup %4041 }
 0x230   :  { %v1554_v39 = vmul.f32 %v4042_v4, %v1467_v32  ;;  %vm1559_vm10 = vweird.f32 %v4042_v4 }
 0x231   :  { %vm1560_vm12 = vmor %vm1558_vm11, %vm1559_vm10 }
 0x232   :  { %v1555_v14 = vsub.f32 1.0, %v1554_v39 }
 0x234   :  { %v1556_v18 = vmul.f32 %v4042_v4, %v1555_v14 }
 0x236   :  { %v1557_v33 = vadd.f32 %v4042_v4, %v1556_v18  ;;  %v1388_v18 = vpop.f32.mrf.mxu3 }
 0x23b   :  { %v5121_v13 = vpop.xlane.xlu2 %204 }
 0x243   :  { %v1743_v40 = vpop.permute.xlu2 %1742 }
 0x244   :  { %v1786_v46 = vmul.f32 %v1743_v40, %v5126_v1  ;;  %v5136_v22 = vpop.xlane.xlu1 %313  ;;  %v1383_v40 = vpop.f32.mrf.mxu2 }
 0x245   :  { %316 = vadd.xlane.f32.xlu2 %v315_v57  ;;  %v1561_v57 = vsel %vm1560_vm12, %v4042_v4, %v1557_v33  ;;  %v1390_v33 = vpop.f32.mrf.mxu3 }
 0x246   :  { %1822 = vrot.lane.b32.xlu1 %v1786_v46, %s4403_s17  ;;  %v1565_v46 = vor.u32 1.1754944e-38, %v1564_v25  ;;  %v5160_v25 = vadd.f32 %v4895_v2, %v1390_v33  ;;  %v1144_v33 = vpop.f32.mrf.mxu0 }
 0x248   :  { %v5145_v39 = vsel %vm1563_vm13, %v1565_v46, %v1561_v57 }
 0x24c   :  { %v1385_v37 = vpop.f32.mrf.mxu2 }
 0x24d   :  { %v5151_v32 = vadd.f32 %v4895_v2, %v1385_v37  ;;  %v5169_v37 = vpop.xlane.xlu0 %207 }
 0x24e   :  { %1750 = vrot.lane.b32.xlu1 %v5132_v58, %s4403_s17  ;;  %v5181_v59 = vpop.f32.mrf.mxu0 }
 0x256   :  { %1752 = vrot.lane.b32.xlu1 %v5139_v36, %s4403_s17 }
 0x25c   :  { %v1745_v16 = vpop.permute.xlu1 %1744 }
 0x25d   :  { %v1787_v14 = vmul.f32 %v1745_v16, %v5145_v39 }
 0x25f   :  { %v1817_v56 = vpop.permute.xlu2 %1816  ;;  %1824 = vrot.lane.b32.xlu1 %v1787_v14, %s4403_s17 }
 0x260   :  { %v1863_v54 = vadd.f32 %v1817_v56, %v4960_v19  ;;  %v1393_v19 = vpop.f32.mrf.mxu3 }
 0x262   :  { %4043 = vtanh.f32 %v1863_v54  ;;  %v5165_v54 = vadd.f32 %v4895_v2, %v1393_v19  ;;  %v1229_v19 = vpop.f32.mrf.mxu1 }
 0x267   :  { %1756 = vrot.lane.b32.xlu1 %v5151_v32, %s4403_s17 }
 0x268   :  { %v5155_v4 = vpop.eup %4043 }
 0x269   :  { %1912 = vrot.lane.b32.xlu2 %v5155_v4, %s4403_s17 }
 0x26f   :  { %1760 = vrot.lane.b32.xlu1 %v5160_v25, %s4403_s17 }
 0x277   :  { %1762 = vrot.lane.b32.xlu1 %v5165_v54, %s4403_s17 }
 0x286   :  { %v1815_v21 = vpop.permute.xlu0 %1814 }
 0x287   :  { %v1862_v57 = vadd.f32 %v1815_v21, %v4989_v55  ;;  %v5183_v55 = vpop.f32.mrf.mxu1  ;;  %v332_v21 = vmul.f32 %v4934_v5, %v5013_v52 }
 0x289   :  { %4045 = vtanh.f32 %v1862_v57  ;;  %v4014_v57 = vunpack.i.h.bf16 %v4957_v10  ;;  %v349_v10 = vmul.f32 %v4939_v48, %v4979_v11  ;;  %v5213_v11 = vadd.f32 %v4895_v2, %v1383_v40  ;;  %v5228_v40 = vpop.permute.xlu1 %1746 }
 0x28b   :  { %v318_v42 = vsel %vm160_vm1, %v4014_v57, 0.0 }
 0x28e   :  { %v1819_v46 = vpop.permute.xlu0 %1818 }
 0x28f   :  { %v5172_v16 = vpop.eup %4045  ;;  %v1864_v14 = vadd.f32 %v1819_v46, %v5011_v7  ;;  %v351_v7 = vmul.f32 %v4939_v48, %v5047_v23  ;;  %v1234_v35 = vpop.f32.mrf.mxu1  ;;  %v330_v23 = vmul.f32 %v4934_v5, %v5033_v44 }
 0x290   :  { %1910 = vrot.lane.b32.xlu0 %v5172_v16, %s4403_s17 }
 0x291   :  { %4047 = vtanh.f32 %v1864_v14  ;;  %v367_v46 = vadd.f32 %v351_v7, %v332_v21  ;;  %v1149_v14 = vpop.f32.mrf.mxu0  ;;  %v5205_v21 = vadd.f32 %v4895_v2, %v5123_v62  ;;  %v1821_v62 = vpop.permute.xlu2 %1820 }
 0x292   :  { %v1235_v38 = vadd.f32 %v1234_v35, %v1149_v14  ;;  %v1865_v57 = vadd.f32 %v1821_v62, %v5016_v63 }
 0x293   :  { %v5192_v30 = vadd.f32 %v4952_v24, %v367_v46  ;;  %v5224_v46 = vadd.f32 %v4895_v2, %v1388_v18  ;;  %v4211_v18 = vld [vmem:[#allocation5 + $0x4] sm:$0xf] }
 0x295   :  { %6535 = vst [vmem:[#allocation39_spill] sm:$0xff] %v5192_v30  ;;  %v5195_v43 = vadd.f32 %v1235_v38, %v5192_v30  ;;  %v356_v30 = vmul.f32 %v4939_v48, %v5136_v22  ;;  %v1247_v22 = vadd.f32 %v5040_v12, %v4966_v8 }
 0x297   :  { %v5177_v56 = vpop.eup %4047  ;;  %v1406_v52 = vadd.f32 %v5132_v58, %v5195_v43  ;;  %v1230_v58 = vadd.f32 %v1229_v19, %v1144_v33  ;;  %v1236_v8 = vpop.f32.mrf.mxu1 }
 0x298   :  { %6534 = vst [vmem:[#allocation38_spill] sm:$0xff] %v5177_v56  ;;  %1914 = vrot.lane.b32.xlu2 %v5177_v56, %s4403_s17 }
 0x299   :  { %v3862_v56 = vmul.f32 -1.442695, %v1406_v52 }
 0x29b   :  { %4049 = vpow2.f32 %v3862_v56 }
 0x2a1   :  { %v4050_v35 = vpop.eup %4049 }
 0x2a2   :  { %v1470_v7 = vadd.f32 1.0, %v4050_v35 }
 0x2a4   :  { %4051 = vrcp.f32 %v1470_v7  ;;  %vm1603_vm15 = vweird.f32 %v1470_v7 }
 0x2a5   :  { %4053 = vtanh.f32 %v1865_v57 }
 0x2aa   :  { %v4052_v33 = vpop.eup %4051 }
 0x2ab   :  { %v1599_v14 = vmul.f32 %v4052_v33, %v1470_v7  ;;  %vm1604_vm14 = vweird.f32 %v4052_v33 }
 0x2ac   :  { %vm1605_vm3 = vmor %vm1603_vm15, %vm1604_vm14 }
 0x2b8   :  { %v5230_v52 = vpop.xlane.xlu2 %316 }
 0x2ba   :  { %319 = vadd.xlane.f32.xlu0 %v318_v42  ;;  %v365_v42 = vadd.f32 %v349_v10, %v330_v23  ;;  %v1600_v10 = vsub.f32 1.0, %v1599_v14  ;;  %v5232_v23 = vpop.eup %4053  ;;  %v1607_v14 = vand.u32 2147483647, %v1470_v7 }
 0x2bb   :  { %6537 = vst [vmem:[#allocation41_spill] sm:$0xff] %v5232_v23 }
 0x2bc   :  { %v5210_v38 = vadd.f32 %v4952_v24, %v365_v42  ;;  %v411_v42 = vunpack.c.l.bf16 %v4211_v18  ;;  %v1601_v35 = vmul.f32 %v4052_v33, %v1600_v10  ;;  %v337_v10 = vmul.f32 %v4934_v5, %v5087_v49 }
 0x2bd   :  { %vm1608_vm4 = vcmp.eq.f32.partialorder %v1607_v14, 8.507059e+37  ;;  %v350_v49 = vmul.f32 %v4939_v48, %v5053_v15  ;;  %v333_v15 = vmul.f32 %v4934_v5, %v5031_v31  ;;  %v353_v31 = vmul.f32 %v4939_v48, %v5042_v3 }
 0x2be   :  { %6536 = vst [vmem:[#allocation40_spill] sm:$0xff] %v5210_v38  ;;  %v5216_v44 = vadd.f32 %v1230_v58, %v5210_v38  ;;  %v1602_v57 = vadd.f32 %v4052_v33, %v1601_v35  ;;  %v372_v35 = vadd.f32 %v356_v30, %v337_v10  ;;  %v331_v30 = vmul.f32 %v4934_v5, %v4973_v17 }
 0x2bf   :  { %v352_v17 = vmul.f32 %v4939_v48, %v5068_v41 }
 0x2c0   :  { %v1404_v56 = vadd.f32 %v5036_v26, %v5216_v44  ;;  %v5236_v26 = vpop.permute.xlu1 %1822  ;;  %v1606_v38 = vsel %vm1605_vm3, %v4052_v33, %v1602_v57  ;;  %v366_v10 = vadd.f32 %v350_v49, %v331_v30  ;;  %v1232_v49 = vadd.f32 %v5183_v55, %v5181_v59  ;;  %v1239_v55 = vpop.f32.mrf.mxu1 }
 0x2c1   :  { %v334_v30 = vmul.f32 %v4934_v5, %v4994_v27 }
 0x2c2   :  { %v3860_v19 = vmul.f32 -1.442695, %v1404_v56 }
 0x2c3   :  { %v1913_v58 = vpop.permute.xlu2 %1912 }
 0x2c4   :  { %4055 = vpow2.f32 %v3860_v19  ;;  %v1959_v56 = vsub.f32 %v411_v42, %v1913_v58  ;;  %v1609_v19 = vand.u32 2147483648, %v1470_v7 }
 0x2c6   :  { %v1610_v18 = vor.u32 1.1754944e-38, %v1609_v19 }
 0x2ca   :  { %v4056_v63 = vpop.eup %4055 }
 0x2cb   :  { %v1468_v62 = vadd.f32 1.0, %v4056_v63  ;;  %v5243_v63 = vsel %vm1608_vm4, %v1610_v18, %v1606_v38  ;;  %v4212_v38 = vld [vmem:[#allocation5] sm:$0xf]  ;;  %v1151_v18 = vpop.f32.mrf.mxu0 }
 0x2cc   :  { %v1237_v3 = vadd.f32 %v1236_v8, %v1151_v18 }
 0x2cd   :  { %4057 = vrcp.f32 %v1468_v62  ;;  %vm1573_vm6 = vweird.f32 %v1468_v62 }
 0x2ce   :  { %1748 = vrot.lane.b32.xlu0 %v5205_v21, %s4403_s17 }
 0x2d3   :  { %v4058_v42 = vpop.eup %4057 }
 0x2d4   :  { %v1569_v7 = vmul.f32 %v4058_v42, %v1468_v62  ;;  %vm1574_vm5 = vweird.f32 %v4058_v42 }
 0x2d5   :  { %vm1575_vm7 = vmor %vm1573_vm6, %vm1574_vm5 }
 0x2d6   :  { %1754 = vrot.lane.b32.xlu0 %v5213_v11, %s4403_s17  ;;  %v1570_v33 = vsub.f32 1.0, %v1569_v7 }
 0x2d8   :  { %v1571_v19 = vmul.f32 %v4058_v42, %v1570_v33  ;;  %v1577_v33 = vand.u32 2147483647, %v1468_v62 }
 0x2da   :  { %vm1578_vm8 = vcmp.eq.f32.partialorder %v1577_v33, 8.507059e+37 }
 0x2de   :  { %1758 = vrot.lane.b32.xlu0 %v5224_v46, %s4403_s17 }
 0x2e6   :  { %1916 = vrot.lane.b32.xlu0 %v5232_v23, %s4403_s17  ;;  %v1751_v23 = vpop.permute.xlu1 %1750 }
 0x2e7   :  { %v1790_v58 = vmul.f32 %v1751_v23, %v5243_v63  ;;  %v410_v23 = vunpack.c.l.bf16 %v4212_v38 }
 0x2ee   :  { %1992 = vrot.lane.b32.xlu0 %v1959_v56, %s4410_s6  ;;  %v5248_v56 = vadd.f32 %v4952_v24, %v372_v35 }
 0x2f0   :  { %v5253_v57 = vadd.f32 %v1247_v22, %v5248_v56  ;;  %v1579_v22 = vand.u32 2147483648, %v1468_v62 }
 0x2f2   :  { %v1411_v14 = vadd.f32 %v5160_v25, %v5253_v57  ;;  %v5267_v25 = vadd.f32 %v4952_v24, %v366_v10  ;;  %v1580_v41 = vor.u32 1.1754944e-38, %v1579_v22  ;;  %v369_v10 = vadd.f32 %v353_v31, %v334_v30 }
 0x2f4   :  { %v3867_v7 = vmul.f32 -1.442695, %v1411_v14  ;;  %v5278_v62 = vadd.f32 %v1232_v49, %v5267_v25  ;;  %v1154_v14 = vpop.f32.mrf.mxu0  ;;  %v5308_v49 = vpop.permute.xlu1 %1752 }
 0x2f5   :  { %v1240_v18 = vadd.f32 %v1239_v55, %v1154_v14 }
 0x2f6   :  { %1830 = vrot.lane.b32.xlu0 %v1790_v58, %s4403_s17  ;;  %v1572_v58 = vadd.f32 %v4058_v42, %v1571_v19  ;;  %4059 = vpow2.f32 %v3867_v7  ;;  %v1395_v7 = vpop.f32.mrf.mxu3 }
 0x2f7   :  { %v5306_v33 = vadd.f32 %v4895_v2, %v1395_v7 }
 0x2f8   :  { %v1576_v38 = vsel %vm1575_vm7, %v4058_v42, %v1572_v58  ;;  %v5291_v58 = vadd.f32 %v4952_v24, %v369_v10 }
 0x2f9   :  { %v5275_v19 = vsel %vm1578_vm8, %v1580_v41, %v1576_v38  ;;  %v355_v38 = vmul.f32 %v4939_v48, %v5076_v47  ;;  %v4213_v47 = vld [vmem:[#allocation5 + $0x8] sm:$0xf] }
 0x2fa   :  { %v1788_v59 = vmul.f32 %v5228_v40, %v5275_v19  ;;  %v1405_v40 = vadd.f32 %v5205_v21, %v5278_v62 }
 0x2fc   :  { %v4060_v42 = vpop.eup %4059  ;;  %v1156_v21 = vpop.f32.mrf.mxu0 }
 0x2fd   :  { %v5298_v8 = vadd.f32 1.0, %v4060_v42  ;;  %v1825_v55 = vpop.permute.xlu1 %1824  ;;  %v412_v42 = vunpack.c.l.bf16 %v4213_v47 }
 0x2ff   :  { %4061 = vrcp.f32 %v5298_v8  ;;  %vm1678_vm10 = vweird.f32 %v5298_v8 }
 0x302   :  { %v1911_v35 = vpop.permute.xlu0 %1910 }
 0x303   :  { %v1958_v12 = vsub.f32 %v410_v23, %v1911_v35  ;;  %v368_v23 = vadd.f32 %v352_v17, %v333_v15  ;;  %v335_v35 = vmul.f32 %v4934_v5, %v5022_v50  ;;  %v1866_v50 = vadd.f32 %v5236_v26, %v5085_v20  ;;  %v1241_v26 = vpop.f32.mrf.mxu1 }
 0x304   :  { %v5303_v17 = vadd.f32 %v1240_v18, %v5291_v58  ;;  %v1242_v31 = vadd.f32 %v1241_v26, %v1156_v21  ;;  %v1915_v18 = vpop.permute.xlu2 %1914 }
 0x305   :  { %1990 = vrot.lane.b32.xlu2 %v1958_v12, %s4410_s6  ;;  %v5283_v27 = vadd.f32 %v4952_v24, %v368_v23  ;;  %v354_v12 = vmul.f32 %v4939_v48, %v5062_v0  ;;  %v3861_v0 = vmul.f32 -1.442695, %v1405_v40  ;;  %4063 = vtanh.f32 %v1866_v50  ;;  %v5327_v14 = vpop.eup %4061 }
 0x306   :  { %v1408_v2 = vadd.f32 %v5213_v11, %v5303_v17  ;;  %v1674_v40 = vmul.f32 %v5327_v14, %v5298_v8  ;;  %v1867_v50 = vadd.f32 %v1825_v55, %v5117_v61  ;;  %vm1679_vm9 = vweird.f32 %v5327_v14 }
 0x307   :  { %v5296_v22 = vadd.f32 %v1237_v3, %v5283_v27  ;;  %v370_v15 = vadd.f32 %v354_v12, %v335_v35  ;;  %4065 = vpow2.f32 %v3861_v0  ;;  %v338_v35 = vmul.f32 %v4934_v5, %v5121_v13  ;;  %vm1680_vm11 = vmor %vm1678_vm10, %vm1679_vm9 }
 0x308   :  { %v3864_v10 = vmul.f32 -1.442695, %v1408_v2  ;;  %v357_v12 = vmul.f32 %v4939_v48, %v5230_v52  ;;  %v1675_v26 = vsub.f32 1.0, %v1674_v40 }
 0x309   :  { %v1407_v30 = vadd.f32 %v5139_v36, %v5296_v22  ;;  %v5316_v20 = vadd.f32 %v4952_v24, %v370_v15  ;;  %v336_v36 = vmul.f32 %v4934_v5, %v5057_v29 }
 0x30a   :  { %v373_v21 = vadd.f32 %v357_v12, %v338_v35 }
 0x30b   :  { %v3863_v41 = vmul.f32 -1.442695, %v1407_v30  ;;  %v5325_v23 = vadd.f32 %v1242_v31, %v5316_v20  ;;  %v371_v11 = vadd.f32 %v355_v38, %v336_v36  ;;  %v1960_v30 = vsub.f32 %v412_v42, %v1915_v18  ;;  %v5355_v31 = vpop.permute.xlu1 %1756 }
 0x30c   :  { %v5360_v38 = vadd.f32 %v4952_v24, %v373_v21  ;;  %v1676_v36 = vmul.f32 %v5327_v14, %v1675_v26 }
 0x30d   :  { %1826 = vrot.lane.b32.xlu2 %v1788_v59, %s4403_s17  ;;  %v5329_v59 = vpop.eup %4063  ;;  %4067 = vpow2.f32 %v3863_v41  ;;  %v1409_v29 = vadd.f32 %v5151_v32, %v5325_v23  ;;  %v5344_v15 = vadd.f32 %v4952_v24, %v371_v11  ;;  %v1684_v11 = vand.u32 2147483648, %v5298_v8 }
 0x30e   :  { %v4066_v3 = vpop.eup %4065  ;;  %4069 = vpow2.f32 %v3864_v10  ;;  %v5370_v55 = vadd.f32 %v5055_v53, %v5360_v38  ;;  %v1682_v53 = vand.u32 2147483647, %v5298_v8 }
 0x30f   :  { %v5341_v7 = vadd.f32 1.0, %v4066_v3  ;;  %v3865_v32 = vmul.f32 -1.442695, %v1409_v29  ;;  %v5350_v52 = vadd.f32 %v5027_v9, %v5344_v15  ;;  %v1677_v3 = vadd.f32 %v5327_v14, %v1676_v36 }
 0x310   :  { %v1412_v12 = vadd.f32 %v5165_v54, %v5370_v55  ;;  %vm1683_vm12 = vcmp.eq.f32.partialorder %v1682_v53, 8.507059e+37 }
 0x311   :  { %4071 = vrcp.f32 %v5341_v7  ;;  %v1410_v61 = vadd.f32 %v5224_v46, %v5350_v52  ;;  %v1681_v40 = vsel %vm1680_vm11, %v5327_v14, %v1677_v3  ;;  %vm1588_vm14 = vweird.f32 %v5341_v7 }
 0x312   :  { %4073 = vtanh.f32 %v1867_v50 }
 0x313   :  { %v4068_v0 = vpop.eup %4067  ;;  %4075 = vpow2.f32 %v3865_v32  ;;  %v3866_v10 = vmul.f32 -1.442695, %v1410_v61  ;;  %v1761_v8 = vpop.permute.xlu1 %1760  ;;  %v1685_v32 = vor.u32 1.1754944e-38, %v1684_v11 }
 0x314   :  { %v4070_v13 = vpop.eup %4069  ;;  %v5353_v2 = vadd.f32 1.0, %v4068_v0  ;;  %v339_v0 = vmul.f32 %v4934_v5, %v5169_v37 }
 0x315   :  { %1764 = vrot.lane.b32.xlu2 %v5306_v33, %s4403_s17  ;;  %v5363_v41 = vadd.f32 1.0, %v4070_v13  ;;  %v5396_v26 = vsel %vm1683_vm12, %v1685_v32, %v1681_v40  ;;  %v3868_v13 = vmul.f32 -1.442695, %v1412_v12 }
 0x316   :  { %4077 = vrcp.f32 %v5353_v2  ;;  %v1795_v54 = vmul.f32 %v1761_v8, %v5396_v26  ;;  %vm1618_vm6 = vweird.f32 %v5353_v2 }
 0x317   :  { %v5365_v9 = vpop.eup %4071  ;;  %4079 = vrcp.f32 %v5363_v41  ;;  %vm1633_vm8 = vweird.f32 %v5363_v41 }
 0x318   :  { %v5374_v46 = vpop.eup %4073  ;;  %v1584_v29 = vmul.f32 %v5365_v9, %v5341_v7  ;;  %4081 = vpow2.f32 %v3866_v10  ;;  %v1252_v10 = vadd.f32 %v5141_v6, %v5005_v51  ;;  %vm1589_vm13 = vweird.f32 %v5365_v9 }
 0x319   :  { %v4076_v47 = vpop.eup %4075  ;;  %vm1590_vm15 = vmor %vm1588_vm14, %vm1589_vm13 }
 0x31a   :  { %v5390_v50 = vadd.f32 1.0, %v4076_v47  ;;  %v1585_v21 = vsub.f32 1.0, %v1584_v29 }
 0x31c   :  { %v5388_v18 = vpop.eup %4077  ;;  %4083 = vrcp.f32 %v5390_v50  ;;  %v1586_v5 = vmul.f32 %v5365_v9, %v1585_v21  ;;  %vm1648_vm13 = vweird.f32 %v5390_v50 }
 0x31d   :  { %1918 = vrot.lane.b32.xlu2 %v5329_v59, %s4403_s17  ;;  %v1614_v14 = vmul.f32 %v5388_v18, %v5353_v2  ;;  %4085 = vpow2.f32 %v3868_v13  ;;  %vm1619_vm4 = vweird.f32 %v5388_v18 }
 0x31e   :  { %v1587_v47 = vadd.f32 %v5365_v9, %v1586_v5  ;;  %v1624_v5 = vand.u32 2147483648, %v5353_v2  ;;  %vm5444_vm7 = vmor %vm1618_vm6, %vm1619_vm4 }
 0x31f   :  { %v1615_v11 = vsub.f32 1.0, %v1614_v14 }
 0x320   :  { %v1591_v12 = vsel %vm1590_vm15, %v5365_v9, %v1587_v47  ;;  %v1637_v47 = vand.u32 2147483647, %v5363_v41 }
 0x321   :  { %v1616_v51 = vmul.f32 %v5388_v18, %v1615_v11  ;;  %v1622_v11 = vand.u32 2147483647, %v5353_v2 }
 0x322   :  { %vm1638_vm11 = vcmp.eq.f32.partialorder %v1637_v47, 8.507059e+37 }
 0x323   :  { %v1617_v13 = vadd.f32 %v5388_v18, %v1616_v51  ;;  %vm1623_vm10 = vcmp.eq.f32.partialorder %v1622_v11, 8.507059e+37 }
 0x325   :  { %1994 = vrot.lane.b32.xlu2 %v1960_v30, %s4410_s6  ;;  %v5394_v30 = vpop.eup %4079 }
 0x326   :  { %v4082_v61 = vpop.eup %4081  ;;  %v1629_v37 = vmul.f32 %v5394_v30, %v5363_v41  ;;  %vm1634_vm5 = vweird.f32 %v5394_v30 }
 0x327   :  { %v5411_v3 = vadd.f32 1.0, %v4082_v61  ;;  %v5415_v53 = vpop.eup %4083  ;;  %vm1635_vm9 = vmor %vm1633_vm8, %vm1634_vm5 }
 0x328   :  { %v4086_v6 = vpop.eup %4085  ;;  %vm1649_vm12 = vweird.f32 %v5415_v53 }
 0x329   :  { %4087 = vrcp.f32 %v5411_v3  ;;  %v5431_v21 = vadd.f32 1.0, %v4086_v6  ;;  %v1625_v6 = vor.u32 1.1754944e-38, %v1624_v5  ;;  %vm1650_vm14 = vmor %vm1648_vm13, %vm1649_vm12  ;;  %vm1663_vm4 = vweird.f32 %v5411_v3 }
 0x32b   :  { %4089 = vrcp.f32 %v5431_v21  ;;  %vm1693_vm8 = vweird.f32 %v5431_v21 }
 0x32d   :  { %v320_v42 = vpop.xlane.xlu0 %319  ;;  %1920 = vrot.lane.b32.xlu2 %v5374_v46, %s4403_s17 }
 0x32e   :  { %v358_v35 = vmul.f32 %v4939_v48, %v320_v42  ;;  %v1630_v42 = vsub.f32 1.0, %v1629_v37  ;;  %v1639_v37 = vand.u32 2147483648, %v5363_v41 }
 0x32f   :  { %v4088_v61 = vpop.eup %4087 }
 0x330   :  { %v374_v48 = vadd.f32 %v358_v35, %v339_v0  ;;  %v1592_v35 = vand.u32 2147483647, %v5341_v7  ;;  %v1631_v40 = vmul.f32 %v5394_v30, %v1630_v42  ;;  %v1644_v0 = vmul.f32 %v5415_v53, %v5390_v50 }
 0x331   :  { %v1621_v42 = vsel %vm5444_vm7, %v5388_v18, %v1617_v13  ;;  %v1659_v51 = vmul.f32 %v4088_v61, %v5411_v3  ;;  %v1640_v2 = vor.u32 1.1754944e-38, %v1639_v37  ;;  %v1652_v13 = vand.u32 2147483647, %v5390_v50 }
 0x332   :  { %v5407_v36 = vadd.f32 %v4952_v24, %v374_v48  ;;  %v1594_v24 = vand.u32 2147483648, %v5341_v7  ;;  %vm1593_vm3 = vcmp.eq.f32.partialorder %v1592_v35, 8.507059e+37  ;;  %v1645_v14 = vsub.f32 1.0, %v1644_v0 }
 0x333   :  { %v5458_v41 = vsel %vm1623_vm10, %v1625_v6, %v1621_v42  ;;  %vm1653_vm15 = vcmp.eq.f32.partialorder %v1652_v13, 8.507059e+37 }
 0x334   :  { %v5418_v29 = vadd.f32 %v1252_v10, %v5407_v36  ;;  %v1595_v32 = vor.u32 1.1754944e-38, %v1594_v24  ;;  %v1646_v35 = vmul.f32 %v5415_v53, %v1645_v14  ;;  %v1791_v18 = vmul.f32 %v5308_v49, %v5458_v41 }
 0x335   :  { %1840 = vrot.lane.b32.xlu2 %v1795_v54, %s4403_s17  ;;  %v1632_v54 = vadd.f32 %v5394_v30, %v1631_v40 }
 0x336   :  { %v1413_v8 = vadd.f32 %v5306_v33, %v5418_v29  ;;  %v5433_v48 = vsel %vm1593_vm3, %v1595_v32, %v1591_v12  ;;  %v1647_v0 = vadd.f32 %v5415_v53, %v1646_v35  ;;  %v4090_v32 = vpop.eup %4089  ;;  %vm1664_vm3 = vweird.f32 %v4088_v61 }
 0x337   :  { %v1636_v24 = vsel %vm1635_vm9, %v5394_v30, %v1632_v54  ;;  %v1689_v14 = vmul.f32 %v4090_v32, %v5431_v21  ;;  %vm1665_vm5 = vmor %vm1663_vm4, %vm1664_vm3  ;;  %vm1694_vm7 = vweird.f32 %v4090_v32 }
 0x338   :  { %v3869_v33 = vmul.f32 -1.442695, %v1413_v8  ;;  %v5460_v40 = vsel %vm1638_vm11, %v1640_v2, %v1636_v24  ;;  %v1660_v8 = vsub.f32 1.0, %v1659_v51  ;;  %v1651_v49 = vsel %vm1650_vm14, %v5415_v53, %v1647_v0  ;;  %vm1695_vm9 = vmor %vm1693_vm8, %vm1694_vm7 }
 0x339   :  { %v1690_v47 = vsub.f32 1.0, %v1689_v14  ;;  %v1667_v53 = vand.u32 2147483647, %v5411_v3 }
 0x33a   :  { %4091 = vpow2.f32 %v3869_v33  ;;  %v1661_v54 = vmul.f32 %v4088_v61, %v1660_v8  ;;  %v1763_v8 = vpop.permute.xlu1 %1762 }
 0x33b   :  { %v1691_v35 = vmul.f32 %v4090_v32, %v1690_v47  ;;  %vm1668_vm6 = vcmp.eq.f32.partialorder %v1667_v53, 8.507059e+37 }
 0x33c   :  { %v1662_v11 = vadd.f32 %v4088_v61, %v1661_v54 }
 0x33e   :  { %v1666_v24 = vsel %vm1665_vm5, %v4088_v61, %v1662_v11 }
 0x340   :  { %v1749_v7 = vpop.permute.xlu0 %1748 }
 0x341   :  { %v1789_v9 = vmul.f32 %v1749_v7, %v5433_v48  ;;  %v1654_v7 = vand.u32 2147483648, %v5390_v50  ;;  %v1669_v50 = vand.u32 2147483648, %v5411_v3  ;;  %v1697_v3 = vand.u32 2147483647, %v5431_v21 }
 0x343   :  { %1828 = vrot.lane.b32.xlu1 %v1789_v9, %s4403_s17  ;;  %v4092_v9 = vpop.eup %4091  ;;  %v1655_v33 = vor.u32 1.1754944e-38, %v1654_v7  ;;  %v1670_v51 = vor.u32 1.1754944e-38, %v1669_v50  ;;  %vm1698_vm10 = vcmp.eq.f32.partialorder %v1697_v3, 8.507059e+37 }
 0x344   :  { %v1477_v5 = vadd.f32 1.0, %v4092_v9 }
 0x345   :  { %v5474_v37 = vsel %vm1653_vm15, %v1655_v33, %v1651_v49  ;;  %v5482_v6 = vsel %vm1668_vm6, %v1670_v51, %v1666_v24 }
 0x346   :  { %v1793_v10 = vmul.f32 %v5355_v31, %v5474_v37  ;;  %4093 = vrcp.f32 %v1477_v5  ;;  %v1714_v53 = vand.u32 2147483648, %v1477_v5  ;;  %vm1708_vm12 = vweird.f32 %v1477_v5 }
 0x347   :  { %v1712_v24 = vand.u32 2147483647, %v1477_v5 }
 0x348   :  { %v1755_v12 = vpop.permute.xlu0 %1754  ;;  %v1715_v51 = vor.u32 1.1754944e-38, %v1714_v53 }
 0x349   :  { %v1792_v30 = vmul.f32 %v1755_v12, %v5460_v40  ;;  %v1692_v12 = vadd.f32 %v4090_v32, %v1691_v35  ;;  %vm1713_vm14 = vcmp.eq.f32.partialorder %v1712_v24, 8.507059e+37 }
 0x34b   :  { %1832 = vrot.lane.b32.xlu1 %v1791_v18, %s4403_s17  ;;  %1834 = vrot.lane.b32.xlu0 %v1792_v30, %s4403_s17  ;;  %v1699_v18 = vand.u32 2147483648, %v5431_v21  ;;  %v1696_v0 = vsel %vm1695_vm9, %v4090_v32, %v1692_v12  ;;  %v4214_v21 = vld [vmem:[#allocation5 + $0xc] sm:$0xf] }
 0x34c   :  { %v4094_v31 = vpop.eup %4093  ;;  %v413_v33 = vunpack.c.l.bf16 %v4214_v21 }
 0x34d   :  { %v1704_v61 = vmul.f32 %v4094_v31, %v1477_v5  ;;  %v1700_v7 = vor.u32 1.1754944e-38, %v1699_v18  ;;  %vm1709_vm11 = vweird.f32 %v4094_v31 }
 0x34e   :  { %vm1710_vm13 = vmor %vm1708_vm12, %vm1709_vm11 }
 0x34f   :  { %v5490_v49 = vsel %vm1698_vm10, %v1700_v7, %v1696_v0  ;;  %v1705_v54 = vsub.f32 1.0, %v1704_v61 }
 0x350   :  { %v1759_v42 = vpop.permute.xlu0 %1758  ;;  %v1796_v14 = vmul.f32 %v1763_v8, %v5490_v49 }
 0x351   :  { %v1794_v2 = vmul.f32 %v1759_v42, %v5482_v6 }
 0x353   :  { %1836 = vrot.lane.b32.xlu1 %v1793_v10, %s4403_s17  ;;  %v1706_v10 = vmul.f32 %v4094_v31, %v1705_v54 }
 0x355   :  { %v1707_v50 = vadd.f32 %v4094_v31, %v1706_v10 }
 0x357   :  { %v1711_v35 = vsel %vm1710_vm13, %v4094_v31, %v1707_v50 }
 0x358   :  { %v1917_v30 = vpop.permute.xlu0 %1916  ;;  %v5499_v12 = vsel %vm1713_vm14, %v1715_v51, %v1711_v35 }
 0x359   :  { %v1961_v47 = vsub.f32 %v413_v33, %v1917_v30 }
 0x35b   :  { %1838 = vrot.lane.b32.xlu1 %v1794_v2, %s4403_s17 }
 0x35f   :  { %v1991_v13 = vpop.permute.xlu2 %1990 }
 0x360   :  { %v2038_v9 = vmul.f32 %v1991_v13, %v5091_v34  ;;  %v1993_v11 = vpop.permute.xlu0 %1992  ;;  %v4216_v13 = vld [vmem:[#allocation5 + $0x14] sm:$0xf] }
 0x361   :  { %v2039_v34 = vmul.f32 %v1993_v11, %v5064_v45  ;;  %v4215_v45 = vld [vmem:[#allocation5 + $0x10] sm:$0xf] }
 0x362   :  { %2070 = vrot.lane.b32.xlu0 %v2038_v9, %s4410_s6  ;;  %v414_v5 = vunpack.c.l.bf16 %v4215_v45  ;;  %v415_v9 = vunpack.c.l.bf16 %v4216_v13 }
 0x363   :  { %1842 = vrot.lane.b32.xlu1 %v1796_v14, %s4403_s17 }
 0x367   :  { %v1827_v32 = vpop.permute.xlu2 %1826 }
 0x368   :  { %v1868_v42 = vadd.f32 %v1827_v32, %v5216_v44  ;;  %v1831_v3 = vpop.permute.xlu0 %1830 }
 0x369   :  { %v1870_v30 = vadd.f32 %v1831_v3, %v5195_v43 }
 0x36a   :  { %4095 = vtanh.f32 %v1868_v42  ;;  %1996 = vrot.lane.b32.xlu0 %v1961_v47, %s4410_s6 }
 0x36b   :  { %2072 = vrot.lane.b32.xlu1 %v2039_v34, %s4410_s6  ;;  %4097 = vtanh.f32 %v1870_v30 }
 0x36f   :  { %v1765_v2 = vpop.permute.xlu2 %1764 }
 0x370   :  { %v5501_v44 = vpop.eup %4095  ;;  %v1797_v18 = vmul.f32 %v1765_v2, %v5499_v12 }
 0x371   :  { %v5510_v7 = vpop.eup %4097 }
 0x372   :  { %1922 = vrot.lane.b32.xlu0 %v5501_v44, %s4403_s17  ;;  %1844 = vrot.lane.b32.xlu2 %v1797_v18, %s4403_s17 }
 0x377   :  { %v1919_v31 = vpop.permute.xlu2 %1918 }
 0x378   :  { %v1962_v61 = vsub.f32 %v414_v5, %v1919_v31 }
 0x37a   :  { %1998 = vrot.lane.b32.xlu2 %v1962_v61, %s4410_s6 }
 0x37f   :  { %v1995_v0 = vpop.permute.xlu2 %1994 }
 0x380   :  { %v2040_v8 = vmul.f32 %v1995_v0, %v5101_v60  ;;  %v4217_v0 = vld [vmem:[#allocation5 + $0x18] sm:$0xf] }
 0x382   :  { %1926 = vrot.lane.b32.xlu2 %v5510_v7, %s4403_s17  ;;  %2074 = vrot.lane.b32.xlu1 %v2040_v8, %s4410_s6  ;;  %v416_v8 = vunpack.c.l.bf16 %v4217_v0 }
 0x387   :  { %v1921_v54 = vpop.permute.xlu2 %1920 }
 0x388   :  { %v1963_v14 = vsub.f32 %v415_v9, %v1921_v54 }
 0x38a   :  { %2000 = vrot.lane.b32.xlu1 %v1963_v14, %s4410_s6 }
 0x38f   :  { %v1841_v53 = vpop.permute.xlu2 %1840 }
 0x390   :  { %v1875_v5 = vadd.f32 %v1841_v53, %v5253_v57 }
 0x3b5   :  { %v1829_v43 = vpop.permute.xlu1 %1828 }
 0x3b6   :  { %v1869_v21 = vadd.f32 %v1829_v43, %v5278_v62 }
 0x3b8   :  { %4099 = vtanh.f32 %v1869_v21 }
 0x3bd   :  { %v1833_v33 = vpop.permute.xlu1 %1832  ;;  %v1835_v10 = vpop.permute.xlu0 %1834 }
 0x3be   :  { %v5517_v60 = vpop.eup %4099  ;;  %v1871_v11 = vadd.f32 %v1833_v33, %v5296_v22  ;;  %v1872_v32 = vadd.f32 %v1835_v10, %v5303_v17 }
 0x3bf   :  { %1924 = vrot.lane.b32.xlu0 %v5517_v60, %s4403_s17 }
 0x3c0   :  { %4101 = vtanh.f32 %v1871_v11 }
 0x3c1   :  { %4103 = vtanh.f32 %v1872_v32 }
 0x3c5   :  { %v1837_v47 = vpop.permute.xlu1 %1836 }
 0x3c6   :  { %v5523_v42 = vpop.eup %4101  ;;  %v1873_v50 = vadd.f32 %v1837_v47, %v5325_v23 }
 0x3c7   :  { %v5526_v62 = vpop.eup %4103  ;;  %1928 = vrot.lane.b32.xlu0 %v5523_v42, %s4403_s17 }
 0x3c8   :  { %4105 = vtanh.f32 %v1873_v50  ;;  %1930 = vrot.lane.b32.xlu2 %v5526_v62, %s4403_s17 }
 0x3cd   :  { %v1839_v22 = vpop.permute.xlu1 %1838 }
 0x3ce   :  { %v5532_v17 = vpop.eup %4105  ;;  %v1874_v34 = vadd.f32 %v1839_v22, %v5350_v52  ;;  %v1845_v52 = vpop.permute.xlu2 %1844 }
 0x3cf   :  { %1932 = vrot.lane.b32.xlu0 %v5532_v17, %s4403_s17 }
 0x3d0   :  { %4107 = vtanh.f32 %v1874_v34  ;;  %v6540_v34 = vld [vmem:[#allocation38_spill] sm:$0xff] }
 0x3d4   :  { %v2071_v23 = vpop.permute.xlu0 %2070 }
 0x3d5   :  { %v5538_v24 = vadd.f32 %v5172_v16, %v2071_v23  ;;  %v1843_v35 = vpop.permute.xlu1 %1842  ;;  %v4219_v23 = vld [vmem:[#allocation5 + $0x1c] sm:$0xf] }
 0x3d6   :  { %v5540_v51 = vpop.eup %4107  ;;  %v1876_v2 = vadd.f32 %v1843_v35, %v5370_v55  ;;  %v1999_v13 = vpop.permute.xlu2 %1998  ;;  %v417_v35 = vunpack.c.l.bf16 %v4219_v23 }
 0x3d7   :  { %v2134_v18 = vpack.c.bf16 %v5538_v24, %v5538_v24  ;;  %1934 = vrot.lane.b32.xlu0 %v5540_v51, %s4403_s17  ;;  %v2042_v43 = vmul.f32 %v1999_v13, %v5126_v1  ;;  %v4218_v1 = vld [vmem:[#allocation5 + $0x20] sm:$0xf]  ;;  %v6541_v13 = vld [vmem:[#allocation41_spill] sm:$0xff] }
 0x3d8   :  { %4109 = vtanh.f32 %v1876_v2  ;;  %v418_v10 = vunpack.c.l.bf16 %v4218_v1 }
 0x3d9   :  { %v5547_v45 = vunpack.c.l.b16 %v2134_v18  ;;  %4111 = vtanh.f32 %v1875_v5 }
 0x3db   :  { %v2152_v16 = vpack.c.b16 %v5547_v45, %v5547_v45 }
 0x3dc   :  { %v1997_v3 = vpop.permute.xlu0 %1996 }
 0x3dd   :  { %v2041_v30 = vmul.f32 %v1997_v3, %v5103_v28  ;;  %v2073_v31 = vpop.permute.xlu1 %2072  ;;  %2153 = vrot.lane.b32.xlu1 %v2152_v16, %s4403_s17  ;;  %v1877_v28 = vadd.f32 %v1845_v52, %v5418_v29  ;;  %v4220_v3 = vld [vmem:[#allocation5 + $0x24] sm:$0xf] }
 0x3de   :  { %v5554_v55 = vpop.eup %4109  ;;  %v5557_v61 = vadd.f32 %v5155_v4, %v2073_v31  ;;  %v1927_v11 = vpop.permute.xlu2 %1926 }
 0x3df   :  { %1938 = vrot.lane.b32.xlu0 %v5554_v55, %s4403_s17  ;;  %2076 = vrot.lane.b32.xlu2 %v2041_v30, %s4410_s6  ;;  %v5567_v54 = vpop.eup %4111  ;;  %4113 = vtanh.f32 %v1877_v28  ;;  %v1966_v47 = vsub.f32 %v418_v10, %v1927_v11  ;;  %v419_v30 = vunpack.c.l.bf16 %v4220_v3 }
 0x3e0   :  { %v2135_v57 = vpack.c.bf16 %v5557_v61, %v5557_v61 }
 0x3e2   :  { %v5565_v9 = vunpack.c.l.b16 %v2135_v57 }
 0x3e4   :  { %v1923_v14 = vpop.permute.xlu0 %1922  ;;  %v2872_v4 = vpack.c.b16 %v5565_v9, %v5547_v45  ;;  %v2173_v33 = vpack.c.b16 %v5565_v9, %v5565_v9  ;;  %v4234_v45 = vld [vmem:[#allocation2 + $0x20] sm:$0xf] }
 0x3e5   :  { %v1964_v21 = vsub.f32 %v416_v8, %v1923_v14  ;;  %1936 = vrot.lane.b32.xlu1 %v5567_v54, %s4403_s17  ;;  %v5576_v29 = vpop.eup %4113  ;;  %v4221_v8 = vld [vmem:[#allocation5 + $0x28] sm:$0xf] }
 0x3e6   :  { %v420_v28 = vunpack.c.l.bf16 %v4221_v8 }
 0x3e7   :  { %2002 = vrot.lane.b32.xlu2 %v1964_v21, %s4410_s6  ;;  %2078 = vrot.lane.b32.xlu0 %v2042_v43, %s4410_s6  ;;  %v4222_v43 = vld [vmem:[#allocation5 + $0x2c] sm:$0xf] }
 0x3e8   :  { %v421_v21 = vunpack.c.l.bf16 %v4222_v43 }
 0x3ed   :  { %1940 = vrot.lane.b32.xlu1 %v5576_v29, %s4403_s17 }
 0x3ef   :  { %2174 = vrot.lane.b32.xlu2 %v2173_v33, %s4403_s17 }
 0x3f4   :  { %v2075_v32 = vpop.permute.xlu1 %2074 }
 0x3f5   :  { %v5587_v53 = vadd.f32 %v6540_v34, %v2075_v32 }
 0x3f7   :  { %2006 = vrot.lane.b32.xlu2 %v1966_v47, %s4410_s6  ;;  %v2136_v52 = vpack.c.bf16 %v5587_v53, %v5587_v53 }
 0x3f9   :  { %v5592_v16 = vunpack.c.l.b16 %v2136_v52 }
 0x3fb   :  { %v2194_v0 = vpack.c.b16 %v5592_v16, %v5592_v16 }
 0x3fc   :  { %v2001_v50 = vpop.permute.xlu1 %2000 }
 0x3fd   :  { %v2043_v22 = vmul.f32 %v2001_v50, %v5145_v39  ;;  %v4223_v50 = vld [vmem:[#allocation5 + $0x30] sm:$0xf] }
 0x3ff   :  { %2080 = vrot.lane.b32.xlu2 %v2043_v22, %s4410_s6  ;;  %v422_v22 = vunpack.c.l.bf16 %v4223_v50 }
 0x422   :  { %v1931_v2 = vpop.permute.xlu2 %1930 }
 0x423   :  { %v1968_v10 = vsub.f32 %v420_v28, %v1931_v2 }
 0x431   :  { %v1925_v18 = vpop.permute.xlu0 %1924 }
 0x432   :  { %v1965_v5 = vsub.f32 %v417_v35, %v1925_v18 }
 0x434   :  { %2004 = vrot.lane.b32.xlu1 %v1965_v5, %s4410_s6 }
 0x439   :  { %v1929_v39 = vpop.permute.xlu0 %1928  ;;  %v2077_v31 = vpop.permute.xlu2 %2076 }
 0x43a   :  { %v1967_v57 = vsub.f32 %v419_v30, %v1929_v39  ;;  %v5599_v14 = vadd.f32 %v6541_v13, %v2077_v31  ;;  %v4224_v31 = vld [vmem:[#allocation5 + $0x34] sm:$0xf] }
 0x43c   :  { %2195 = vrot.lane.b32.xlu1 %v2194_v0, %s4403_s17  ;;  %2008 = vrot.lane.b32.xlu0 %v1967_v57, %s4410_s6  ;;  %v2137_v11 = vpack.c.bf16 %v5599_v14, %v5599_v14  ;;  %v423_v57 = vunpack.c.l.bf16 %v4224_v31  ;;  %v4225_v0 = vld [vmem:[#allocation2] sm:$0xf] }
 0x43e   :  { %v5605_v47 = vunpack.c.l.b16 %v2137_v11 }
 0x440   :  { %v2215_v18 = vpack.c.b16 %v5605_v47, %v5605_v47 }
 0x441   :  { %v1933_v33 = vpop.permute.xlu0 %1932  ;;  %v2003_v1 = vpop.permute.xlu2 %2002 }
 0x442   :  { %v1969_v32 = vsub.f32 %v421_v21, %v1933_v33  ;;  %v2044_v39 = vmul.f32 %v2003_v1, %v5275_v19  ;;  %v4226_v19 = vld [vmem:[#allocation5 + $0x38] sm:$0xf] }
 0x443   :  { %v424_v1 = vunpack.c.l.bf16 %v4226_v19 }
 0x444   :  { %2012 = vrot.lane.b32.xlu1 %v1969_v32, %s4410_s6  ;;  %2010 = vrot.lane.b32.xlu0 %v1968_v10, %s4410_s6  ;;  %v4227_v32 = vld [vmem:[#allocation5 + $0x3c] sm:$0xf] }
 0x445   :  { %v425_v50 = vunpack.c.l.bf16 %v4227_v32 }
 0x449   :  { %v1935_v34 = vpop.permute.xlu0 %1934  ;;  %v2175_v23 = vpop.permute.xlu2 %2174 }
 0x44a   :  { %v1970_v35 = vsub.f32 %v422_v22, %v1935_v34  ;;  %v5615_v5 = vsel %vm429_vm0, %v2175_v23, 0 }
 0x44c   :  { %2014 = vrot.lane.b32.xlu2 %v1970_v35, %s4410_s6  ;;  %2216 = vrot.lane.b32.xlu1 %v2215_v18, %s4403_s17 }
 0x44f   :  { %v2154_v2 = vpop.permute.xlu1 %2153 }
 0x450   :  { %v5612_v52 = vsel %vm429_vm0, %v2154_v2, 0  ;;  %v4228_v2 = vld [vmem:[#allocation2 + $0x4] sm:$0xf] }
 0x451   :  { %v1939_v3 = vpop.permute.xlu0 %1938  ;;  %2165 = vmatpush.bf16.msrb.mxu3 %v5612_v52  ;;  %v2007_v30 = vpop.permute.xlu2 %2006 }
 0x452   :  { %v1972_v23 = vsub.f32 %v424_v1, %v1939_v3 }
 0x454   :  { %2082 = vrot.lane.b32.xlu2 %v2044_v39, %s4410_s6  ;;  %3870 = vmatmul.msk.bf16.vlgmr.msrb.gmra.mxu3 %vm160_vm1, %v4225_v0  ;;  %v2046_v39 = vmul.f32 %v2007_v30, %v5243_v63 }
 0x455   :  { %2186 = vmatpush.bf16.msra.mxu3 %v5615_v5 }
 0x457   :  { %v1937_v8 = vpop.permute.xlu1 %1936 }
 0x458   :  { %v1971_v28 = vsub.f32 %v423_v57, %v1937_v8 }
 0x459   :  { %v2079_v13 = vpop.permute.xlu0 %2078  ;;  %v2081_v43 = vpop.permute.xlu2 %2080 }
 0x45a   :  { %v5623_v21 = vadd.f32 %v5329_v59, %v2079_v13  ;;  %v5626_v33 = vadd.f32 %v5374_v46, %v2081_v43  ;;  %2016 = vrot.lane.b32.xlu0 %v1971_v28, %s4410_s6 }
 0x45c   :  { %v2138_v10 = vpack.c.bf16 %v5623_v21, %v5623_v21  ;;  %v2139_v11 = vpack.c.bf16 %v5626_v33, %v5626_v33 }
 0x45e   :  { %v5633_v22 = vunpack.c.l.b16 %v2138_v10  ;;  %v5635_v34 = vunpack.c.l.b16 %v2139_v11 }
 0x45f   :  { %v1941_v59 = vpop.permute.xlu1 %1940 }
 0x460   :  { %v1973_v46 = vsub.f32 %v425_v50, %v1941_v59  ;;  %v2236_v35 = vpack.c.b16 %v5633_v22, %v5633_v22  ;;  %v2874_v18 = vpack.c.b16 %v5635_v34, %v5633_v22  ;;  %v2257_v43 = vpack.c.b16 %v5635_v34, %v5635_v34  ;;  %v4235_v34 = vld [vmem:[#allocation2 + $0x1c] sm:$0xf] }
 0x462   :  { %2018 = vrot.lane.b32.xlu0 %v1972_v23, %s4410_s6  ;;  %2020 = vrot.lane.b32.xlu1 %v1973_v46, %s4410_s6 }
 0x463   :  { %2237 = vrot.lane.b32.xlu2 %v2236_v35, %s4403_s17 }
 0x464   :  { %3871 = vmatmul.msk.bf16.vlgmr.msra.gmra.mxu3 %vm160_vm1, %v4228_v2  ;;  %v4231_v2 = vld [vmem:[#allocation2 + $0x10] sm:$0xf] }
 0x46a   :  { %2086 = vrot.lane.b32.xlu1 %v2046_v39, %s4410_s6 }
 0x4a6   :  { %v2005_v3 = vpop.permute.xlu1 %2004  ;;  %v2015_v31 = vpop.permute.xlu2 %2014 }
 0x4a7   :  { %v2045_v57 = vmul.f32 %v2005_v3, %v5433_v48  ;;  %v4229_v48 = vld [vmem:[#allocation2 + $0x8] sm:$0xf]  ;;  %v2050_v32 = vmul.f32 %v2015_v31, %v5482_v6  ;;  %v4230_v6 = vld [vmem:[#allocation2 + $0xc] sm:$0xf] }
 0x4a9   :  { %2084 = vrot.lane.b32.xlu0 %v2045_v57, %s4410_s6 }
 0x4ae   :  { %v2196_v0 = vpop.permute.xlu1 %2195  ;;  %v2009_v8 = vpop.permute.xlu0 %2008 }
 0x4af   :  { %v5650_v28 = vsel %vm429_vm0, %v2196_v0, 0  ;;  %v2047_v13 = vmul.f32 %v2009_v8, %v5458_v41  ;;  %v2083_v19 = vpop.permute.xlu2 %2082 }
 0x4b0   :  { %2207 = vmatpush.bf16.msrb.mxu3 %v5650_v28  ;;  %v5659_v63 = vadd.f32 %v5501_v44, %v2083_v19 }
 0x4b1   :  { %2088 = vrot.lane.b32.xlu2 %v2047_v13, %s4410_s6  ;;  %2258 = vrot.lane.b32.xlu0 %v2257_v43, %s4403_s17 }
 0x4b2   :  { %v2140_v41 = vpack.c.bf16 %v5659_v63, %v5659_v63 }
 0x4b3   :  { %3872 = vmatmul.msk.bf16.vlgmr.msrb.gmra.mxu3 %vm160_vm1, %v4229_v48 }
 0x4b4   :  { %v5670_v44 = vunpack.c.l.b16 %v2140_v41 }
 0x4b6   :  { %v2013_v30 = vpop.permute.xlu1 %2012  ;;  %v2011_v1 = vpop.permute.xlu0 %2010 }
 0x4b7   :  { %v2049_v10 = vmul.f32 %v2013_v30, %v5474_v37  ;;  %v2048_v11 = vmul.f32 %v2011_v1, %v5460_v40  ;;  %v2278_v37 = vpack.c.b16 %v5670_v44, %v5670_v44 }
 0x4b9   :  { %2092 = vrot.lane.b32.xlu2 %v2049_v10, %s4410_s6  ;;  %2090 = vrot.lane.b32.xlu1 %v2048_v11, %s4410_s6 }
 0x4ba   :  { %2094 = vrot.lane.b32.xlu0 %v2050_v32, %s4410_s6 }
 0x4bd   :  { %v2238_v50 = vpop.permute.xlu2 %2237 }
 0x4be   :  { %v2217_v59 = vpop.permute.xlu1 %2216  ;;  %v5678_v40 = vsel %vm429_vm0, %v2238_v50, 0 }
 0x4bf   :  { %v5673_v23 = vsel %vm429_vm0, %v2217_v59, 0 }
 0x4c0   :  { %2228 = vmatpush.bf16.msra.mxu3 %v5673_v23 }
 0x4c1   :  { %2279 = vrot.lane.b32.xlu2 %v2278_v37, %s4403_s17 }
 0x4c3   :  { %3873 = vmatmul.msk.bf16.vlgmr.msra.gmra.mxu3 %vm160_vm1, %v4230_v6 }
 0x4c4   :  { %2249 = vmatpush.bf16.msrb.mxu3 %v5678_v40 }
 0x4cc   :  { %v2017_v46 = vpop.permute.xlu0 %2016 }
 0x4cd   :  { %v2051_v35 = vmul.f32 %v2017_v46, %v5396_v26 }
 0x4cf   :  { %2096 = vrot.lane.b32.xlu1 %v2051_v35, %s4410_s6 }
 0x4d3   :  { %3874 = vmatmul.msk.bf16.vlgmr.msrb.gmra.mxu3 %vm160_vm1, %v4231_v2 }
 0x4d4   :  { %v2019_v39 = vpop.permute.xlu0 %2018  ;;  %v2021_v3 = vpop.permute.xlu1 %2020 }
 0x4d5   :  { %v2052_v31 = vmul.f32 %v2019_v39, %v5490_v49  ;;  %v2053_v57 = vmul.f32 %v2021_v3, %v5499_v12 }
 0x4d7   :  { %2100 = vrot.lane.b32.xlu1 %v2053_v57, %s4410_s6  ;;  %2098 = vrot.lane.b32.xlu0 %v2052_v31, %s4410_s6 }
 0x4dc   :  { %v2087_v0 = vpop.permute.xlu1 %2086 }
 0x4dd   :  { %v5692_v8 = vadd.f32 %v5510_v7, %v2087_v0 }
 0x4df   :  { %v2142_v26 = vpack.c.bf16 %v5692_v8, %v5692_v8 }
 0x4e1   :  { %v5696_v13 = vunpack.c.l.b16 %v2142_v26 }
 0x4e3   :  { %v2320_v43 = vpack.c.b16 %v5696_v13, %v5696_v13 }
 0x4e5   :  { %2321 = vrot.lane.b32.xlu0 %v2320_v43, %s4403_s17 }
 0x50b   :  { %v2089_v49 = vpop.permute.xlu2 %2088 }
 0x50c   :  { %v5702_v12 = vadd.f32 %v5523_v42, %v2089_v49 }
 0x50e   :  { %v2143_v19 = vpack.c.bf16 %v5702_v12, %v5702_v12 }
 0x510   :  { %v5706_v48 = vunpack.c.l.b16 %v2143_v19 }
 0x512   :  { %v2341_v7 = vpack.c.b16 %v5706_v48, %v5706_v48  ;;  %v2876_v30 = vpack.c.b16 %v5706_v48, %v5696_v13 }
 0x513   :  { %v2093_v1 = vpop.permute.xlu2 %2092 }
 0x514   :  { %v5713_v41 = vadd.f32 %v5532_v17, %v2093_v1  ;;  %2342 = vrot.lane.b32.xlu1 %v2341_v7, %s4403_s17 }
 0x516   :  { %6542 = vst [vmem:[#allocation38_spill] sm:$0xff] %v5713_v41  ;;  %v2145_v42 = vpack.c.bf16 %v5713_v41, %v5713_v41 }
 0x518   :  { %v5718_v10 = vunpack.c.l.b16 %v2145_v42 }
 0x51a   :  { %v2383_v11 = vpack.c.b16 %v5718_v10, %v5718_v10 }
 0x51b   :  { %v2085_v32 = vpop.permute.xlu0 %2084  ;;  %v2280_v37 = vpop.permute.xlu2 %2279 }
 0x51c   :  { %v5723_v50 = vadd.f32 %v5517_v60, %v2085_v32  ;;  %2384 = vrot.lane.b32.xlu0 %v2383_v11, %s4403_s17  ;;  %v5733_v2 = vsel %vm429_vm0, %v2280_v37, 0  ;;  %v4232_v60 = vld [vmem:[#allocation2 + $0x14] sm:$0xf] }
 0x51e   :  { %v2141_v17 = vpack.c.bf16 %v5723_v50, %v5723_v50 }
 0x520   :  { %v2298_v59 = vunpack.c.l.b16 %v2141_v17 }
 0x522   :  { %v2299_v6 = vpack.c.b16 %v2298_v59, %v2298_v59 }
 0x523   :  { %v2259_v46 = vpop.permute.xlu0 %2258 }
 0x524   :  { %v5729_v35 = vsel %vm429_vm0, %v2259_v46, 0  ;;  %2300 = vrot.lane.b32.xlu2 %v2299_v6, %s4403_s17 }
 0x525   :  { %2270 = vmatpush.bf16.msra.mxu3 %v5729_v35 }
 0x528   :  { %3875 = vmatmul.msk.bf16.vlgmr.msra.gmra.mxu3 %vm160_vm1, %v4232_v60 }
 0x529   :  { %2291 = vmatpush.bf16.msrb.mxu3 %v5733_v2 }
 0x52b   :  { %v2091_v39 = vpop.permute.xlu1 %2090 }
 0x52c   :  { %v5739_v3 = vadd.f32 %v5526_v62, %v2091_v39  ;;  %v2095_v31 = vpop.permute.xlu0 %2094  ;;  %v4233_v62 = vld [vmem:[#allocation2 + $0x18] sm:$0xf] }
 0x52d   :  { %v5742_v57 = vadd.f32 %v5540_v51, %v2095_v31 }
 0x52e   :  { %v2144_v0 = vpack.c.bf16 %v5739_v3, %v5739_v3 }
 0x52f   :  { %6543 = vst [vmem:[#allocation41_spill] sm:$0xff] %v5742_v57  ;;  %v2146_v26 = vpack.c.bf16 %v5742_v57, %v5742_v57 }
 0x530   :  { %v2361_v43 = vunpack.c.l.b16 %v2144_v0 }
 0x531   :  { %v2403_v49 = vunpack.c.l.b16 %v2146_v26 }
 0x532   :  { %v2362_v19 = vpack.c.b16 %v2361_v43, %v2361_v43 }
 0x533   :  { %v2404_v7 = vpack.c.b16 %v2403_v49, %v2403_v49 }
 0x534   :  { %2363 = vrot.lane.b32.xlu2 %v2362_v19, %s4403_s17  ;;  %v2875_v19 = vpack.c.b16 %v2298_v59, %v5670_v44 }
 0x535   :  { %2405 = vrot.lane.b32.xlu1 %v2404_v7, %s4403_s17  ;;  %v2873_v7 = vpack.c.b16 %v5605_v47, %v5592_v16 }
 0x538   :  { %3876 = vmatmul.msk.bf16.vlgmr.msrb.gmra.mxu3 %vm160_vm1, %v4233_v62  ;;  %v5800_v62 = vpop.f32.mrf.mxu3 }
 0x541   :  { %v2097_v1 = vpop.permute.xlu1 %2096 }
 0x542   :  { %v5752_v51 = vadd.f32 %v5567_v54, %v2097_v1  ;;  %v2169_v1 = vpop.f32.mrf.mxu3 }
 0x544   :  { %6544 = vst [vmem:[#allocation42_spill] sm:$0xff] %v5752_v51  ;;  %v2147_v42 = vpack.c.bf16 %v5752_v51, %v5752_v51 }
 0x546   :  { %v2424_v11 = vunpack.c.l.b16 %v2147_v42 }
 0x548   :  { %v2425_v32 = vpack.c.b16 %v2424_v11, %v2424_v11  ;;  %v2878_v9 = vpack.c.b16 %v2424_v11, %v2403_v49  ;;  %v4238_v49 = vld [vmem:[#allocation2 + $0x2c] sm:$0xf] }
 0x549   :  { %v2101_v17 = vpop.permute.xlu1 %2100  ;;  %v2099_v37 = vpop.permute.xlu0 %2098 }
 0x54a   :  { %v5757_v6 = vadd.f32 %v5576_v29, %v2101_v17  ;;  %v5760_v46 = vadd.f32 %v5554_v55, %v2099_v37  ;;  %2426 = vrot.lane.b32.xlu2 %v2425_v32, %s4403_s17  ;;  %v4239_v37 = vld [vmem:[#allocation2 + $0x34] sm:$0xf] }
 0x54c   :  { %6545 = vst [vmem:[#allocation43_spill] sm:$0xff] %v5757_v6  ;;  %v2149_v60 = vpack.c.bf16 %v5757_v6, %v5757_v6  ;;  %v2148_v54 = vpack.c.bf16 %v5760_v46, %v5760_v46 }
 0x54d   :  { %6546 = vst [vmem:[#allocation44_spill] sm:$0xff] %v5760_v46 }
 0x54e   :  { %v2466_v39 = vunpack.c.l.b16 %v2149_v60  ;;  %v2445_v31 = vunpack.c.l.b16 %v2148_v54  ;;  %v2188_v60 = vpop.f32.mrf.mxu3  ;;  %v4240_v54 = vld [vmem:[#allocation2 + $0x30] sm:$0xf] }
 0x550   :  { %v2467_v0 = vpack.c.b16 %v2466_v39, %v2466_v39  ;;  %v2446_v26 = vpack.c.b16 %v2445_v31, %v2445_v31  ;;  %v2879_v16 = vpack.c.b16 %v2466_v39, %v2445_v31  ;;  %v2694_v39 = vpack.c.bf16 %v2188_v60, %v5800_v62  ;;  %v6558_v62 = vld [vmem:[#allocation30_spill] sm:$0xff] }
 0x551   :  { %v4248_v60 = vld [vmem:[#allocation10] sm:$0xff] }
 0x552   :  { %2880 = vrot.lane.b32.xlu2 %v2872_v4, %s4403_s17  ;;  %2468 = vrot.lane.b32.xlu1 %v2467_v0, %s4403_s17  ;;  %v2877_v4 = vpack.c.b16 %v5718_v10, %v2361_v43  ;;  %v4236_v10 = vld [vmem:[#allocation2 + $0x24] sm:$0xf]  ;;  %v4237_v43 = vld [vmem:[#allocation2 + $0x28] sm:$0xf] }
 0x553   :  { %2447 = vrot.lane.b32.xlu0 %v2446_v26, %s4403_s17  ;;  %v6548_v26 = vld [vmem:[#allocation20_spill] sm:$0xff] }
 0x556   :  { %v2190_v31 = vpop.f32.mrf.mxu3 }
 0x557   :  { %v2322_v55 = vpop.permute.xlu0 %2321 }
 0x558   :  { %v2324_v29 = vsel %vm429_vm0, %v2322_v55, 0 }
 0x559   :  { %2333 = vmatpush.bf16.msrb.mxu0 %v2324_v29 }
 0x55a   :  { %2886 = vrot.lane.b32.xlu2 %v2875_v19, %s4403_s17  ;;  %2884 = vrot.lane.b32.xlu1 %v2874_v18, %s4403_s17 }
 0x55b   :  { %2882 = vrot.lane.b32.xlu0 %v2873_v7, %s4403_s17  ;;  %v4241_v7 = vld [vmem:[#allocation2 + $0x3c] sm:$0xf] }
 0x55c   :  { %3878 = vmatmul.msk.bf16.vlgmr.msrb.gmra.mxu0 %vm160_vm1, %v4234_v45  ;;  %v6549_v45 = vld [vmem:[#allocation17_spill] sm:$0xff] }
 0x55e   :  { %v5813_v0 = vpop.f32.mrf.mxu3 }
 0x562   :  { %2892 = vrot.lane.b32.xlu2 %v2878_v9, %s4403_s17  ;;  %2890 = vrot.lane.b32.xlu1 %v2877_v4, %s4403_s17  ;;  %v6550_v4 = vld [vmem:[#allocation16_spill] sm:$0xff] }
 0x563   :  { %2888 = vrot.lane.b32.xlu0 %v2876_v30, %s4403_s17 }
 0x56b   :  { %2894 = vrot.lane.b32.xlu0 %v2879_v16, %s4403_s17  ;;  %v6552_v16 = vld [vmem:[#allocation29_spill] sm:$0xff] }
 0x57e   :  { %v2301_v47 = vpop.permute.xlu2 %2300 }
 0x57f   :  { %v2303_v22 = vsel %vm429_vm0, %v2301_v47, 0  ;;  %v6553_v47 = vld [vmem:[#allocation19_spill] sm:$0xff] }
 0x580   :  { %2312 = vmatpush.bf16.msra.mxu3 %v2303_v22 }
 0x583   :  { %3877 = vmatmul.msk.bf16.vlgmr.msra.gmra.mxu3 %vm160_vm1, %v4235_v34 }
 0x586   :  { %v2343_v18 = vpop.permute.xlu1 %2342 }
 0x587   :  { %v2345_v44 = vsel %vm429_vm0, %v2343_v18, 0  ;;  %v4243_v18 = vld [vmem:[#allocation7 + $0x8] sm:$0xff] }
 0x588   :  { %2354 = vmatpush.bf16.msrb.mxu1 %v2345_v44 }
 0x58b   :  { %3879 = vmatmul.msk.bf16.vlgmr.msrb.gmra.mxu1 %vm160_vm1, %v4236_v10  ;;  %v4246_v10 = vld [vmem:[#allocation8] sm:$0xff] }
 0x58e   :  { %v2385_v59 = vpop.permute.xlu0 %2384  ;;  %v2364_v13 = vpop.permute.xlu2 %2363 }
 0x58f   :  { %v2387_v48 = vsel %vm429_vm0, %v2385_v59, 0  ;;  %v2366_v30 = vsel %vm429_vm0, %v2364_v13, 0  ;;  %v6555_v13 = vld [vmem:[#allocation25_spill] sm:$0xff] }
 0x590   :  { %2375 = vmatpush.bf16.msrb.mxu2 %v2366_v30  ;;  %2396 = vmatpush.bf16.msrb.mxu3 %v2387_v48 }
 0x593   :  { %3880 = vmatmul.msk.bf16.vlgmr.msrb.gmra.mxu2 %vm160_vm1, %v4237_v43  ;;  %3881 = vmatmul.msk.bf16.vlgmr.msrb.gmra.mxu3 %vm160_vm1, %v4238_v49  ;;  %v6556_v43 = vld [vmem:[#allocation28_spill] sm:$0xff] }
 0x5a4   :  { %v2427_v42 = vpop.permute.xlu2 %2426 }
 0x5a5   :  { %v2429_v11 = vsel %vm429_vm0, %v2427_v42, 0 }
 0x5a6   :  { %2438 = vmatpush.bf16.msra.mxu1 %v2429_v11 }
 0x5a7   :  { %v2406_v32 = vpop.permute.xlu1 %2405 }
 0x5a8   :  { %v2408_v17 = vsel %vm429_vm0, %v2406_v32, 0  ;;  %v6560_v32 = vld [vmem:[#allocation27_spill] sm:$0xff] }
 0x5a9   :  { %2417 = vmatpush.bf16.msra.mxu0 %v2408_v17  ;;  %3883 = vmatmul.msk.bf16.vlgmr.msra.gmra.mxu1 %vm160_vm1, %v4239_v37  ;;  %v4247_v37 = vld [vmem:[#allocation10 + $0x8] sm:$0xff] }
 0x5aa   :  { %2506 = vmatpush.bf16.msrb.mxu1 %v5615_v5  ;;  %v6547_v5 = vld [vmem:[#allocation23_spill] sm:$0xff] }
 0x5ac   :  { %3882 = vmatmul.msk.bf16.vlgmr.msra.gmra.mxu0 %vm160_vm1, %v4240_v54 }
 0x5ad   :  { %2493 = vmatpush.bf16.msrb.mxu0 %v5612_v52  ;;  %v2211_v52 = vpop.f32.mrf.mxu3 }
 0x5ae   :  { %2558 = vmatpush.bf16.msra.mxu1 %v5729_v35  ;;  %v6562_v52 = vld [vmem:[#allocation24_spill] sm:$0xff] }
 0x5b1   :  { %2545 = vmatpush.bf16.msra.mxu0 %v5678_v40 }
 0x5b5   :  { %v2230_v9 = vpop.f32.mrf.mxu3 }
 0x5b6   :  { %v2695_v31 = vpack.c.bf16 %v2230_v9, %v5813_v0 }
 0x5b9   :  { %3887 = vmatmul.msk.bf16.vlgmr.msrb.gmra.mxu1 %vm160_vm1, %v6547_v5 }
 0x5ba   :  { %2610 = vmatpush.bf16.msrb.mxu1 %v2345_v44  ;;  %v4245_v44 = vld [vmem:[#allocation7] sm:$0xff] }
 0x5bc   :  { %3886 = vmatmul.msk.bf16.vlgmr.msrb.gmra.mxu0 %vm160_vm1, %v6548_v26  ;;  %v6561_v26 = vld [vmem:[#allocation31_spill] sm:$0xff] }
 0x5bd   :  { %2597 = vmatpush.bf16.msrb.mxu0 %v2324_v29  ;;  %v4242_v29 = vld [vmem:[#allocation2 + $0x38] sm:$0xf] }
 0x5c4   :  { %v2469_v35 = vpop.permute.xlu1 %2468 }
 0x5c5   :  { %v2471_v55 = vsel %vm429_vm0, %v2469_v35, 0  ;;  %v2448_v19 = vpop.permute.xlu0 %2447 }
 0x5c6   :  { %v2450_v40 = vsel %vm429_vm0, %v2448_v19, 0  ;;  %2480 = vmatpush.bf16.msra.mxu3 %v2471_v55 }
 0x5c7   :  { %2459 = vmatpush.bf16.msra.mxu2 %v2450_v40 }
 0x5c9   :  { %3885 = vmatmul.msk.bf16.vlgmr.msra.gmra.mxu3 %vm160_vm1, %v4241_v7  ;;  %3891 = vmatmul.msk.bf16.vlgmr.msra.gmra.mxu1 %vm160_vm1, %v6549_v45  ;;  %v2881_v7 = vpop.permute.xlu2 %2880 }
 0x5ca   :  { %2532 = vmatpush.bf16.msrb.mxu3 %v5673_v23  ;;  %3884 = vmatmul.msk.bf16.vlgmr.msra.gmra.mxu2 %vm160_vm1, %v4242_v29  ;;  %v2232_v23 = vpop.f32.mrf.mxu3 }
 0x5cb   :  { %2519 = vmatpush.bf16.msrb.mxu2 %v5650_v28  ;;  %2662 = vmatpush.bf16.msra.mxu1 %v2429_v11  ;;  %v6551_v28 = vld [vmem:[#allocation22_spill] sm:$0xff]  ;;  %v6559_v11 = vld [vmem:[#allocation21_spill] sm:$0xff] }
 0x5cc   :  { %3890 = vmatmul.msk.bf16.vlgmr.msra.gmra.mxu0 %vm160_vm1, %v6550_v4 }
 0x5cd   :  { %2649 = vmatpush.bf16.msra.mxu0 %v2408_v17  ;;  %v2883_v23 = vpop.permute.xlu0 %2882 }
 0x5ce   :  { %2584 = vmatpush.bf16.msra.mxu3 %v2303_v22  ;;  %v4244_v22 = vld [vmem:[#allocation8 + $0x8] sm:$0xff] }
 0x5cf   :  { %2571 = vmatpush.bf16.msra.mxu2 %v5733_v2  ;;  %v6554_v2 = vld [vmem:[#allocation18_spill] sm:$0xff] }
 0x5d2   :  { %v2251_v34 = vpop.f32.mrf.mxu3 }
 0x5d9   :  { %3889 = vmatmul.msk.bf16.vlgmr.msrb.gmra.mxu3 %vm160_vm1, %v6551_v28  ;;  %3895 = vmatmul.msk.bf16.vlgmr.msrb.gmra.mxu1 %vm160_vm1, %v6552_v16  ;;  %v2335_v49 = vpop.f32.mrf.mxu0 }
 0x5da   :  { %3888 = vmatmul.msk.bf16.vlgmr.msrb.gmra.mxu2 %vm160_vm1, %v6553_v47  ;;  %2636 = vmatpush.bf16.msrb.mxu3 %v2387_v48  ;;  %v2253_v59 = vpop.f32.mrf.mxu3  ;;  %v6557_v48 = vld [vmem:[#allocation26_spill] sm:$0xff] }
 0x5db   :  { %2623 = vmatpush.bf16.msrb.mxu2 %v2366_v30  ;;  %2813 = vmatpush.bf16.msrb.mxu1 %v4243_v18 }
 0x5dc   :  { %3894 = vmatmul.msk.bf16.vlgmr.msrb.gmra.mxu0 %vm160_vm1, %v6554_v2  ;;  %v2885_v2 = vpop.permute.xlu1 %2884 }
 0x5dd   :  { %2740 = vmatpush.bf16.msrb.mxu0 %v4244_v22 }
 0x5df   :  { %2814 = vmatpush.bf16.msrb.mxu1 %v4245_v44 }
 0x5e1   :  { %2741 = vmatpush.bf16.msrb.mxu0 %v4246_v10  ;;  %v2337_v42 = vpop.f32.mrf.mxu0 }
 0x5e2   :  { %v2272_v30 = vpop.f32.mrf.mxu3 }
 0x5e3   :  { %v2696_v19 = vpack.c.bf16 %v2272_v30, %v2251_v34 }
 0x5e9   :  { %3893 = vmatmul.msk.bf16.vlgmr.msra.gmra.mxu3 %vm160_vm1, %v6555_v13  ;;  %3899 = vmatmul.msk.bf16.vlgmr.msra.gmra.mxu1 %vm160_vm1, %v6556_v43 }
 0x5ea   :  { %3892 = vmatmul.msk.bf16.vlgmr.msra.gmra.mxu2 %vm160_vm1, %v6557_v48  ;;  %2688 = vmatpush.bf16.msra.mxu3 %v2471_v55  ;;  %v2274_v1 = vpop.f32.mrf.mxu3  ;;  %v2887_v48 = vpop.permute.xlu2 %2886 }
 0x5eb   :  { %2675 = vmatpush.bf16.msra.mxu2 %v2450_v40 }
 0x5ec   :  { %3898 = vmatmul.msk.bf16.vlgmr.msra.gmra.mxu0 %vm160_vm1, %v6558_v62 }
 0x5f2   :  { %v2293_v17 = vpop.f32.mrf.mxu3 }
 0x5f9   :  { %3897 = vmatmul.msk.bf16.vlgmr.msrb.gmra.mxu3 %vm160_vm1, %v6559_v11  ;;  %3910 = vmatmul.msk.bf16.vlgmr.msrb.gmra.mxu1 %vm1095_vm2, %v2694_v39 }
 0x5fa   :  { %3896 = vmatmul.msk.bf16.vlgmr.msrb.gmra.mxu2 %vm160_vm1, %v6560_v32  ;;  %v2295_v54 = vpop.f32.mrf.mxu3 }
 0x5fb   :  { %2926 = vmatpush.bf16.msrb.mxu2 %v4247_v37 }
 0x5ff   :  { %2927 = vmatpush.bf16.msrb.mxu2 %v4248_v60  ;;  %v2889_v60 = vpop.permute.xlu0 %2888 }
 0x606   :  { %v2314_v39 = vpop.f32.mrf.mxu3 }
 0x607   :  { %v2697_v9 = vpack.c.bf16 %v2314_v39, %v2293_v17 }
 0x608   :  { %v2356_v5 = vpop.f32.mrf.mxu1 }
 0x609   :  { %3901 = vmatmul.msk.bf16.vlgmr.msra.gmra.mxu3 %vm160_vm1, %v6561_v26  ;;  %3911 = vmatmul.msk.bf16.gmra.mxu1 %vm1095_vm2, %v2695_v31  ;;  %v2698_v34 = vpack.c.bf16 %v2356_v5, %v2335_v49 }
 0x60a   :  { %3900 = vmatmul.msk.bf16.vlgmr.msra.gmra.mxu2 %vm160_vm1, %v6562_v52 }
 0x60e   :  { %v2316_v55 = vpop.f32.mrf.mxu3 }
 0x610   :  { %v2358_v35 = vpop.f32.mrf.mxu1 }
 0x616   :  { %v2377_v40 = vpop.f32.mrf.mxu2  ;;  %v2398_v0 = vpop.f32.mrf.mxu3 }
 0x617   :  { %v2699_v43 = vpack.c.bf16 %v2398_v0, %v2377_v40 }
 0x619   :  { %3912 = vmatmul.msk.bf16.gmra.mxu1 %vm1095_vm2, %v2696_v19 }
 0x61a   :  { %3918 = vmatmul.msk.bf16.vlgmr.msrb.gmra.mxu2 %vm1095_vm2, %v2881_v7  ;;  %v2891_v7 = vpop.permute.xlu1 %2890 }
 0x61e   :  { %v2379_v45 = vpop.f32.mrf.mxu2  ;;  %v2400_v29 = vpop.f32.mrf.mxu3 }
 0x626   :  { %v2440_v4 = vpop.f32.mrf.mxu1 }
 0x629   :  { %v2419_v28 = vpop.f32.mrf.mxu0  ;;  %3913 = vmatmul.msk.bf16.gmra.mxu1 %vm1095_vm2, %v2697_v9 }
 0x62a   :  { %3919 = vmatmul.msk.bf16.gmra.mxu2 %vm1095_vm2, %v2883_v23  ;;  %v2700_v32 = vpack.c.bf16 %v2440_v4, %v2419_v28 }
 0x62e   :  { %v2442_v16 = vpop.f32.mrf.mxu1 }
 0x631   :  { %v2421_v47 = vpop.f32.mrf.mxu0 }
 0x636   :  { %v2508_v18 = vpop.f32.mrf.mxu1 }
 0x639   :  { %v2495_v22 = vpop.f32.mrf.mxu0  ;;  %3914 = vmatmul.msk.bf16.gmra.mxu1 %vm1095_vm2, %v2698_v34  ;;  %v2893_v34 = vpop.permute.xlu2 %2892 }
 0x63a   :  { %v2702_v44 = vpack.c.bf16 %v2508_v18, %v2495_v22  ;;  %3920 = vmatmul.msk.bf16.gmra.mxu2 %vm1095_vm2, %v2885_v2 }
 0x63c   :  { %3902 = vmatmul.msk.bf16.vlgmr.msrb.gmra.mxu0 %vm1095_vm2, %v2702_v44 }
 0x63e   :  { %v2510_v10 = vpop.f32.mrf.mxu1 }
 0x641   :  { %v2497_v59 = vpop.f32.mrf.mxu0 }
 0x642   :  { %v2895_v59 = vpop.permute.xlu0 %2894 }
 0x646   :  { %v2560_v13 = vpop.f32.mrf.mxu1 }
 0x649   :  { %v2547_v30 = vpop.f32.mrf.mxu0  ;;  %3915 = vmatmul.msk.bf16.gmra.mxu1 %vm1095_vm2, %v2699_v43 }
 0x64a   :  { %3921 = vmatmul.msk.bf16.gmra.mxu2 %vm1095_vm2, %v2887_v48  ;;  %v2704_v4 = vpack.c.bf16 %v2560_v13, %v2547_v30 }
 0x64c   :  { %v2482_v49 = vpop.f32.mrf.mxu3 }
 0x64d   :  { %v2461_v62 = vpop.f32.mrf.mxu2 }
 0x64e   :  { %v2562_v1 = vpop.f32.mrf.mxu1  ;;  %v2701_v40 = vpack.c.bf16 %v2482_v49, %v2461_v62 }
 0x651   :  { %v2549_v42 = vpop.f32.mrf.mxu0 }
 0x652   :  { %v5877_v42 = vld [vmem:[%s6475_s8] ss:$0 sm:$0xff]  ;;  %s4411_s8 = smov 96  }
 0x654   :  { %v2484_v11 = vpop.f32.mrf.mxu3 }
 0x655   :  { %v2463_v17 = vpop.f32.mrf.mxu2 }
 0x656   :  { %v2612_v37 = vpop.f32.mrf.mxu1 }
 0x659   :  { %v2599_v54 = vpop.f32.mrf.mxu0  ;;  %3916 = vmatmul.msk.bf16.gmra.mxu1 %vm1095_vm2, %v2700_v32 }
 0x65a   :  { %3922 = vmatmul.msk.bf16.gmra.mxu2 %vm1095_vm2, %v2889_v60  ;;  %v2706_v48 = vpack.c.bf16 %v2612_v37, %v2599_v54 }
 0x65c   :  { %v2534_v31 = vpop.f32.mrf.mxu3 }
 0x65d   :  { %v2521_v5 = vpop.f32.mrf.mxu2 }
 0x65e   :  { %v2703_v26 = vpack.c.bf16 %v2534_v31, %v2521_v5  ;;  %v2614_v52 = vpop.f32.mrf.mxu1 }
 0x660   :  { %3903 = vmatmul.msk.bf16.gmra.mxu0 %vm1095_vm2, %v2703_v26 }
 0x661   :  { %v2601_v39 = vpop.f32.mrf.mxu0 }
 0x664   :  { %v2536_v35 = vpop.f32.mrf.mxu3 }
 0x665   :  { %v2523_v55 = vpop.f32.mrf.mxu2 }
 0x666   :  { %v2664_v19 = vpop.f32.mrf.mxu1 }
 0x669   :  { %v2651_v0 = vpop.f32.mrf.mxu0  ;;  %3917 = vmatmul.msk.bf16.gmra.mxu1 %vm1095_vm2, %v2701_v40 }
 0x66a   :  { %v2708_v45 = vpack.c.bf16 %v2664_v19, %v2651_v0  ;;  %3923 = vmatmul.msk.bf16.gmra.mxu2 %vm1095_vm2, %v2891_v7 }
 0x66c   :  { %v2586_v29 = vpop.f32.mrf.mxu3 }
 0x66d   :  { %v2573_v9 = vpop.f32.mrf.mxu2 }
 0x66e   :  { %v2666_v23 = vpop.f32.mrf.mxu1  ;;  %v2705_v22 = vpack.c.bf16 %v2586_v29, %v2573_v9 }
 0x670   :  { %3904 = vmatmul.msk.bf16.gmra.mxu0 %vm1095_vm2, %v2704_v4 }
 0x671   :  { %v2653_v28 = vpop.f32.mrf.mxu0 }
 0x674   :  { %v2588_v16 = vpop.f32.mrf.mxu3 }
 0x675   :  { %v2575_v47 = vpop.f32.mrf.mxu2 }
 0x676   :  { %v2816_v54 = vpop.f32.mrf.mxu1 }
 0x67a   :  { %3924 = vmatmul.msk.bf16.gmra.mxu2 %vm1095_vm2, %v2893_v34  ;;  %v6563_v34 = vld [vmem:[#allocation33_spill] sm:$0xff] }
 0x67c   :  { %v2638_v18 = vpop.f32.mrf.mxu3 }
 0x67d   :  { %v2625_v2 = vpop.f32.mrf.mxu2 }
 0x67e   :  { %v2707_v1 = vpack.c.bf16 %v2638_v18, %v2625_v2  ;;  %v2818_v26 = vpop.f32.mrf.mxu1 }
 0x680   :  { %3905 = vmatmul.msk.bf16.gmra.mxu0 %vm1095_vm2, %v2705_v22 }
 0x684   :  { %v2640_v44 = vpop.f32.mrf.mxu3 }
 0x685   :  { %v2627_v10 = vpop.f32.mrf.mxu2 }
 0x686   :  { %v2821_v19 = vpop.f32.mrf.mxu1  ;;  %v6564_v10 = vld [vmem:[#allocation32_spill] sm:$0xff] }
 0x68a   :  { %3925 = vmatmul.msk.bf16.gmra.mxu2 %vm1095_vm2, %v2895_v59 }
 0x68c   :  { %v2690_v13 = vpop.f32.mrf.mxu3 }
 0x68d   :  { %v2677_v43 = vpop.f32.mrf.mxu2 }
 0x68e   :  { %v2709_v39 = vpack.c.bf16 %v2690_v13, %v2677_v43  ;;  %v2823_v29 = vpop.f32.mrf.mxu1 }
 0x690   :  { %3906 = vmatmul.msk.bf16.gmra.mxu0 %vm1095_vm2, %v2706_v48 }
 0x694   :  { %v2692_v30 = vpop.f32.mrf.mxu3 }
 0x695   :  { %v2679_v49 = vpop.f32.mrf.mxu2 }
 0x696   :  { %v2826_v16 = vpop.f32.mrf.mxu1 }
 0x69d   :  { %v2929_v62 = vpop.f32.mrf.mxu2 }
 0x69e   :  { %v2930_v11 = vadd.f32 %v5877_v42, %v2929_v62  ;;  %v2828_v48 = vpop.f32.mrf.mxu1 }
 0x6a0   :  { %3907 = vmatmul.msk.bf16.gmra.mxu0 %vm1095_vm2, %v2707_v1  ;;  %3305 = vrot.lane.b32.xlu1 %v2930_v11, %s4403_s17 }
 0x6a5   :  { %v2931_v32 = vpop.f32.mrf.mxu2 }
 0x6a6   :  { %v2932_v17 = vadd.f32 %v5877_v42, %v2931_v32 }
 0x6a8   :  { %3307 = vrot.lane.b32.xlu2 %v2932_v17, %s4403_s17 }
 0x6ad   :  { %v2934_v37 = vpop.f32.mrf.mxu2 }
 0x6ae   :  { %v2935_v60 = vadd.f32 %v5877_v42, %v2934_v37 }
 0x6b0   :  { %3908 = vmatmul.msk.bf16.gmra.mxu0 %vm1095_vm2, %v2708_v45  ;;  %3309 = vrot.lane.b32.xlu0 %v2935_v60, %s4403_s17 }
 0x6b5   :  { %v2936_v31 = vpop.f32.mrf.mxu2 }
 0x6b6   :  { %v5888_v5 = vadd.f32 %v5877_v42, %v2936_v31 }
 0x6b8   :  { %3311 = vrot.lane.b32.xlu1 %v5888_v5, %s4403_s17 }
 0x6b9   :  { %v2743_v7 = vpop.f32.mrf.mxu0 }
 0x6ba   :  { %v2817_v28 = vadd.f32 %v2816_v54, %v2743_v7 }
 0x6bc   :  { %v5911_v18 = vadd.f32 %v2817_v28, %v6563_v34 }
 0x6bd   :  { %v2939_v52 = vpop.f32.mrf.mxu2 }
 0x6be   :  { %v2940_v35 = vadd.f32 %v5877_v42, %v2939_v52  ;;  %v2969_v13 = vadd.f32 %v2930_v11, %v5911_v18  ;;  %v6565_v11 = vld [vmem:[#allocation34_spill] sm:$0xff]  ;;  %v2831_v52 = vpop.f32.mrf.mxu1 }
 0x6c0   :  { %3909 = vmatmul.msk.bf16.gmra.mxu0 %vm1095_vm2, %v2709_v39  ;;  %3313 = vrot.lane.b32.xlu2 %v2940_v35, %s4403_s17  ;;  %v3926_v30 = vmul.f32 -1.442695, %v2969_v13 }
 0x6c1   :  { %v2745_v9 = vpop.f32.mrf.mxu0 }
 0x6c2   :  { %v2819_v47 = vadd.f32 %v2818_v26, %v2745_v9  ;;  %4115 = vpow2.f32 %v3926_v30 }
 0x6c4   :  { %v5917_v59 = vadd.f32 %v2819_v47, %v6564_v10 }
 0x6c5   :  { %v2941_v55 = vpop.f32.mrf.mxu2 }
 0x6c6   :  { %v5896_v40 = vadd.f32 %v5877_v42, %v2941_v55  ;;  %v2970_v43 = vadd.f32 %v2932_v17, %v5917_v59 }
 0x6c8   :  { %3315 = vrot.lane.b32.xlu0 %v5896_v40, %s4403_s17  ;;  %v3927_v32 = vmul.f32 -1.442695, %v2970_v43  ;;  %v4116_v17 = vpop.eup %4115 }
 0x6ca   :  { %4117 = vpow2.f32 %v3927_v32 }
 0x6cd   :  { %v2944_v0 = vpop.f32.mrf.mxu2 }
 0x6ce   :  { %v5901_v45 = vadd.f32 %v5877_v42, %v2944_v0  ;;  %v6566_v0 = vld [vmem:[#allocation36_spill] sm:$0xff] }
 0x6d0   :  { %3317 = vrot.lane.b32.xlu1 %v5901_v45, %s4403_s17 }
 0x6d5   :  { %v2946_v4 = vpop.f32.mrf.mxu2 }
 0x6d6   :  { %v5906_v23 = vadd.f32 %v5877_v42, %v2946_v4  ;;  %v5939_v4 = vadd.f32 1.0, %v4116_v17 }
 0x6d8   :  { %3319 = vrot.lane.b32.xlu2 %v5906_v23, %s4403_s17  ;;  %4119 = vrcp.f32 %v5939_v4  ;;  %vm3054_vm1 = vweird.f32 %v5939_v4 }
 0x6dd   :  { %v2748_v2 = vpop.f32.mrf.mxu0  ;;  %v2949_v22 = vpop.f32.mrf.mxu2 }
 0x6de   :  { %v5914_v44 = vadd.f32 %v5877_v42, %v2949_v22  ;;  %v2822_v37 = vadd.f32 %v2821_v19, %v2748_v2  ;;  %v4118_v19 = vpop.eup %4117 }
 0x6df   :  { %v5943_v34 = vadd.f32 1.0, %v4118_v19  ;;  %v5957_v30 = vpop.eup %4119 }
 0x6e0   :  { %3321 = vrot.lane.b32.xlu0 %v5914_v44, %s4403_s17  ;;  %v5929_v54 = vadd.f32 %v2822_v37, %v6565_v11  ;;  %vm3055_vm0 = vweird.f32 %v5957_v30 }
 0x6e1   :  { %vm6021_vm3 = vmor %vm3054_vm1, %vm3055_vm0  ;;  %vm3069_vm4 = vweird.f32 %v5943_v34 }
 0x6e2   :  { %v2971_v28 = vadd.f32 %v2935_v60, %v5929_v54  ;;  %v2833_v60 = vpop.f32.mrf.mxu1 }
 0x6e5   :  { %v2750_v49 = vpop.f32.mrf.mxu0  ;;  %v2951_v62 = vpop.f32.mrf.mxu2 }
 0x6e6   :  { %v5924_v1 = vadd.f32 %v5877_v42, %v2951_v62  ;;  %v2824_v7 = vadd.f32 %v2823_v29, %v2750_v49  ;;  %v3928_v29 = vmul.f32 -1.442695, %v2971_v28 }
 0x6e8   :  { %3323 = vrot.lane.b32.xlu1 %v5924_v1, %s4403_s17 }
 0x6ed   :  { %v2753_v31 = vpop.f32.mrf.mxu0  ;;  %v2954_v26 = vpop.f32.mrf.mxu2 }
 0x6ee   :  { %v2827_v39 = vadd.f32 %v2826_v16, %v2753_v31  ;;  %v5932_v55 = vadd.f32 %v5877_v42, %v2954_v26  ;;  %v6567_v16 = vld [vmem:[#allocation35_spill] sm:$0xff] }
 0x6ef   :  { %v5946_v2 = vadd.f32 %v2824_v7, %v6567_v16  ;;  %v5971_v7 = vpop.f32.mrf.mxu1 }
 0x6f0   :  { %v5935_v9 = vadd.f32 %v2827_v39, %v6566_v0  ;;  %3325 = vrot.lane.b32.xlu2 %v5932_v55, %s4403_s17 }
 0x6f2   :  { %v2973_v47 = vadd.f32 %v2940_v35, %v5935_v9  ;;  %v2972_v35 = vadd.f32 %v5888_v5, %v5946_v2  ;;  %v3050_v5 = vmul.f32 %v5957_v30, %v5939_v4 }
 0x6f4   :  { %v3930_v22 = vmul.f32 -1.442695, %v2973_v47  ;;  %v3929_v62 = vmul.f32 -1.442695, %v2972_v35  ;;  %v3051_v28 = vsub.f32 1.0, %v3050_v5  ;;  %v6568_v47 = vld [vmem:[#allocation37_spill] sm:$0xff] }
 0x6f5   :  { %v2755_v10 = vpop.f32.mrf.mxu0  ;;  %v2956_v13 = vpop.f32.mrf.mxu2 }
 0x6f6   :  { %4121 = vpow2.f32 %v3930_v22  ;;  %v5950_v43 = vadd.f32 %v5877_v42, %v2956_v13  ;;  %v2829_v39 = vadd.f32 %v2828_v48, %v2755_v10 }
 0x6f7   :  { %4123 = vrcp.f32 %v5943_v34 }
 0x6f8   :  { %3327 = vrot.lane.b32.xlu0 %v5950_v43, %s4403_s17  ;;  %4125 = vpow2.f32 %v3928_v29  ;;  %v5978_v16 = vadd.f32 %v2829_v39, %v6568_v47  ;;  %v6569_v47 = vld [vmem:[#allocation40_spill] sm:$0xff] }
 0x6f9   :  { %4127 = vpow2.f32 %v3929_v62  ;;  %v3052_v62 = vmul.f32 %v5957_v30, %v3051_v28 }
 0x6fa   :  { %v2974_v39 = vadd.f32 %v5896_v40, %v5978_v16 }
 0x6fc   :  { %v4122_v49 = vpop.eup %4121 }
 0x6fd   :  { %v5959_v32 = vadd.f32 1.0, %v4122_v49  ;;  %v2758_v37 = vpop.f32.mrf.mxu0  ;;  %v2959_v11 = vpop.f32.mrf.mxu2 }
 0x6fe   :  { %v5961_v31 = vpop.eup %4123  ;;  %v5964_v26 = vadd.f32 %v5877_v42, %v2959_v11  ;;  %v2832_v11 = vadd.f32 %v2831_v52, %v2758_v37  ;;  %v3053_v52 = vadd.f32 %v5957_v30, %v3052_v62  ;;  %v6005_v37 = vpop.f32.mrf.mxu1 }
 0x6ff   :  { %v4126_v17 = vpop.eup %4125  ;;  %4129 = vrcp.f32 %v5959_v32  ;;  %v3065_v19 = vmul.f32 %v5961_v31, %v5943_v34  ;;  %vm3070_vm15 = vweird.f32 %v5961_v31  ;;  %vm3114_vm9 = vweird.f32 %v5959_v32 }
 0x700   :  { %3329 = vrot.lane.b32.xlu1 %v5964_v26, %s4403_s17  ;;  %v5973_v0 = vadd.f32 1.0, %v4126_v17  ;;  %v4128_v13 = vpop.eup %4127  ;;  %v3057_v46 = vsel %vm6021_vm3, %v5957_v30, %v3053_v52  ;;  %vm3071_vm5 = vmor %vm3069_vm4, %vm3070_vm15 }
 0x701   :  { %v3066_v35 = vsub.f32 1.0, %v3065_v19  ;;  %v5992_v5 = vadd.f32 1.0, %v4128_v13 }
 0x702   :  { %4131 = vrcp.f32 %v5973_v0  ;;  %vm3084_vm13 = vweird.f32 %v5973_v0 }
 0x703   :  { %4133 = vrcp.f32 %v5992_v5  ;;  %vm3099_vm15 = vweird.f32 %v5992_v5 }
 0x705   :  { %v2760_v22 = vpop.f32.mrf.mxu0  ;;  %v2961_v29 = vpop.f32.mrf.mxu2 }
 0x706   :  { %v2834_v49 = vadd.f32 %v2833_v60, %v2760_v22  ;;  %v5982_v48 = vadd.f32 %v5877_v42, %v2961_v29  ;;  %v5984_v10 = vpop.eup %4129  ;;  %v3067_v60 = vmul.f32 %v5961_v31, %v3066_v35  ;;  %v6008_v22 = vadd.f32 %v2832_v11, %v6569_v47 }
 0x707   :  { %v3110_v28 = vmul.f32 %v5984_v10, %v5959_v32  ;;  %v3060_v29 = vand.u32 2147483648, %v5939_v4  ;;  %vm3115_vm8 = vweird.f32 %v5984_v10 }
 0x708   :  { %v5988_v17 = vadd.f32 %v2834_v49, %v5267_v25  ;;  %3331 = vrot.lane.b32.xlu2 %v5982_v48, %s4403_s17  ;;  %v6003_v25 = vpop.eup %4131  ;;  %v3058_v49 = vand.u32 2147483647, %v5939_v4  ;;  %v3068_v62 = vadd.f32 %v5961_v31, %v3067_v60  ;;  %v2975_v60 = vadd.f32 %v5901_v45, %v6008_v22  ;;  %vm3116_vm10 = vmor %vm3114_vm9, %vm3115_vm8 }
 0x709   :  { %v3111_v47 = vsub.f32 1.0, %v3110_v28  ;;  %v3080_v4 = vmul.f32 %v6003_v25, %v5973_v0  ;;  %v3061_v28 = vor.u32 1.1754944e-38, %v3060_v29  ;;  %vm3085_vm11 = vweird.f32 %v6003_v25 }
 0x70a   :  { %v2976_v19 = vadd.f32 %v5906_v23, %v5988_v17  ;;  %v3931_v23 = vmul.f32 -1.442695, %v2974_v39  ;;  %v3075_v39 = vand.u32 2147483648, %v5943_v34  ;;  %vm3059_vm6 = vcmp.eq.f32.partialorder %v3058_v49, 8.507059e+37  ;;  %vm3086_vm14 = vmor %vm3084_vm13, %vm3085_vm11 }
 0x70b   :  { %v3072_v30 = vsel %vm3071_vm5, %v5961_v31, %v3068_v62  ;;  %v3112_v45 = vmul.f32 %v5984_v10, %v3111_v47  ;;  %v3081_v51 = vsub.f32 1.0, %v3080_v4 }
 0x70c   :  { %v3933_v40 = vmul.f32 -1.442695, %v2976_v19  ;;  %v6043_v19 = vpop.eup %4133  ;;  %v3076_v6 = vor.u32 1.1754944e-38, %v3075_v39 }
 0x70d   :  { %v2763_v13 = vpop.f32.mrf.mxu0  ;;  %v2964_v35 = vpop.f32.mrf.mxu2  ;;  %v3113_v39 = vadd.f32 %v5984_v10, %v3112_v45  ;;  %vm3100_vm1 = vweird.f32 %v6043_v19 }
 0x70e   :  { %4135 = vpow2.f32 %v3933_v40  ;;  %v6017_v11 = vadd.f32 %v5877_v42, %v2964_v35  ;;  %v3073_v40 = vand.u32 2147483647, %v5943_v34  ;;  %v6040_v35 = vsel %vm3059_vm6, %v3061_v28, %v3057_v46  ;;  %v3308_v34 = vpop.permute.xlu2 %3307  ;;  %vm3101_vm3 = vmor %vm3099_vm15, %vm3100_vm1 }
 0x70f   :  { %4137 = vpow2.f32 %v3931_v23  ;;  %v3932_v23 = vmul.f32 -1.442695, %v2975_v60  ;;  %v2841_v60 = vpop.f32.mrf.mxu1  ;;  %v2837_v28 = vadd.f32 %v5971_v7, %v2763_v13 }
 0x710   :  { %3333 = vrot.lane.b32.xlu0 %v6017_v11, %s4403_s17  ;;  %vm3074_vm7 = vcmp.eq.f32.partialorder %v3073_v40, 8.507059e+37  ;;  %v3082_v40 = vmul.f32 %v6003_v25, %v3081_v51  ;;  %v3117_v51 = vsel %vm3116_vm10, %v5984_v10, %v3113_v39  ;;  %v3088_v10 = vand.u32 2147483647, %v5973_v0 }
 0x711   :  { %v6046_v57 = vsel %vm3074_vm7, %v3076_v6, %v3072_v30  ;;  %v3120_v6 = vand.u32 2147483648, %v5959_v32 }
 0x712   :  { %v3306_v52 = vpop.permute.xlu1 %3305  ;;  %v3354_v46 = vmul.f32 %v3308_v34, %v6046_v57  ;;  %v3083_v34 = vadd.f32 %v6003_v25, %v3082_v40  ;;  %vm3089_vm0 = vcmp.eq.f32.partialorder %v3088_v10, 8.507059e+37 }
 0x713   :  { %v3353_v41 = vmul.f32 %v3306_v52, %v6040_v35  ;;  %v3121_v52 = vor.u32 1.1754944e-38, %v3120_v6 }
 0x714   :  { %v4136_v29 = vpop.eup %4135  ;;  %v3087_v40 = vsel %vm3086_vm14, %v6003_v25, %v3083_v34 }
 0x715   :  { %v6048_v49 = vadd.f32 1.0, %v4136_v29  ;;  %v2765_v31 = vpop.f32.mrf.mxu0  ;;  %v2966_v62 = vpop.f32.mrf.mxu2  ;;  %3385 = vrot.lane.b32.xlu2 %v3353_v41, %s4403_s17  ;;  %v3095_v41 = vmul.f32 %v6043_v19, %v5992_v5 }
 0x716   :  { %v6053_v47 = vadd.f32 %v5877_v42, %v2966_v62  ;;  %v4138_v4 = vpop.eup %4137  ;;  %v3118_v42 = vand.u32 2147483647, %v5959_v32  ;;  %v6572_v32 = vld [vmem:[#allocation39_spill] sm:$0xff] }
 0x717   :  { %4139 = vrcp.f32 %v6048_v49  ;;  %v6068_v30 = vadd.f32 1.0, %v4138_v4  ;;  %v3096_v29 = vsub.f32 1.0, %v3095_v41  ;;  %vm3159_vm6 = vweird.f32 %v6048_v49 }
 0x718   :  { %4141 = vpow2.f32 %v3932_v23  ;;  %3335 = vrot.lane.b32.xlu1 %v6053_v47, %s4403_s17  ;;  %3387 = vrot.lane.b32.xlu0 %v3354_v46, %s4403_s17  ;;  %vm3119_vm12 = vcmp.eq.f32.partialorder %v3118_v42, 8.507059e+37  ;;  %v3090_v23 = vand.u32 2147483648, %v5973_v0  ;;  %v6077_v46 = vadd.f32 %v2837_v28, %v6572_v32 }
 0x719   :  { %v6079_v7 = vsel %vm3119_vm12, %v3121_v52, %v3117_v51  ;;  %4143 = vrcp.f32 %v6068_v30  ;;  %v3097_v41 = vmul.f32 %v6043_v19, %v3096_v29  ;;  %v2839_v28 = vadd.f32 %v6005_v37, %v2765_v31  ;;  %v2843_v52 = vpop.f32.mrf.mxu1 }
 0x71a   :  { %v3314_v45 = vpop.permute.xlu2 %3313  ;;  %v3091_v0 = vor.u32 1.1754944e-38, %v3090_v23  ;;  %vm3129_vm10 = vweird.f32 %v6068_v30 }
 0x71b   :  { %v3357_v4 = vmul.f32 %v3314_v45, %v6079_v7  ;;  %v6108_v23 = vadd.f32 %v2839_v28, %v5283_v27 }
 0x71c   :  { %v6100_v34 = vsel %vm3089_vm0, %v3091_v0, %v3087_v40 }
 0x71d   :  { %v6074_v62 = vpop.eup %4139  ;;  %v2768_v13 = vpop.f32.mrf.mxu0  ;;  %v2978_v40 = vadd.f32 %v5924_v1, %v6108_v23  ;;  %v3165_v1 = vand.u32 2147483648, %v6048_v49 }
 0x71e   :  { %v4142_v39 = vpop.eup %4141  ;;  %v2842_v6 = vadd.f32 %v2841_v60, %v2768_v13  ;;  %v3155_v42 = vmul.f32 %v6074_v62, %v6048_v49  ;;  %v2977_v60 = vadd.f32 %v5914_v44, %v6077_v46  ;;  %v3105_v13 = vand.u32 2147483648, %v5992_v5 }
 0x71f   :  { %v6094_v32 = vadd.f32 1.0, %v4142_v39  ;;  %v6105_v29 = vpop.eup %4143  ;;  %v3103_v39 = vand.u32 2147483647, %v5992_v5  ;;  %vm3160_vm5 = vweird.f32 %v6074_v62 }
 0x720   :  { %v6091_v51 = vadd.f32 %v2842_v6, %v5291_v58  ;;  %3393 = vrot.lane.b32.xlu0 %v3357_v4, %s4403_s17  ;;  %v3098_v58 = vadd.f32 %v6043_v19, %v3097_v41  ;;  %v3156_v31 = vsub.f32 1.0, %v3155_v42  ;;  %v3125_v6 = vmul.f32 %v6105_v29, %v6068_v30  ;;  %vm3161_vm7 = vmor %vm3159_vm6, %vm3160_vm5 }
 0x721   :  { %4145 = vrcp.f32 %v6094_v32  ;;  %v3106_v41 = vor.u32 1.1754944e-38, %v3105_v13  ;;  %vm3104_vm4 = vcmp.eq.f32.partialorder %v3103_v39, 8.507059e+37  ;;  %v2846_v5 = vpop.f32.mrf.mxu1  ;;  %vm3130_vm9 = vweird.f32 %v6105_v29 }
 0x722   :  { %v2979_v25 = vadd.f32 %v5932_v55, %v6091_v51  ;;  %v3310_v45 = vpop.permute.xlu0 %3309  ;;  %v3934_v55 = vmul.f32 -1.442695, %v2977_v60  ;;  %v3102_v4 = vsel %vm3101_vm3, %v6043_v19, %v3098_v58  ;;  %v3157_v27 = vmul.f32 %v6074_v62, %v3156_v31  ;;  %vm3131_vm11 = vmor %vm3129_vm10, %vm3130_vm9 }
 0x723   :  { %v3355_v37 = vmul.f32 %v3310_v45, %v6100_v34  ;;  %v6121_v42 = vsel %vm3104_vm4, %v3106_v41, %v3102_v4  ;;  %vm3144_vm14 = vweird.f32 %v6094_v32 }
 0x724   :  { %v3936_v44 = vmul.f32 -1.442695, %v2979_v25  ;;  %v3158_v19 = vadd.f32 %v6074_v62, %v3157_v27  ;;  %v3126_v25 = vsub.f32 1.0, %v3125_v6  ;;  %v3166_v27 = vor.u32 1.1754944e-38, %v3165_v1 }
 0x725   :  { %v2770_v10 = vpop.f32.mrf.mxu0  ;;  %3389 = vrot.lane.b32.xlu1 %v3355_v37, %s4403_s17  ;;  %v3935_v37 = vmul.f32 -1.442695, %v2978_v40 }
 0x726   :  { %4147 = vpow2.f32 %v3936_v44  ;;  %v3163_v44 = vand.u32 2147483647, %v6048_v49  ;;  %v3127_v39 = vmul.f32 %v6105_v29, %v3126_v25  ;;  %v2844_v6 = vadd.f32 %v2843_v52, %v2770_v10 }
 0x727   :  { %4149 = vpow2.f32 %v3934_v55  ;;  %v6123_v0 = vpop.eup %4145  ;;  %v3162_v55 = vsel %vm3161_vm7, %v6074_v62, %v3158_v19  ;;  %v3135_v19 = vand.u32 2147483648, %v6068_v30 }
 0x728   :  { %v3140_v4 = vmul.f32 %v6123_v0, %v6094_v32  ;;  %vm3164_vm8 = vcmp.eq.f32.partialorder %v3163_v44, 8.507059e+37  ;;  %v6150_v52 = vadd.f32 %v2844_v6, %v5316_v20  ;;  %vm3145_vm13 = vweird.f32 %v6123_v0 }
 0x729   :  { %v6141_v41 = vsel %vm3164_vm8, %v3166_v27, %v3162_v55  ;;  %vm3146_vm0 = vmor %vm3144_vm14, %vm3145_vm13 }
 0x72a   :  { %v3312_v28 = vpop.permute.xlu1 %3311  ;;  %v3141_v62 = vsub.f32 1.0, %v3140_v4  ;;  %v3136_v4 = vor.u32 1.1754944e-38, %v3135_v19 }
 0x72b   :  { %v3356_v60 = vmul.f32 %v3312_v28, %v6121_v42 }
 0x72c   :  { %v4148_v45 = vpop.eup %4147  ;;  %v3142_v55 = vmul.f32 %v6123_v0, %v3141_v62 }
 0x72d   :  { %v6129_v58 = vadd.f32 1.0, %v4148_v45  ;;  %v2773_v31 = vpop.f32.mrf.mxu0  ;;  %3391 = vrot.lane.b32.xlu2 %v3356_v60, %s4403_s17  ;;  %v4150_v13 = vpop.eup %4149  ;;  %v3128_v60 = vadd.f32 %v6105_v29, %v3127_v39 }
 0x72e   :  { %v6139_v40 = vadd.f32 1.0, %v4150_v13  ;;  %v2848_v45 = vpop.f32.mrf.mxu1  ;;  %v2847_v6 = vadd.f32 %v2846_v5, %v2773_v31  ;;  %v3143_v62 = vadd.f32 %v6123_v0, %v3142_v55  ;;  %v3148_v31 = vand.u32 2147483647, %v6094_v32 }
 0x72f   :  { %4151 = vrcp.f32 %v6129_v58  ;;  %v3132_v13 = vsel %vm3131_vm11, %v6105_v29, %v3128_v60  ;;  %vm3204_vm3 = vweird.f32 %v6129_v58 }
 0x730   :  { %4153 = vpow2.f32 %v3935_v37  ;;  %v3133_v37 = vand.u32 2147483647, %v6068_v30  ;;  %v2980_v30 = vadd.f32 %v5950_v43, %v6150_v52  ;;  %v3150_v43 = vand.u32 2147483648, %v6094_v32 }
 0x731   :  { %4155 = vrcp.f32 %v6139_v40  ;;  %v6180_v5 = vadd.f32 %v2847_v6, %v5344_v15  ;;  %vm3149_vm1 = vcmp.eq.f32.partialorder %v3148_v31, 8.507059e+37  ;;  %vm3174_vm7 = vweird.f32 %v6139_v40 }
 0x732   :  { %v3320_v49 = vpop.permute.xlu2 %3319  ;;  %vm3134_vm12 = vcmp.eq.f32.partialorder %v3133_v37, 8.507059e+37 }
 0x733   :  { %v3360_v28 = vmul.f32 %v3320_v49, %v6141_v41  ;;  %v6169_v29 = vsel %vm3134_vm12, %v3136_v4, %v3132_v13  ;;  %v2981_v13 = vadd.f32 %v5964_v26, %v6180_v5  ;;  %v3208_v26 = vand.u32 2147483647, %v6129_v58 }
 0x735   :  { %v6147_v25 = vpop.eup %4151  ;;  %v2775_v10 = vpop.f32.mrf.mxu0  ;;  %3399 = vrot.lane.b32.xlu0 %v3360_v28, %s4403_s17  ;;  %vm3209_vm5 = vcmp.eq.f32.partialorder %v3208_v26, 8.507059e+37 }
 0x736   :  { %v4154_v1 = vpop.eup %4153  ;;  %v2849_v44 = vadd.f32 %v2848_v45, %v2775_v10  ;;  %v3200_v20 = vmul.f32 %v6147_v25, %v6129_v58  ;;  %v3147_v10 = vsel %vm3146_vm0, %v6123_v0, %v3143_v62  ;;  %vm3205_vm15 = vweird.f32 %v6147_v25  ;;  %v2851_v62 = vpop.f32.mrf.mxu1 }
 0x737   :  { %v6163_v27 = vadd.f32 1.0, %v4154_v1  ;;  %v6174_v19 = vpop.eup %4155  ;;  %vm3206_vm4 = vmor %vm3204_vm3, %vm3205_vm15 }
 0x738   :  { %v6161_v39 = vadd.f32 %v2849_v44, %v5248_v56  ;;  %v3201_v56 = vsub.f32 1.0, %v3200_v20  ;;  %v3170_v1 = vmul.f32 %v6174_v19, %v6139_v40  ;;  %v3151_v44 = vor.u32 1.1754944e-38, %v3150_v43 }
 0x739   :  { %4157 = vrcp.f32 %v6163_v27  ;;  %vm3175_vm6 = vweird.f32 %v6174_v19  ;;  %vm3189_vm11 = vweird.f32 %v6163_v27 }
 0x73a   :  { %v2982_v49 = vadd.f32 %v5982_v48, %v6161_v39  ;;  %v3316_v28 = vpop.permute.xlu0 %3315  ;;  %v3937_v48 = vmul.f32 -1.442695, %v2980_v30  ;;  %v3202_v37 = vmul.f32 %v6147_v25, %v3201_v56  ;;  %v6190_v55 = vsel %vm3149_vm1, %v3151_v44, %v3147_v10  ;;  %vm3176_vm8 = vmor %vm3174_vm7, %vm3175_vm6 }
 0x73b   :  { %v3358_v60 = vmul.f32 %v3316_v28, %v6169_v29  ;;  %v3171_v4 = vsub.f32 1.0, %v3170_v1  ;;  %v3938_v28 = vmul.f32 -1.442695, %v2981_v13 }
 0x73c   :  { %v3939_v45 = vmul.f32 -1.442695, %v2982_v49  ;;  %v3203_v0 = vadd.f32 %v6147_v25, %v3202_v37  ;;  %v3210_v49 = vand.u32 2147483648, %v6129_v58 }
 0x73d   :  { %3395 = vrot.lane.b32.xlu1 %v3358_v60, %s4403_s17  ;;  %v2778_v6 = vpop.f32.mrf.mxu0  ;;  %v3172_v43 = vmul.f32 %v6174_v19, %v3171_v4  ;;  %v3178_v4 = vand.u32 2147483647, %v6139_v40 }
 0x73e   :  { %4159 = vpow2.f32 %v3939_v45  ;;  %v3207_v45 = vsel %vm3206_vm4, %v6147_v25, %v3203_v0  ;;  %v3211_v31 = vor.u32 1.1754944e-38, %v3210_v49  ;;  %v2852_v10 = vadd.f32 %v2851_v62, %v2778_v6 }
 0x73f   :  { %4161 = vpow2.f32 %v3937_v48  ;;  %v6192_v20 = vpop.eup %4157  ;;  %v3173_v13 = vadd.f32 %v6174_v19, %v3172_v43  ;;  %vm3179_vm9 = vcmp.eq.f32.partialorder %v3178_v4, 8.507059e+37 }
 0x740   :  { %v3185_v48 = vmul.f32 %v6192_v20, %v6163_v27  ;;  %v6210_v1 = vsel %vm3209_vm5, %v3211_v31, %v3207_v45  ;;  %v6219_v0 = vadd.f32 %v2852_v10, %v5360_v38  ;;  %v2853_v38 = vpop.f32.mrf.mxu1  ;;  %vm3190_vm10 = vweird.f32 %v6192_v20 }
 0x741   :  { %v3177_v49 = vsel %vm3176_vm8, %v6174_v19, %v3173_v13  ;;  %vm3191_vm12 = vmor %vm3189_vm11, %vm3190_vm10 }
 0x742   :  { %v3318_v15 = vpop.permute.xlu1 %3317  ;;  %v3186_v25 = vsub.f32 1.0, %v3185_v48 }
 0x743   :  { %v3359_v32 = vmul.f32 %v3318_v15, %v6190_v55  ;;  %v3180_v15 = vand.u32 2147483648, %v6139_v40 }
 0x744   :  { %v4160_v30 = vpop.eup %4159 }
 0x745   :  { %v6198_v60 = vadd.f32 1.0, %v4160_v30  ;;  %3397 = vrot.lane.b32.xlu2 %v3359_v32, %s4403_s17  ;;  %v4162_v56 = vpop.eup %4161  ;;  %v2780_v30 = vpop.f32.mrf.mxu0  ;;  %v3181_v62 = vor.u32 1.1754944e-38, %v3180_v15 }
 0x746   :  { %v6208_v37 = vadd.f32 1.0, %v4162_v56  ;;  %v2983_v56 = vadd.f32 %v6017_v11, %v6219_v0  ;;  %v2854_v45 = vadd.f32 %v2853_v38, %v2780_v30 }
 0x747   :  { %4163 = vrcp.f32 %v6198_v60  ;;  %v6233_v48 = vsel %vm3179_vm9, %v3181_v62, %v3177_v49  ;;  %v3255_v62 = vand.u32 2147483648, %v6198_v60  ;;  %vm3249_vm0 = vweird.f32 %v6198_v60 }
 0x748   :  { %4165 = vpow2.f32 %v3938_v28  ;;  %v3187_v28 = vmul.f32 %v6192_v20, %v3186_v25  ;;  %v3940_v13 = vmul.f32 -1.442695, %v2983_v56  ;;  %v6240_v11 = vadd.f32 %v2854_v45, %v5407_v36 }
 0x749   :  { %4167 = vrcp.f32 %v6208_v37  ;;  %v3193_v25 = vand.u32 2147483647, %v6163_v27  ;;  %vm3219_vm4 = vweird.f32 %v6208_v37 }
 0x74a   :  { %v3326_v58 = vpop.permute.xlu2 %3325  ;;  %v3188_v19 = vadd.f32 %v6192_v20, %v3187_v28  ;;  %v2984_v36 = vadd.f32 %v6053_v47, %v6240_v11  ;;  %v3253_v47 = vand.u32 2147483647, %v6198_v60 }
 0x74b   :  { %v3363_v44 = vmul.f32 %v3326_v58, %v6210_v1  ;;  %vm3194_vm13 = vcmp.eq.f32.partialorder %v3193_v25, 8.507059e+37 }
 0x74c   :  { %v3192_v15 = vsel %vm3191_vm12, %v6192_v20, %v3188_v19  ;;  %v3941_v56 = vmul.f32 -1.442695, %v2984_v36  ;;  %vm3254_vm15 = vcmp.eq.f32.partialorder %v3253_v47, 8.507059e+37 }
 0x74d   :  { %v6216_v32 = vpop.eup %4163  ;;  %3405 = vrot.lane.b32.xlu0 %v3363_v44, %s4403_s17  ;;  %v3195_v44 = vand.u32 2147483648, %v6163_v27 }
 0x74e   :  { %v4166_v6 = vpop.eup %4165  ;;  %v3245_v26 = vmul.f32 %v6216_v32, %v6198_v60  ;;  %vm3250_vm14 = vweird.f32 %v6216_v32  ;;  %v3225_v60 = vand.u32 2147483648, %v6208_v37 }
 0x74f   :  { %v6231_v40 = vadd.f32 1.0, %v4166_v6  ;;  %v4168_v58 = vpop.eup %4167  ;;  %v3196_v6 = vor.u32 1.1754944e-38, %v3195_v44  ;;  %vm3251_vm1 = vmor %vm3249_vm0, %vm3250_vm14 }
 0x750   :  { %v3246_v10 = vsub.f32 1.0, %v3245_v26  ;;  %v3215_v30 = vmul.f32 %v4168_v58, %v6208_v37  ;;  %vm3220_vm3 = vweird.f32 %v4168_v58 }
 0x751   :  { %4169 = vrcp.f32 %v6231_v40  ;;  %v6251_v49 = vsel %vm3194_vm13, %v3196_v6, %v3192_v15  ;;  %vm3221_vm5 = vmor %vm3219_vm4, %vm3220_vm3  ;;  %vm3234_vm8 = vweird.f32 %v6231_v40 }
 0x752   :  { %v3322_v43 = vpop.permute.xlu0 %3321  ;;  %v3247_v4 = vmul.f32 %v6216_v32, %v3246_v10  ;;  %4171 = vpow2.f32 %v3940_v13  ;;  %v3216_v20 = vsub.f32 1.0, %v3215_v30  ;;  %v3256_v10 = vor.u32 1.1754944e-38, %v3255_v62 }
 0x753   :  { %v3361_v31 = vmul.f32 %v3322_v43, %v6233_v48  ;;  %4173 = vpow2.f32 %v3941_v56 }
 0x754   :  { %v3248_v26 = vadd.f32 %v6216_v32, %v3247_v4 }
 0x755   :  { %3401 = vrot.lane.b32.xlu1 %v3361_v31, %s4403_s17  ;;  %v3217_v31 = vmul.f32 %v4168_v58, %v3216_v20 }
 0x756   :  { %v3252_v43 = vsel %vm3251_vm1, %v6216_v32, %v3248_v26  ;;  %v3223_v32 = vand.u32 2147483647, %v6208_v37  ;;  %v3238_v37 = vand.u32 2147483647, %v6231_v40 }
 0x757   :  { %v4170_v38 = vpop.eup %4169  ;;  %v6262_v13 = vsel %vm3254_vm15, %v3256_v10, %v3252_v43  ;;  %v3218_v4 = vadd.f32 %v4168_v58, %v3217_v31  ;;  %v3240_v43 = vand.u32 2147483648, %v6231_v40 }
 0x758   :  { %v4172_v45 = vpop.eup %4171  ;;  %v3230_v19 = vmul.f32 %v4170_v38, %v6231_v40  ;;  %vm3224_vm6 = vcmp.eq.f32.partialorder %v3223_v32, 8.507059e+37  ;;  %vm3235_vm7 = vweird.f32 %v4170_v38  ;;  %vm3239_vm10 = vcmp.eq.f32.partialorder %v3238_v37, 8.507059e+37 }
 0x759   :  { %v3047_v44 = vadd.f32 1.0, %v4172_v45  ;;  %v4174_v6 = vpop.eup %4173  ;;  %v3222_v36 = vsel %vm3221_vm5, %v4168_v58, %v3218_v4  ;;  %vm3236_vm9 = vmor %vm3234_vm8, %vm3235_vm7 }
 0x75a   :  { %v3324_v28 = vpop.permute.xlu1 %3323  ;;  %v3231_v30 = vsub.f32 1.0, %v3230_v19  ;;  %v3048_v26 = vadd.f32 1.0, %v4174_v6 }
 0x75b   :  { %v3362_v27 = vmul.f32 %v3324_v28, %v6251_v49  ;;  %4175 = vrcp.f32 %v3047_v44  ;;  %vm3264_vm12 = vweird.f32 %v3047_v44 }
 0x75c   :  { %v3232_v28 = vmul.f32 %v4170_v38, %v3231_v30  ;;  %4177 = vrcp.f32 %v3048_v26  ;;  %vm3279_vm1 = vweird.f32 %v3048_v26 }
 0x75d   :  { %3403 = vrot.lane.b32.xlu2 %v3362_v27, %s4403_s17  ;;  %v3226_v27 = vor.u32 1.1754944e-38, %v3225_v60 }
 0x75e   :  { %v3233_v47 = vadd.f32 %v4170_v38, %v3232_v28 }
 0x75f   :  { %v6269_v20 = vsel %vm3224_vm6, %v3226_v27, %v3222_v36  ;;  %v3270_v27 = vand.u32 2147483648, %v3047_v44 }
 0x760   :  { %v3237_v31 = vsel %vm3236_vm9, %v4170_v38, %v3233_v47 }
 0x761   :  { %v4176_v45 = vpop.eup %4175 }
 0x762   :  { %v3332_v25 = vpop.permute.xlu2 %3331  ;;  %v3260_v19 = vmul.f32 %v4176_v45, %v3047_v44  ;;  %v4178_v32 = vpop.eup %4177  ;;  %vm3265_vm11 = vweird.f32 %v4176_v45 }
 0x763   :  { %v3366_v15 = vmul.f32 %v3332_v25, %v6262_v13  ;;  %v3241_v25 = vor.u32 1.1754944e-38, %v3240_v43  ;;  %v3275_v6 = vmul.f32 %v4178_v32, %v3048_v26  ;;  %vm3266_vm13 = vmor %vm3264_vm12, %vm3265_vm11  ;;  %v3271_v43 = vor.u32 1.1754944e-38, %v3270_v27 }
 0x764   :  { %v3261_v60 = vsub.f32 1.0, %v3260_v19  ;;  %vm3280_vm0 = vweird.f32 %v4178_v32  ;;  %v3285_v19 = vand.u32 2147483648, %v3048_v26 }
 0x765   :  { %3411 = vrot.lane.b32.xlu0 %v3366_v15, %s4403_s17  ;;  %v6277_v4 = vsel %vm3239_vm10, %v3241_v25, %v3237_v31  ;;  %v3276_v28 = vsub.f32 1.0, %v3275_v6  ;;  %vm3281_vm15 = vmor %vm3279_vm1, %vm3280_vm0 }
 0x766   :  { %v3262_v40 = vmul.f32 %v4176_v45, %v3261_v60 }
 0x767   :  { %v3277_v47 = vmul.f32 %v4178_v32, %v3276_v28 }
 0x76a   :  { %v3328_v62 = vpop.permute.xlu0 %3327 }
 0x76b   :  { %v3364_v56 = vmul.f32 %v3328_v62, %v6269_v20  ;;  %v3268_v62 = vand.u32 2147483647, %v3047_v44 }
 0x76d   :  { %3407 = vrot.lane.b32.xlu1 %v3364_v56, %s4403_s17  ;;  %vm3269_vm14 = vcmp.eq.f32.partialorder %v3268_v62, 8.507059e+37 }
 0x76f   :  { %v3386_v58 = vpop.permute.xlu2 %3385 }
 0x770   :  { %v3433_v10 = vadd.f32 %v3386_v58, %v5911_v18  ;;  %v3263_v18 = vadd.f32 %v4176_v45, %v3262_v40 }
 0x772   :  { %4179 = vtanh.f32 %v3433_v10  ;;  %v3330_v15 = vpop.permute.xlu1 %3329  ;;  %v3267_v56 = vsel %vm3266_vm13, %v4176_v45, %v3263_v18  ;;  %v3283_v10 = vand.u32 2147483647, %v3048_v26 }
 0x773   :  { %v3365_v30 = vmul.f32 %v3330_v15, %v6277_v4  ;;  %v6286_v58 = vsel %vm3269_vm14, %v3271_v43, %v3267_v56  ;;  %v3286_v15 = vor.u32 1.1754944e-38, %v3285_v19 }
 0x774   :  { %vm3284_vm3 = vcmp.eq.f32.partialorder %v3283_v10, 8.507059e+37 }
 0x775   :  { %3409 = vrot.lane.b32.xlu2 %v3365_v30, %s4403_s17 }
 0x778   :  { %v6281_v36 = vpop.eup %4179 }
 0x779   :  { %v3465_v38 = vsub.f32 %v5538_v24, %v6281_v36  ;;  %v3278_v24 = vadd.f32 %v4178_v32, %v3277_v47 }
 0x77b   :  { %3497 = vrot.lane.b32.xlu0 %v3465_v38, %s4411_s8  ;;  %v3282_v44 = vsel %vm3281_vm15, %v4178_v32, %v3278_v24 }
 0x77c   :  { %v6291_v30 = vsel %vm3284_vm3, %v3286_v15, %v3282_v44 }
 0x782   :  { %v3334_v37 = vpop.permute.xlu0 %3333 }
 0x783   :  { %v3367_v31 = vmul.f32 %v3334_v37, %v6286_v58 }
 0x785   :  { %3413 = vrot.lane.b32.xlu1 %v3367_v31, %s4403_s17 }
 0x787   :  { %v3392_v25 = vpop.permute.xlu2 %3391 }
 0x788   :  { %v3436_v45 = vadd.f32 %v3392_v25, %v5946_v2 }
 0x78a   :  { %4181 = vtanh.f32 %v3436_v45  ;;  %v3336_v60 = vpop.permute.xlu1 %3335  ;;  %v3388_v40 = vpop.permute.xlu0 %3387 }
 0x78b   :  { %v3368_v6 = vmul.f32 %v3336_v60, %v6291_v30  ;;  %v3434_v38 = vadd.f32 %v3388_v40, %v5917_v59 }
 0x78d   :  { %4183 = vtanh.f32 %v3434_v38  ;;  %3415 = vrot.lane.b32.xlu2 %v3368_v6, %s4403_s17 }
 0x790   :  { %v6296_v26 = vpop.eup %4181 }
 0x791   :  { %v3468_v32 = vsub.f32 %v5599_v14, %v6296_v26 }
 0x792   :  { %v3394_v2 = vpop.permute.xlu0 %3393 }
 0x793   :  { %v6300_v18 = vpop.eup %4183  ;;  %v3437_v28 = vadd.f32 %v3394_v2, %v5935_v9  ;;  %3503 = vrot.lane.b32.xlu0 %v3468_v32, %s4411_s8 }
 0x794   :  { %v3466_v27 = vsub.f32 %v5557_v61, %v6300_v18 }
 0x795   :  { %4185 = vtanh.f32 %v3437_v28 }
 0x796   :  { %3499 = vrot.lane.b32.xlu1 %v3466_v27, %s4411_s8 }
 0x797   :  { %v3390_v59 = vpop.permute.xlu1 %3389 }
 0x798   :  { %v3435_v62 = vadd.f32 %v3390_v59, %v5929_v54 }
 0x79a   :  { %4187 = vtanh.f32 %v3435_v62 }
 0x79b   :  { %v6308_v56 = vpop.eup %4185 }
 0x79c   :  { %v3469_v14 = vsub.f32 %v5623_v21, %v6308_v56 }
 0x79e   :  { %3505 = vrot.lane.b32.xlu1 %v3469_v14, %s4411_s8 }
 0x79f   :  { %v3398_v9 = vpop.permute.xlu2 %3397 }
 0x7a0   :  { %v6313_v47 = vpop.eup %4187  ;;  %v3439_v43 = vadd.f32 %v3398_v9, %v6008_v22  ;;  %v6575_v9 = vld [vmem:[#allocation38_spill] sm:$0xff] }
 0x7a1   :  { %v3467_v61 = vsub.f32 %v5587_v53, %v6313_v47 }
 0x7a2   :  { %4189 = vtanh.f32 %v3439_v43 }
 0x7a3   :  { %3501 = vrot.lane.b32.xlu2 %v3467_v61, %s4411_s8 }
 0x7a7   :  { %v3400_v54 = vpop.permute.xlu0 %3399 }
 0x7a8   :  { %v6319_v37 = vpop.eup %4189  ;;  %v3440_v31 = vadd.f32 %v3400_v54, %v5988_v17 }
 0x7a9   :  { %v3471_v21 = vsub.f32 %v5659_v63, %v6319_v37 }
 0x7aa   :  { %4191 = vtanh.f32 %v3440_v31  ;;  %v6576_v31 = vld [vmem:[#allocation43_spill] sm:$0xff] }
 0x7ab   :  { %3509 = vrot.lane.b32.xlu0 %v3471_v21, %s4411_s8 }
 0x7af   :  { %v3396_v24 = vpop.permute.xlu1 %3395 }
 0x7b0   :  { %v6325_v19 = vpop.eup %4191  ;;  %v3438_v22 = vadd.f32 %v3396_v24, %v5978_v16 }
 0x7b1   :  { %v3472_v53 = vsub.f32 %v5723_v50, %v6325_v19 }
 0x7b2   :  { %4193 = vtanh.f32 %v3438_v22 }
 0x7b3   :  { %3511 = vrot.lane.b32.xlu1 %v3472_v53, %s4411_s8 }
 0x7b7   :  { %v3404_v10 = vpop.permute.xlu2 %3403 }
 0x7b8   :  { %v6331_v25 = vpop.eup %4193  ;;  %v3442_v17 = vadd.f32 %v3404_v10, %v6108_v23 }
 0x7b9   :  { %v3470_v63 = vsub.f32 %v5626_v33, %v6331_v25 }
 0x7ba   :  { %4195 = vtanh.f32 %v3442_v17 }
 0x7bb   :  { %3507 = vrot.lane.b32.xlu2 %v3470_v63, %s4411_s8 }
 0x7bf   :  { %v3406_v44 = vpop.permute.xlu0 %3405 }
 0x7c0   :  { %v6337_v45 = vpop.eup %4195  ;;  %v3443_v16 = vadd.f32 %v3406_v44, %v6091_v51 }
 0x7c1   :  { %v3474_v50 = vsub.f32 %v5702_v12, %v6337_v45 }
 0x7c2   :  { %4197 = vtanh.f32 %v3443_v16 }
 0x7c3   :  { %3515 = vrot.lane.b32.xlu0 %v3474_v50, %s4411_s8 }
 0x7c7   :  { %v3402_v15 = vpop.permute.xlu1 %3401 }
 0x7c8   :  { %v6343_v60 = vpop.eup %4197  ;;  %v3441_v23 = vadd.f32 %v3402_v15, %v6077_v46 }
 0x7c9   :  { %v3475_v33 = vsub.f32 %v5739_v3, %v6343_v60  ;;  %v6573_v3 = vld [vmem:[#allocation41_spill] sm:$0xff] }
 0x7ca   :  { %4199 = vtanh.f32 %v3441_v23 }
 0x7cb   :  { %3517 = vrot.lane.b32.xlu1 %v3475_v33, %s4411_s8 }
 0x7cf   :  { %v3410_v40 = vpop.permute.xlu2 %3409 }
 0x7d0   :  { %v6349_v6 = vpop.eup %4199  ;;  %v3445_v51 = vadd.f32 %v3410_v40, %v6180_v5 }
 0x7d1   :  { %v3473_v12 = vsub.f32 %v5692_v8, %v6349_v6  ;;  %v6574_v8 = vld [vmem:[#allocation42_spill] sm:$0xff] }
 0x7d2   :  { %4201 = vtanh.f32 %v3445_v51 }
 0x7d3   :  { %3513 = vrot.lane.b32.xlu2 %v3473_v12, %s4411_s8 }
 0x7d7   :  { %v3412_v38 = vpop.permute.xlu0 %3411 }
 0x7d8   :  { %v6355_v32 = vpop.eup %4201  ;;  %v3446_v46 = vadd.f32 %v3412_v38, %v6161_v39 }
 0x7d9   :  { %v3477_v2 = vsub.f32 %v6573_v3, %v6355_v32 }
 0x7da   :  { %4203 = vtanh.f32 %v3446_v46 }
 0x7db   :  { %3521 = vrot.lane.b32.xlu0 %v3477_v2, %s4411_s8 }
 0x7df   :  { %v3408_v28 = vpop.permute.xlu1 %3407 }
 0x7e0   :  { %v6361_v27 = vpop.eup %4203  ;;  %v3444_v5 = vadd.f32 %v3408_v28, %v6150_v52 }
 0x7e1   :  { %v3478_v59 = vsub.f32 %v6574_v8, %v6361_v27 }
 0x7e2   :  { %4205 = vtanh.f32 %v3444_v5 }
 0x7e3   :  { %3523 = vrot.lane.b32.xlu1 %v3478_v59, %s4411_s8 }
 0x7e7   :  { %v3416_v62 = vpop.permute.xlu2 %3415 }
 0x7e8   :  { %v6367_v14 = vpop.eup %4205  ;;  %v3448_v39 = vadd.f32 %v3416_v62, %v6240_v11 }
 0x7e9   :  { %v3476_v43 = vsub.f32 %v6575_v9, %v6367_v14 }
 0x7ea   :  { %4207 = vtanh.f32 %v3448_v39 }
 0x7eb   :  { %3519 = vrot.lane.b32.xlu2 %v3476_v43, %s4411_s8 }
 0x7ed   :  { %v3498_v61 = vpop.permute.xlu0 %3497 }
 0x7ee   :  { %v3545_v52 = vmul.f32 %v3498_v61, %v6040_v35  ;;  %v6577_v35 = vld [vmem:[#allocation44_spill] sm:$0xff] }
 0x7f0   :  { %v6374_v54 = vpop.eup %4207  ;;  %3577 = vrot.lane.b32.xlu1 %v3545_v52, %s4410_s6 }
 0x7f1   :  { %v3480_v21 = vsub.f32 %v6576_v31, %v6374_v54 }
 0x7f3   :  { %3527 = vrot.lane.b32.xlu0 %v3480_v21, %s4411_s8 }
 0x7f7   :  { %v3414_v24 = vpop.permute.xlu1 %3413 }
 0x7f8   :  { %v3447_v11 = vadd.f32 %v3414_v24, %v6219_v0 }
 0x7fa   :  { %4209 = vtanh.f32 %v3447_v11 }
 0x7fd   :  { %v3502_v22 = vpop.permute.xlu2 %3501 }
 0x7fe   :  { %v3547_v53 = vmul.f32 %v3502_v22, %v6100_v34 }
 0x800   :  { %v6382_v10 = vpop.eup %4209  ;;  %3581 = vrot.lane.b32.xlu0 %v3547_v53, %s4410_s6 }
 0x801   :  { %v3479_v17 = vsub.f32 %v6577_v35, %v6382_v10 }
 0x803   :  { %3525 = vrot.lane.b32.xlu2 %v3479_v17, %s4411_s8 }
 0x805   :  { %v3504_v63 = vpop.permute.xlu0 %3503 }
 0x806   :  { %v3548_v44 = vmul.f32 %v3504_v63, %v6121_v42 }
 0x808   :  { %v3500_v16 = vpop.permute.xlu1 %3499  ;;  %3583 = vrot.lane.b32.xlu1 %v3548_v44, %s4410_s6 }
 0x809   :  { %v3546_v0 = vmul.f32 %v3500_v16, %v6046_v57 }
 0x80b   :  { %3579 = vrot.lane.b32.xlu2 %v3546_v0, %s4410_s6 }
 0x810   :  { %v3506_v34 = vpop.permute.xlu1 %3505 }
 0x811   :  { %v3549_v50 = vmul.f32 %v3506_v34, %v6079_v7 }
 0x813   :  { %3585 = vrot.lane.b32.xlu2 %v3549_v50, %s4410_s6 }
 0x815   :  { %v3508_v15 = vpop.permute.xlu2 %3507 }
 0x816   :  { %v3550_v23 = vmul.f32 %v3508_v15, %v6169_v29 }
 0x818   :  { %3587 = vrot.lane.b32.xlu0 %v3550_v23, %s4410_s6 }
 0x81d   :  { %v3510_v33 = vpop.permute.xlu0 %3509 }
 0x81e   :  { %v3551_v42 = vmul.f32 %v3510_v33, %v6190_v55 }
 0x820   :  { %3589 = vrot.lane.b32.xlu1 %v3551_v42, %s4410_s6 }
 0x825   :  { %v3512_v40 = vpop.permute.xlu1 %3511 }
 0x826   :  { %v3552_v57 = vmul.f32 %v3512_v40, %v6141_v41 }
 0x828   :  { %3591 = vrot.lane.b32.xlu2 %v3552_v57, %s4410_s6 }
 0x82d   :  { %v3514_v51 = vpop.permute.xlu2 %3513 }
 0x82e   :  { %v3553_v7 = vmul.f32 %v3514_v51, %v6233_v48 }
 0x830   :  { %3593 = vrot.lane.b32.xlu0 %v3553_v7, %s4410_s6 }
 0x835   :  { %v3516_v12 = vpop.permute.xlu0 %3515 }
 0x836   :  { %v3554_v29 = vmul.f32 %v3516_v12, %v6251_v49 }
 0x838   :  { %3595 = vrot.lane.b32.xlu1 %v3554_v29, %s4410_s6 }
 0x83d   :  { %v3518_v38 = vpop.permute.xlu1 %3517 }
 0x83e   :  { %v3555_v55 = vmul.f32 %v3518_v38, %v6210_v1 }
 0x840   :  { %3597 = vrot.lane.b32.xlu2 %v3555_v55, %s4410_s6 }
 0x845   :  { %v3520_v46 = vpop.permute.xlu2 %3519 }
 0x846   :  { %v3556_v41 = vmul.f32 %v3520_v46, %v6269_v20 }
 0x848   :  { %3599 = vrot.lane.b32.xlu0 %v3556_v41, %s4410_s6 }
 0x84d   :  { %v3522_v3 = vpop.permute.xlu0 %3521 }
 0x84e   :  { %v3557_v48 = vmul.f32 %v3522_v3, %v6277_v4 }
 0x850   :  { %3601 = vrot.lane.b32.xlu1 %v3557_v48, %s4410_s6 }
 0x855   :  { %v3524_v2 = vpop.permute.xlu1 %3523 }
 0x856   :  { %v3558_v49 = vmul.f32 %v3524_v2, %v6262_v13 }
 0x858   :  { %3603 = vrot.lane.b32.xlu2 %v3558_v49, %s4410_s6 }
 0x85d   :  { %v3526_v28 = vpop.permute.xlu2 %3525 }
 0x85e   :  { %v3559_v1 = vmul.f32 %v3526_v28, %v6286_v58 }
 0x860   :  { %3605 = vrot.lane.b32.xlu0 %v3559_v1, %s4410_s6 }
 0x862   :  { %v3578_v5 = vpop.permute.xlu1 %3577 }
 0x863   :  { %v3625_v20 = vadd.f32 %v6281_v36, %v3578_v5 }
 0x865   :  { %3657 = vrot.lane.b32.xlu2 %v3625_v20, %s4403_s17  ;;  %v3528_v8 = vpop.permute.xlu0 %3527  ;;  %v3580_v59 = vpop.permute.xlu2 %3579 }
 0x866   :  { %v3560_v4 = vmul.f32 %v3528_v8, %v6291_v30  ;;  %v3626_v62 = vadd.f32 %v6300_v18, %v3580_v59 }
 0x868   :  { %3607 = vrot.lane.b32.xlu1 %v3560_v4, %s4410_s6  ;;  %3659 = vrot.lane.b32.xlu0 %v3626_v62, %s4403_s17 }
 0x86d   :  { %v3586_v13 = vpop.permute.xlu2 %3585 }
 0x86e   :  { %v3629_v58 = vadd.f32 %v6308_v56, %v3586_v13 }
 0x870   :  { %3665 = vrot.lane.b32.xlu0 %v3629_v58, %s4403_s17 }
 0x872   :  { %v3582_v39 = vpop.permute.xlu0 %3581 }
 0x873   :  { %v3627_v36 = vadd.f32 %v6313_v47, %v3582_v39 }
 0x875   :  { %3661 = vrot.lane.b32.xlu1 %v3627_v36, %s4403_s17 }
 0x87a   :  { %v3584_v9 = vpop.permute.xlu1 %3583 }
 0x87b   :  { %v3628_v43 = vadd.f32 %v6296_v26, %v3584_v9 }
 0x87d   :  { %3663 = vrot.lane.b32.xlu2 %v3628_v43, %s4403_s17 }
 0x882   :  { %v3592_v30 = vpop.permute.xlu2 %3591 }
 0x883   :  { %v3632_v18 = vadd.f32 %v6325_v19, %v3592_v30 }
 0x885   :  { %3671 = vrot.lane.b32.xlu0 %v3632_v18, %s4403_s17 }
 0x88a   :  { %v3588_v61 = vpop.permute.xlu0 %3587 }
 0x88b   :  { %v3630_v56 = vadd.f32 %v6331_v25, %v3588_v61 }
 0x88d   :  { %3667 = vrot.lane.b32.xlu1 %v3630_v56, %s4403_s17 }
 0x892   :  { %v3590_v52 = vpop.permute.xlu1 %3589 }
 0x893   :  { %v3631_v47 = vadd.f32 %v6319_v37, %v3590_v52 }
 0x895   :  { %3669 = vrot.lane.b32.xlu2 %v3631_v47, %s4403_s17 }
 0x89a   :  { %v3598_v31 = vpop.permute.xlu2 %3597 }
 0x89b   :  { %v3635_v26 = vadd.f32 %v6343_v60, %v3598_v31 }
 0x89d   :  { %3677 = vrot.lane.b32.xlu0 %v3635_v26, %s4403_s17 }
 0x8a2   :  { %v3594_v21 = vpop.permute.xlu0 %3593 }
 0x8a3   :  { %v3633_v19 = vadd.f32 %v6349_v6, %v3594_v21 }
 0x8a5   :  { %3673 = vrot.lane.b32.xlu1 %v3633_v19, %s4403_s17 }
 0x8aa   :  { %v3596_v24 = vpop.permute.xlu1 %3595 }
 0x8ab   :  { %v3634_v25 = vadd.f32 %v6337_v45, %v3596_v24 }
 0x8ad   :  { %3675 = vrot.lane.b32.xlu2 %v3634_v25, %s4403_s17 }
 0x8b2   :  { %v3604_v11 = vpop.permute.xlu2 %3603 }
 0x8b3   :  { %v3638_v37 = vadd.f32 %v6361_v27, %v3604_v11 }
 0x8b5   :  { %3683 = vrot.lane.b32.xlu0 %v3638_v37, %s4403_s17 }
 0x8ba   :  { %v3600_v22 = vpop.permute.xlu0 %3599 }
 0x8bb   :  { %v3636_v60 = vadd.f32 %v6367_v14, %v3600_v22 }
 0x8bd   :  { %3679 = vrot.lane.b32.xlu1 %v3636_v60, %s4403_s17 }
 0x8bf   :  { %v3658_v53 = vpop.permute.xlu2 %3657 }
 0x8c0   :  { %3705 = vst.msk [vmem:[#allocation11] sm:$0xff] %vm1095_vm2, %v3658_v53 }
 0x8c2   :  { %v3602_v6 = vpop.permute.xlu1 %3601 }
 0x8c3   :  { %v3637_v35 = vadd.f32 %v6355_v32, %v3602_v6 }
 0x8c5   :  { %3681 = vrot.lane.b32.xlu2 %v3637_v35, %s4403_s17 }
 0x8d2   :  { %v3606_v45 = vpop.permute.xlu0 %3605 }
 0x8d3   :  { %v3639_v17 = vadd.f32 %v6382_v10, %v3606_v45 }
 0x8d5   :  { %3685 = vrot.lane.b32.xlu1 %v3639_v17, %s4403_s17 }
 0x8d7   :  { %v3664_v27 = vpop.permute.xlu2 %3663 }
 0x8d8   :  { %3708 = vst.msk [vmem:[#allocation11 + $0x18] sm:$0xff] %vm1095_vm2, %v3664_v27 }
 0x8da   :  { %v3608_v63 = vpop.permute.xlu1 %3607  ;;  %v3660_v14 = vpop.permute.xlu0 %3659 }
 0x8db   :  { %v3640_v44 = vadd.f32 %v6374_v54, %v3608_v63  ;;  %3706 = vst.msk [vmem:[#allocation11 + $0x8] sm:$0xff] %vm1095_vm2, %v3660_v14 }
 0x8dd   :  { %3687 = vrot.lane.b32.xlu2 %v3640_v44, %s4403_s17  ;;  %s4412_s17 = smov [#allocation11]  }
 0x8de   :  { %s3725_s20 = sshll.u32 %s4412_s17, 4  ;;  %s3726_s20 = int_to_ptr.vmem [resolvable:$true] %s3725_s20 }
 0x8e2   :  { %v3666_v16 = vpop.permute.xlu0 %3665 }
 0x8e3   :  { %3709 = vst.msk [vmem:[#allocation11 + $0x20] sm:$0xff] %vm1095_vm2, %v3666_v16 }
 0x8e7   :  { %v3662_v32 = vpop.permute.xlu1 %3661 }
 0x8e8   :  { %3707 = vst.msk [vmem:[#allocation11 + $0x10] sm:$0xff] %vm1095_vm2, %v3662_v32 }
 0x8ef   :  { %v3670_v10 = vpop.permute.xlu2 %3669 }
 0x8f0   :  { %3711 = vst.msk [vmem:[#allocation11 + $0x30] sm:$0xff] %vm1095_vm2, %v3670_v10 }
 0x8f7   :  { %v3672_v0 = vpop.permute.xlu0 %3671 }
 0x8f8   :  { %3712 = vst.msk [vmem:[#allocation11 + $0x38] sm:$0xff] %vm1095_vm2, %v3672_v0 }
 0x8ff   :  { %v3668_v34 = vpop.permute.xlu1 %3667 }
 0x900   :  { %3710 = vst.msk [vmem:[#allocation11 + $0x28] sm:$0xff] %vm1095_vm2, %v3668_v34 }
 0x907   :  { %v3676_v54 = vpop.permute.xlu2 %3675 }
 0x908   :  { %3714 = vst.msk [vmem:[#allocation11 + $0x48] sm:$0xff] %vm1095_vm2, %v3676_v54 }
 0x90f   :  { %v3678_v50 = vpop.permute.xlu0 %3677 }
 0x910   :  { %3715 = vst.msk [vmem:[#allocation11 + $0x50] sm:$0xff] %vm1095_vm2, %v3678_v50 }
 0x917   :  { %v3674_v15 = vpop.permute.xlu1 %3673 }
 0x918   :  { %3713 = vst.msk [vmem:[#allocation11 + $0x40] sm:$0xff] %vm1095_vm2, %v3674_v15 }
 0x91f   :  { %v3682_v23 = vpop.permute.xlu2 %3681 }
 0x920   :  { %3717 = vst.msk [vmem:[#allocation11 + $0x60] sm:$0xff] %vm1095_vm2, %v3682_v23 }
 0x927   :  { %v3684_v33 = vpop.permute.xlu0 %3683 }
 0x928   :  { %3718 = vst.msk [vmem:[#allocation11 + $0x68] sm:$0xff] %vm1095_vm2, %v3684_v33 }
 0x92f   :  { %v3680_v42 = vpop.permute.xlu1 %3679 }
 0x930   :  { %3716 = vst.msk [vmem:[#allocation11 + $0x58] sm:$0xff] %vm1095_vm2, %v3680_v42 }
 0x937   :  { %v3688_v40 = vpop.permute.xlu2 %3687 }
 0x938   :  { %3720 = vst.msk [vmem:[#allocation11 + $0x78] sm:$0xff] %vm1095_vm2, %v3688_v40 }
 0x947   :  { %v3686_v57 = vpop.permute.xlu1 %3685 }
 0x948   :  { %3719 = vst.msk [vmem:[#allocation11 + $0x70] sm:$0xff] %vm1095_vm2, %v3686_v57 }
 0x949   :  { %3733 = dma.vmem_to_hbm [thread:$0]  %s3726_s20, 2048, %s3728_s1, [#allocation4], %s4413_s23, %s4413_s23, %s4414_s24  }
 0x94a   :  { %4400 = dma.done.wait [#allocation4], 2048  }
 0x94b   :  { %4401 = vsyncadd [#allocation4], 4294965248 }
 0x94c   :  { %3738 = vsyncpa [#allocation3], 1 }
 0x94d   :  { %3739 = vsyncpa [#allocation6], 1 }
 0x94e   :  { %3740 = vsyncpa [#allocation9], 1 }
 0x94f   :  { %3741 = vsyncpa [#allocation4], 1 }

</bundles_post_ra>
